<compile_context>
chip_gen: v6e
topology: v6e:2x2x1
jax: 0.10.0
libtpu: 0.0.40
codegen_flags: <defaults>
</compile_context>

<pallas_src>
import functools

import jax
import jax.numpy as jnp
from jax.experimental import pallas as pl
from jax.experimental.pallas import tpu as pltpu


# ----------------------------------------------------------------------------
# Fused LM kernel (single invocation, loop runs in-kernel)
# ----------------------------------------------------------------------------
def _pnp_lm_kernel(K_ref, Rinit_ref, tinit_ref, pts_ref, fref_ref, fcat_ref,
                   out_ref, *, n_pts, c_pad, n_tiles, tile_hw, n_iters,
                   im_width, im_height, fm_h, fm_w, lambda0):
    f32 = jnp.float32
    Np = pts_ref.shape[1]

    # ---- data resident in VMEM for the whole solve --------------------------
    pts = pts_ref[...]                              # (3, Np) lane-dense points
    X = pts[0:1, :]
    Y = pts[1:2, :]
    Z = pts[2:3, :]
    fref = fref_ref[...]                            # (C_pad, Np)

    lane = jax.lax.broadcasted_iota(jnp.int32, (1, Np), 1)
    valid = lane < n_pts                            # lane-padding mask
    iota_t = jax.lax.broadcasted_iota(jnp.int32, (tile_hw, Np), 0)
    sub6 = jax.lax.broadcasted_iota(jnp.int32, (6, 1), 0)
    r3 = jax.lax.broadcasted_iota(jnp.int32, (3, 1), 0)
    c3 = jax.lax.broadcasted_iota(jnp.int32, (1, 3), 1)
    eye3 = (r3 == c3).astype(f32)
    ii6 = jax.lax.broadcasted_iota(jnp.int32, (6, 6), 0)
    jj6 = jax.lax.broadcasted_iota(jnp.int32, (6, 6), 1)
    eye6 = (ii6 == jj6).astype(f32)

    K00 = K_ref[0, 0]; K01 = K_ref[0, 1]; K02 = K_ref[0, 2]
    K10 = K_ref[1, 0]; K11 = K_ref[1, 1]; K12 = K_ref[1, 2]
    K20 = K_ref[2, 0]; K21 = K_ref[2, 1]; K22 = K_ref[2, 2]

    # ---- small helpers -------------------------------------------------------
    def basis6(k):
        return (sub6 == k).astype(f32)              # (6, 1)

    def mat3_mul(A, B):                             # 3x3 @ 3x3
        return (A[:, 0:1] * B[0:1, :] + A[:, 1:2] * B[1:2, :]
                + A[:, 2:3] * B[2:3, :])

    def mat3_vec(A, v):                             # 3x3 @ (3,1)
        return (A[:, 0:1] * v[0:1, 0:1] + A[:, 1:2] * v[1:2, 0:1]
                + A[:, 2:3] * v[2:3, 0:1])

    def sin_cos(x):
        # Range-reduced Taylor, f32-accurate on [-pi, pi]; avoids relying on
        # trig lowering inside the kernel.
        two_pi = 6.283185307179586
        xr = x - two_pi * jnp.round(x * (1.0 / two_pi))
        x2 = xr * xr
        sin_c = (-1.0 / 1307674368000.0, 1.0 / 6227020800.0,
                 -1.0 / 39916800.0, 1.0 / 362880.0, -1.0 / 5040.0,
                 1.0 / 120.0, -1.0 / 6.0, 1.0)
        cos_c = (1.0 / 20922789888000.0, -1.0 / 87178291200.0,
                 1.0 / 479001600.0, -1.0 / 3628800.0, 1.0 / 40320.0,
                 -1.0 / 720.0, 1.0 / 24.0, -0.5, 1.0)
        s = jnp.full_like(x2, sin_c[0])
        for cc in sin_c[1:]:
            s = s * x2 + cc
        s = s * xr
        c = jnp.full_like(x2, cos_c[0])
        for cc in cos_c[1:]:
            c = c * x2 + cc
        return s, c

    def so3exp(dw):                                 # (3,1) -> (3,3)
        wx = dw[0:1, 0:1]; wy = dw[1:2, 0:1]; wz = dw[2:3, 0:1]

        def rb(i):
            return (r3 == i).astype(f32)

        def cb(j):
            return (c3 == j).astype(f32)

        S = (wx * (rb(2) * cb(1) - rb(1) * cb(2))
             + wy * (rb(0) * cb(2) - rb(2) * cb(0))
             + wz * (rb(1) * cb(0) - rb(0) * cb(1)))            # skew(dw)
        th2 = jnp.sum(dw * dw, axis=0, keepdims=True)           # (1,1)
        th = jnp.sqrt(th2)
        small = th < f32(1e-7)
        inv_th = pl.reciprocal(jnp.where(small, f32(1.0), th))
        W = S * inv_th
        WW = (W[:, 0:1] * W[0:1, :] + W[:, 1:2] * W[1:2, :]
              + W[:, 2:3] * W[2:3, :])
        s, c = sin_cos(th)
        res = jnp.where(small, W, W * s + WW * (f32(1.0) - c))
        return eye3 + res

    def project(R, t):
        p3d = R[:, 0:1] * X + R[:, 1:2] * Y + R[:, 2:3] * Z + t  # (3, Np)
        px = p3d[0:1, :]; py = p3d[1:2, :]; pz = p3d[2:3, :]
        hx = K00 * px + K01 * py + K02 * pz
        hy = K10 * px + K11 * py + K12 * pz
        hz = K20 * px + K21 * py + K22 * pz
        front = hz > f32(1e-6)          # guard behind-camera / degenerate z
        inv_hz = pl.reciprocal(jnp.where(front, hz, f32(1.0)))   # exact
        u = jnp.round(hx * inv_hz).astype(jnp.int32) - 1         # column (x)
        v = jnp.round(hy * inv_hz).astype(jnp.int32) - 1         # row (y)
        mask = (valid & front & (u >= 0) & (v >= 0) &
                (u < im_width) & (v < im_height))                # (1, Np)
        row = jnp.floor(v.astype(f32) * f32(fm_h / im_height)).astype(jnp.int32)
        col = jnp.floor(u.astype(f32) * f32(fm_w / im_width)).astype(jnp.int32)
        flat = row * fm_w + col                                  # (1, Np)
        return px, py, pz, mask, flat

    def gather_cat(flat, mask):
        # [fmap; grad_x; grad_y] gather as HW-tiled bf16 one-hot MXU matmuls.
        def one_tile(kt):
            off = kt * tile_hw
            onehot = ((iota_t == (flat - off)) & mask).astype(jnp.bfloat16)
            return jnp.dot(fcat_ref[kt], onehot,
                           preferred_element_type=f32)           # (3C_pad, Np)

        if n_tiles == 1:
            return one_tile(0)

        def tile_body(kt, acc):
            return acc + one_tile(kt)

        return jax.lax.fori_loop(0, n_tiles, tile_body,
                                 jnp.zeros((3 * c_pad, Np), f32))

    def stats_full(R, t):
        px, py, pz, mask, flat = project(R, t)
        w = mask.astype(f32)
        count = jnp.sum(w, axis=1, keepdims=True)                # (1, 1)

        gathered = gather_cat(flat, mask)                        # (3C_pad, Np)
        feat = gathered[0:c_pad, :]
        gxp = gathered[c_pad:2 * c_pad, :]
        gyp = gathered[2 * c_pad:3 * c_pad, :]

        err = (feat - fref) * w                                  # (C_pad, Np)
        cost = (jnp.sum(f32(0.5) * jnp.sum(err * err, axis=0, keepdims=True),
                        axis=1, keepdims=True)
                * pl.reciprocal(jnp.maximum(count, f32(1.0))))   # (1, 1)

        ex = jnp.sum(gxp * err, axis=0, keepdims=True)           # (1, Np)
        ey = jnp.sum(gyp * err, axis=0, keepdims=True)
        Gxx = jnp.sum(gxp * gxp, axis=0, keepdims=True) * w
        Gxy = jnp.sum(gxp * gyp, axis=0, keepdims=True) * w
        Gyy = jnp.sum(gyp * gyp, axis=0, keepdims=True) * w

        z_safe = jnp.where(mask & (jnp.abs(pz) > f32(1e-12)), pz, f32(1.0))
        inv_z = pl.reciprocal(z_safe, approx=True)               # EUP slot
        a = K00 * inv_z
        b = -K00 * px * inv_z * inv_z
        c = K11 * inv_z
        d = -K11 * py * inv_z * inv_z

        # rows of J_p_T = [I3 | -skew(p)], lane-dense (6, Np)
        r0 = basis6(0) + basis6(4) * pz - basis6(5) * py
        r1 = basis6(1) - basis6(3) * pz + basis6(5) * px
        r2 = basis6(2) + basis6(3) * py - basis6(4) * px
        A0 = a * r0 + b * r2
        A1 = c * r1 + d * r2

        grad = jnp.sum(A0 * ex + A1 * ey, axis=1, keepdims=True)  # (6, 1)
        Hx = Gxx * A0 + Gxy * A1
        Hy = Gxy * A0 + Gyy * A1
        dn = (((1,), (1,)), ((), ()))
        hess = (jax.lax.dot_general(Hx, A0, dn, preferred_element_type=f32)
                + jax.lax.dot_general(Hy, A1, dn,
                                      preferred_element_type=f32))  # (6, 6)
        return grad, hess, cost, count

    def lm_solve(grad, hess, lam, lr):
        # H_lm = H + lambda * (diag(H) + 1e-9 I); unrolled Gauss-Jordan (SPD).
        Hm = hess + lam * (eye6 * hess + f32(1e-9) * eye6)
        g = grad
        for k in range(6):
            inv_p = f32(1.0) / Hm[k:k + 1, k:k + 1]              # (1, 1)
            rowH = Hm[k:k + 1, :] * inv_p                        # (1, 6)
            rowg = g[k:k + 1, :] * inv_p                         # (1, 1)
            fac = Hm[:, k:k + 1]                                 # (6, 1)
            Hm_new = Hm - fac * rowH
            g_new = g - fac * rowg
            is_k = sub6 == k
            Hm = jnp.where(is_k, rowH, Hm_new)
            g = jnp.where(is_k, rowg, g_new)
        return -lr * g                                           # (6, 1)

    # ---- initial full stats at the initial pose ------------------------------
    R0 = Rinit_ref[...]
    t0 = tinit_ref[...]
    grad0, hess0, cost0, count0 = stats_full(R0, t0)
    zero0 = count0 < f32(0.5)
    carry0 = (R0, t0, R0, t0, grad0, hess0, cost0, cost0,
              jnp.full((1, 1), lambda0, f32), jnp.ones((1, 1), f32),
              jnp.logical_not(zero0).astype(f32),   # active
              zero0.astype(f32))                    # exit-with-current-pose

    # ---- LM loop (stats of the last accepted pose are carried) --------------
    def body(_, carry):
        (R, t, Rb, tb, grad, hess, prev_cost, best_cost,
         lam, lr, active, exit_cur) = carry
        active_b = active > f32(0.5)

        delta = lm_solve(grad, hess, lam, lr)                    # (6, 1)
        nan_flag = jnp.max(jnp.where(delta == delta, f32(0.0), f32(1.0)),
                           axis=0, keepdims=True) > f32(0.5)     # torch: break
        delta = jnp.where(nan_flag, f32(0.0), delta)

        dt_ = delta[0:3, :]
        dw = delta[3:6, :]
        dr = so3exp(dw)
        R_new = mat3_mul(dr, R)
        t_new = mat3_vec(dr, t) + dt_

        # single full evaluation at the candidate pose
        grad_new, hess_new, new_cost, count_new = stats_full(R_new, t_new)
        zero_new = count_new < f32(0.5)

        step_ok = (active_b & jnp.logical_not(nan_flag)
                   & jnp.logical_not(zero_new))
        reject = new_cost > prev_cost

        lam = jnp.where(step_ok,
                        jnp.clip(lam * jnp.where(reject, f32(10.0), f32(0.1)),
                                 f32(1e-6), f32(1e4)),
                        lam)
        lr = jnp.where(step_ok,
                       jnp.where(reject,
                                 jnp.clip(f32(0.1) * lr, f32(1e-3), f32(1.0)),
                                 jnp.ones_like(lr)),
                       lr)

        accept = step_ok & jnp.logical_not(reject)
        improved = accept & (new_cost < best_cost)

        Rb = jnp.where(improved, R_new, Rb)
        tb = jnp.where(improved, t_new, tb)
        best_cost = jnp.where(improved, new_cost, best_cost)

        R = jnp.where(accept, R_new, R)
        t = jnp.where(accept, t_new, t)
        prev_cost = jnp.where(accept, new_cost, prev_cost)
        grad = jnp.where(accept, grad_new, grad)
        hess = jnp.where(accept, hess_new, hess)

        # torch: zero supported points at the candidate -> return current pose
        exit_cur = jnp.where(active_b & jnp.logical_not(nan_flag) & zero_new,
                             jnp.ones_like(exit_cur), exit_cur)
        active = jnp.where(nan_flag | zero_new, jnp.zeros_like(active), active)
        return (R, t, Rb, tb, grad, hess, prev_cost, best_cost,
                lam, lr, active, exit_cur)

    final = jax.lax.fori_loop(0, n_iters, body, carry0)
    R_cur, t_cur, Rb, tb = final[0], final[1], final[2], final[3]
    exit_cur = final[11]

    use_cur = exit_cur > f32(0.5)       # count==0 early-exit returns current
    R_out = jnp.where(use_cur, R_cur, Rb)
    t_out = jnp.where(use_cur, t_cur, tb)
    out_ref[...] = jnp.concatenate([R_out, t_out], axis=1)       # (3, 4)


# ----------------------------------------------------------------------------
# Wrapper
# ----------------------------------------------------------------------------
class SparseFeaturePnP:
    """JAX/Pallas port of featurePnP.model.sparseFeaturePnP
    (squared_loss, ratio_threshold=None, track=False)."""
    # TODO(synk): ratio-threshold test, tracking history and
    # multilevel_optimization are not ported (forward-pass default path only).

    def __init__(self, n_iters, lambda_=0.01):
        self.iterations = int(n_iters)
        self.lambda_ = float(lambda_)

    def __call__(self, pts3D, feature_ref, feature_map_query,
                 feature_grad_x, feature_grad_y, K, im_width, im_height,
                 R_init=None, t_init=None):
        C, H, W = feature_map_query.shape
        N = pts3D.shape[0]
        HW = H * W

        Np = max(128, ((N + 127) // 128) * 128)          # lane-dense points
        C_pad = max(8, ((C + 7) // 8) * 8)               # sublane-aligned C
        TILE_HW = min(512, ((HW + 127) // 128) * 128)    # gather K-tile
        HW_pad = ((HW + TILE_HW - 1) // TILE_HW) * TILE_HW
        n_tiles = HW_pad // TILE_HW

        pts_t = jnp.zeros((3, Np), jnp.float32).at[:, :N].set(
            pts3D.astype(jnp.float32).T)
        fref_t = jnp.zeros((C_pad, Np), jnp.float32).at[:C, :N].set(
            feature_ref.astype(jnp.float32).T)

        def pad_chw(x):
            x = x.reshape(C, HW).astype(jnp.float32)
            return jnp.zeros((C_pad, HW_pad), jnp.float32).at[:C, :HW].set(x)

        # single slab [fmap; grad_x; grad_y] -> (n_tiles, 3C_pad, TILE) bf16
        fcat = jnp.concatenate([pad_chw(feature_map_query),
                                pad_chw(feature_grad_x),
                                pad_chw(feature_grad_y)], axis=0)
        fcat = (fcat.reshape(3 * C_pad, n_tiles, TILE_HW)
                .transpose(1, 0, 2).astype(jnp.bfloat16))

        K_f = K.astype(jnp.float32)
        R0 = (jnp.eye(3, dtype=jnp.float32) if R_init is None
              else R_init.astype(jnp.float32))
        t0 = (jnp.array([1.0, 1.0, 0.0], jnp.float32) if t_init is None
              else t_init.astype(jnp.float32)).reshape(3, 1)

        # VMEM budget: resident slab + per-point working set (+margin), capped
        # so the request stays inside v7x's 64 MiB physical VMEM.
        fcat_bytes = n_tiles * 3 * C_pad * TILE_HW * 2
        resident = fcat_bytes + 3 * Np * 4 + C_pad * Np * 4
        work = 4 * (3 * C_pad * Np * 4) + 3 * (TILE_HW * Np * 4)
        need = resident + work + (2 << 20)
        vmem_limit = int(min(max(need, 32 << 20), 56 << 20))
        # TODO(synk): for fcat slabs that cannot fit VMEM (very large C*HW on
        # v7x), stream HW tiles from HBM (emit_pipeline / pl.ANY) instead.

        kernel = functools.partial(
            _pnp_lm_kernel, n_pts=N, c_pad=C_pad, n_tiles=n_tiles,
            tile_hw=TILE_HW, n_iters=self.iterations,
            im_width=int(im_width), im_height=int(im_height),
            fm_h=H, fm_w=W, lambda0=self.lambda_)

        out = pl.pallas_call(
            kernel,
            out_shape=jax.ShapeDtypeStruct((3, 4), jnp.float32),
            in_specs=[
                pl.BlockSpec(memory_space=pltpu.MemorySpace.SMEM),  # K (3,3)
                pl.BlockSpec(memory_space=pltpu.MemorySpace.VMEM),  # R_init
                pl.BlockSpec(memory_space=pltpu.MemorySpace.VMEM),  # t_init
                pl.BlockSpec(memory_space=pltpu.MemorySpace.VMEM),  # pts
                pl.BlockSpec(memory_space=pltpu.MemorySpace.VMEM),  # fref
                pl.BlockSpec(memory_space=pltpu.MemorySpace.VMEM),  # fcat tiles
            ],
            out_specs=pl.BlockSpec(memory_space=pltpu.MemorySpace.VMEM),
            compiler_params=pltpu.CompilerParams(
                vmem_limit_bytes=vmem_limit),
        )(K_f, R0, t0, pts_t, fref_t, fcat)

        return out[:, 0:3], out[:, 3]


# ----------------------------------------------------------------------------
if __name__ == "__main__":
    key = jax.random.PRNGKey(0)
    kp, kf, kn, kr = jax.random.split(key, 4)

    N, C, H, W = 8, 8, 16, 16
    im_width, im_height = W, H

    # 3D points roughly in front of the camera
    xy = jax.random.uniform(kp, (N, 2), minval=-0.6, maxval=0.6)
    z = jax.random.uniform(kr, (N, 1), minval=2.0, maxval=3.0)
    pts3D = jnp.concatenate([xy, z], axis=1).astype(jnp.float32)

    K = jnp.array([[8.0, 0.0, 8.0],
                   [0.0, 8.0, 8.0],
                   [0.0, 0.0, 1.0]], dtype=jnp.float32)

    feature_map_query = jax.random.normal(kf, (C, H, W), dtype=jnp.float32)
    feature_grad_y = jnp.gradient(feature_map_query, axis=1)
    feature_grad_x = jnp.gradient(feature_map_query, axis=2)

    # reference features = query features sampled at the identity-pose
    # projection (plus small noise) so the optimization has a sane target.
    h = (K @ pts3D.T).T
    u0 = jnp.round(h[:, 0] / h[:, 2]).astype(jnp.int32) - 1
    v0 = jnp.round(h[:, 1] / h[:, 2]).astype(jnp.int32) - 1
    feature_ref = feature_map_query[:, v0, u0].T
    feature_ref = feature_ref + 0.01 * jax.random.normal(kn, feature_ref.shape)

    R_init = jnp.eye(3, dtype=jnp.float32)
    t_init = jnp.array([0.02, -0.03, 0.05], dtype=jnp.float32)

    model = SparseFeaturePnP(n_iters=4, lambda_=0.01)
    R_out, t_out = model(pts3D, feature_ref, feature_map_query,
                         feature_grad_x, feature_grad_y, K,
                         im_width, im_height, R_init=R_init, t_init=t_init)
    jax.block_until_ready((R_out, t_out))
    assert R_out.shape == (3, 3) and t_out.shape == (3,)
    assert bool(jnp.all(jnp.isfinite(R_out))) and bool(jnp.all(jnp.isfinite(t_out)))
    print("KERNEL_OK")
</pallas_src>

<mosaic_0001>
module attributes {stable_mosaic.version = 11 : i64} {
  func.func @_pnp_lm_kernel(%arg0: memref<3x3xf32, #tpu.memory_space<smem>>, %arg1: memref<3x3xf32, #tpu.memory_space<vmem>>, %arg2: memref<3x1xf32, #tpu.memory_space<vmem>>, %arg3: memref<3x128xf32, #tpu.memory_space<vmem>>, %arg4: memref<8x128xf32, #tpu.memory_space<vmem>>, %arg5: memref<1x24x256xbf16, #tpu.memory_space<vmem>>, %arg6: memref<3x4xf32, #tpu.memory_space<vmem>>) attributes {dimension_semantics = [], scalar_prefetch = 0 : i64, scratch_operands = 0 : i64, tpu.core_type = #tpu.core_type<tc>} {
    %c0 = arith.constant 0 : index
    %c0_0 = arith.constant 0 : index
    %0 = vector.load %arg3[%c0, %c0_0] : memref<3x128xf32, #tpu.memory_space<vmem>>, vector<3x128xf32>
    %1 = vector.extract_strided_slice %0 {offsets = [0, 0], sizes = [1, 128], strides = [1, 1]} : vector<3x128xf32> to vector<1x128xf32>
    %2 = vector.extract_strided_slice %0 {offsets = [1, 0], sizes = [1, 128], strides = [1, 1]} : vector<3x128xf32> to vector<1x128xf32>
    %3 = vector.extract_strided_slice %0 {offsets = [2, 0], sizes = [1, 128], strides = [1, 1]} : vector<3x128xf32> to vector<1x128xf32>
    %c0_1 = arith.constant 0 : index
    %c0_2 = arith.constant 0 : index
    %4 = vector.load %arg4[%c0_1, %c0_2] : memref<8x128xf32, #tpu.memory_space<vmem>>, vector<8x128xf32>
    %5 = tpu.iota {dimensions = array<i32: 1>} : vector<1x128xi32>
    %c8_i32 = arith.constant 8 : i32
    %6 = vector.broadcast %c8_i32 : i32 to vector<1x128xi32>
    %7 = arith.cmpi slt, %5, %6 : vector<1x128xi32>
    %8 = tpu.iota {dimensions = array<i32: 0>} : vector<256x128xi32>
    %9 = tpu.iota {dimensions = array<i32: 0>} : vector<6x1xi32>
    %10 = tpu.iota {dimensions = array<i32: 0>} : vector<3x1xi32>
    %11 = tpu.iota {dimensions = array<i32: 1>} : vector<1x3xi32>
    %12 = vector.broadcast %10 : vector<3x1xi32> to vector<3x3xi32>
    %13 = vector.broadcast %11 : vector<1x3xi32> to vector<3x3xi32>
    %14 = arith.cmpi eq, %12, %13 : vector<3x3xi32>
    %15 = arith.extui %14 : vector<3x3xi1> to vector<3x3xi32>
    %16 = arith.sitofp %15 : vector<3x3xi32> to vector<3x3xf32>
    %17 = tpu.iota {dimensions = array<i32: 0>} : vector<6x6xi32>
    %18 = tpu.iota {dimensions = array<i32: 1>} : vector<6x6xi32>
    %19 = arith.cmpi eq, %17, %18 : vector<6x6xi32>
    %20 = arith.extui %19 : vector<6x6xi1> to vector<6x6xi32>
    %21 = arith.sitofp %20 : vector<6x6xi32> to vector<6x6xf32>
    %c0_3 = arith.constant 0 : index
    %c0_4 = arith.constant 0 : index
    %22 = memref.load %arg0[%c0_3, %c0_4] : memref<3x3xf32, #tpu.memory_space<smem>>
    %c0_5 = arith.constant 0 : index
    %c1 = arith.constant 1 : index
    %23 = memref.load %arg0[%c0_5, %c1] : memref<3x3xf32, #tpu.memory_space<smem>>
    %c0_6 = arith.constant 0 : index
    %c2 = arith.constant 2 : index
    %24 = memref.load %arg0[%c0_6, %c2] : memref<3x3xf32, #tpu.memory_space<smem>>
    %c1_7 = arith.constant 1 : index
    %c0_8 = arith.constant 0 : index
    %25 = memref.load %arg0[%c1_7, %c0_8] : memref<3x3xf32, #tpu.memory_space<smem>>
    %c1_9 = arith.constant 1 : index
    %c1_10 = arith.constant 1 : index
    %26 = memref.load %arg0[%c1_9, %c1_10] : memref<3x3xf32, #tpu.memory_space<smem>>
    %c1_11 = arith.constant 1 : index
    %c2_12 = arith.constant 2 : index
    %27 = memref.load %arg0[%c1_11, %c2_12] : memref<3x3xf32, #tpu.memory_space<smem>>
    %c2_13 = arith.constant 2 : index
    %c0_14 = arith.constant 0 : index
    %28 = memref.load %arg0[%c2_13, %c0_14] : memref<3x3xf32, #tpu.memory_space<smem>>
    %c2_15 = arith.constant 2 : index
    %c1_16 = arith.constant 1 : index
    %29 = memref.load %arg0[%c2_15, %c1_16] : memref<3x3xf32, #tpu.memory_space<smem>>
    %c2_17 = arith.constant 2 : index
    %c2_18 = arith.constant 2 : index
    %30 = memref.load %arg0[%c2_17, %c2_18] : memref<3x3xf32, #tpu.memory_space<smem>>
    %c0_19 = arith.constant 0 : index
    %c0_20 = arith.constant 0 : index
    %31 = vector.load %arg1[%c0_19, %c0_20] : memref<3x3xf32, #tpu.memory_space<vmem>>, vector<3x3xf32>
    %c0_21 = arith.constant 0 : index
    %c0_22 = arith.constant 0 : index
    %32 = vector.load %arg2[%c0_21, %c0_22] : memref<3x1xf32, #tpu.memory_space<vmem>>, vector<3x1xf32>
    %33 = vector.extract_strided_slice %31 {offsets = [0, 0], sizes = [3, 1], strides = [1, 1]} : vector<3x3xf32> to vector<3x1xf32>
    %34 = vector.broadcast %33 : vector<3x1xf32> to vector<3x128xf32>
    %35 = vector.broadcast %1 : vector<1x128xf32> to vector<3x128xf32>
    %36 = arith.mulf %34, %35 : vector<3x128xf32>
    %37 = vector.extract_strided_slice %31 {offsets = [0, 1], sizes = [3, 1], strides = [1, 1]} : vector<3x3xf32> to vector<3x1xf32>
    %38 = vector.broadcast %37 : vector<3x1xf32> to vector<3x128xf32>
    %39 = vector.broadcast %2 : vector<1x128xf32> to vector<3x128xf32>
    %40 = arith.mulf %38, %39 : vector<3x128xf32>
    %41 = arith.addf %36, %40 : vector<3x128xf32>
    %42 = vector.extract_strided_slice %31 {offsets = [0, 2], sizes = [3, 1], strides = [1, 1]} : vector<3x3xf32> to vector<3x1xf32>
    %43 = vector.broadcast %42 : vector<3x1xf32> to vector<3x128xf32>
    %44 = vector.broadcast %3 : vector<1x128xf32> to vector<3x128xf32>
    %45 = arith.mulf %43, %44 : vector<3x128xf32>
    %46 = arith.addf %41, %45 : vector<3x128xf32>
    %47 = vector.broadcast %32 : vector<3x1xf32> to vector<3x128xf32>
    %48 = arith.addf %46, %47 : vector<3x128xf32>
    %49 = vector.extract_strided_slice %48 {offsets = [0, 0], sizes = [1, 128], strides = [1, 1]} : vector<3x128xf32> to vector<1x128xf32>
    %50 = vector.extract_strided_slice %48 {offsets = [1, 0], sizes = [1, 128], strides = [1, 1]} : vector<3x128xf32> to vector<1x128xf32>
    %51 = vector.extract_strided_slice %48 {offsets = [2, 0], sizes = [1, 128], strides = [1, 1]} : vector<3x128xf32> to vector<1x128xf32>
    %52 = vector.broadcast %22 : f32 to vector<1x128xf32>
    %53 = arith.mulf %52, %49 : vector<1x128xf32>
    %54 = vector.broadcast %23 : f32 to vector<1x128xf32>
    %55 = arith.mulf %54, %50 : vector<1x128xf32>
    %56 = arith.addf %53, %55 : vector<1x128xf32>
    %57 = vector.broadcast %24 : f32 to vector<1x128xf32>
    %58 = arith.mulf %57, %51 : vector<1x128xf32>
    %59 = arith.addf %56, %58 : vector<1x128xf32>
    %60 = vector.broadcast %25 : f32 to vector<1x128xf32>
    %61 = arith.mulf %60, %49 : vector<1x128xf32>
    %62 = vector.broadcast %26 : f32 to vector<1x128xf32>
    %63 = arith.mulf %62, %50 : vector<1x128xf32>
    %64 = arith.addf %61, %63 : vector<1x128xf32>
    %65 = vector.broadcast %27 : f32 to vector<1x128xf32>
    %66 = arith.mulf %65, %51 : vector<1x128xf32>
    %67 = arith.addf %64, %66 : vector<1x128xf32>
    %68 = vector.broadcast %28 : f32 to vector<1x128xf32>
    %69 = arith.mulf %68, %49 : vector<1x128xf32>
    %70 = vector.broadcast %29 : f32 to vector<1x128xf32>
    %71 = arith.mulf %70, %50 : vector<1x128xf32>
    %72 = arith.addf %69, %71 : vector<1x128xf32>
    %73 = vector.broadcast %30 : f32 to vector<1x128xf32>
    %74 = arith.mulf %73, %51 : vector<1x128xf32>
    %75 = arith.addf %72, %74 : vector<1x128xf32>
    %cst = arith.constant 9.99999997E-7 : f32
    %76 = vector.broadcast %cst : f32 to vector<1x128xf32>
    %77 = arith.cmpf ogt, %75, %76 : vector<1x128xf32>
    %cst_23 = arith.constant 1.000000e+00 : f32
    %78 = vector.broadcast %cst_23 : f32 to vector<1x128xf32>
    %79 = arith.select %77, %75, %78 : vector<1x128xi1>, vector<1x128xf32>
    %80 = tpu.reciprocal %79 : vector<1x128xf32> -> vector<1x128xf32>
    %81 = arith.mulf %59, %80 : vector<1x128xf32>
    %82 = math.roundeven %81 : vector<1x128xf32>
    %83 = arith.fptosi %82 : vector<1x128xf32> to vector<1x128xi32>
    %c1_i32 = arith.constant 1 : i32
    %84 = vector.broadcast %c1_i32 : i32 to vector<1x128xi32>
    %85 = arith.subi %83, %84 : vector<1x128xi32>
    %86 = arith.mulf %67, %80 : vector<1x128xf32>
    %87 = math.roundeven %86 : vector<1x128xf32>
    %88 = arith.fptosi %87 : vector<1x128xf32> to vector<1x128xi32>
    %c1_i32_24 = arith.constant 1 : i32
    %89 = vector.broadcast %c1_i32_24 : i32 to vector<1x128xi32>
    %90 = arith.subi %88, %89 : vector<1x128xi32>
    %91 = arith.andi %7, %77 : vector<1x128xi1>
    %c0_i32 = arith.constant 0 : i32
    %92 = vector.broadcast %c0_i32 : i32 to vector<1x128xi32>
    %93 = arith.cmpi sge, %85, %92 : vector<1x128xi32>
    %94 = arith.andi %91, %93 : vector<1x128xi1>
    %c0_i32_25 = arith.constant 0 : i32
    %95 = vector.broadcast %c0_i32_25 : i32 to vector<1x128xi32>
    %96 = arith.cmpi sge, %90, %95 : vector<1x128xi32>
    %97 = arith.andi %94, %96 : vector<1x128xi1>
    %c16_i32 = arith.constant 16 : i32
    %98 = vector.broadcast %c16_i32 : i32 to vector<1x128xi32>
    %99 = arith.cmpi slt, %85, %98 : vector<1x128xi32>
    %100 = arith.andi %97, %99 : vector<1x128xi1>
    %c16_i32_26 = arith.constant 16 : i32
    %101 = vector.broadcast %c16_i32_26 : i32 to vector<1x128xi32>
    %102 = arith.cmpi slt, %90, %101 : vector<1x128xi32>
    %103 = arith.andi %100, %102 : vector<1x128xi1>
    %104 = arith.sitofp %90 : vector<1x128xi32> to vector<1x128xf32>
    %cst_27 = arith.constant 1.000000e+00 : f32
    %105 = vector.broadcast %cst_27 : f32 to vector<1x128xf32>
    %106 = arith.mulf %104, %105 : vector<1x128xf32>
    %107 = math.floor %106 : vector<1x128xf32>
    %108 = arith.fptosi %107 : vector<1x128xf32> to vector<1x128xi32>
    %109 = arith.sitofp %85 : vector<1x128xi32> to vector<1x128xf32>
    %cst_28 = arith.constant 1.000000e+00 : f32
    %110 = vector.broadcast %cst_28 : f32 to vector<1x128xf32>
    %111 = arith.mulf %109, %110 : vector<1x128xf32>
    %112 = math.floor %111 : vector<1x128xf32>
    %113 = arith.fptosi %112 : vector<1x128xf32> to vector<1x128xi32>
    %c16_i32_29 = arith.constant 16 : i32
    %114 = vector.broadcast %c16_i32_29 : i32 to vector<1x128xi32>
    %115 = arith.muli %108, %114 : vector<1x128xi32>
    %116 = arith.addi %115, %113 : vector<1x128xi32>
    %117 = arith.extui %103 : vector<1x128xi1> to vector<1x128xi32>
    %118 = arith.sitofp %117 : vector<1x128xi32> to vector<1x128xf32>
    %cst_30 = arith.constant dense<0.000000e+00> : vector<1xf32>
    %119 = vector.multi_reduction <add>, %118, %cst_30 [1] : vector<1x128xf32> to vector<1xf32>
    %120 = vector.shape_cast %119 : vector<1xf32> to vector<1x1xf32>
    %c0_i32_31 = arith.constant 0 : i32
    %121 = vector.broadcast %c0_i32_31 : i32 to vector<1x128xi32>
    %122 = arith.subi %116, %121 : vector<1x128xi32>
    %123 = vector.broadcast %122 : vector<1x128xi32> to vector<256x128xi32>
    %124 = arith.cmpi eq, %8, %123 : vector<256x128xi32>
    %125 = vector.broadcast %103 : vector<1x128xi1> to vector<256x128xi1>
    %126 = arith.andi %124, %125 : vector<256x128xi1>
    %127 = arith.extui %126 : vector<256x128xi1> to vector<256x128xi32>
    %128 = arith.sitofp %127 : vector<256x128xi32> to vector<256x128xf32>
    %129 = arith.truncf %128 : vector<256x128xf32> to vector<256x128xbf16>
    %c0_32 = arith.constant 0 : index
    %c0_33 = arith.constant 0 : index
    %c0_34 = arith.constant 0 : index
    %130 = vector.load %arg5[%c0_32, %c0_33, %c0_34] : memref<1x24x256xbf16, #tpu.memory_space<vmem>>, vector<1x24x256xbf16>
    %131 = vector.shape_cast %130 : vector<1x24x256xbf16> to vector<24x256xbf16>
    %cst_35 = arith.constant dense<0.000000e+00> : vector<24x128xf32>
    %132 = tpu.matmul %131, %129, %cst_35 {dimension_numbers = #tpu.dot_dimension_numbers<[1], [0], [0], [1], [0, 0, 1, 1], [], []>} : vector<24x256xbf16>, vector<256x128xbf16>, vector<24x128xf32> -> vector<24x128xf32>
    %133 = vector.extract_strided_slice %132 {offsets = [0, 0], sizes = [8, 128], strides = [1, 1]} : vector<24x128xf32> to vector<8x128xf32>
    %134 = vector.extract_strided_slice %132 {offsets = [8, 0], sizes = [8, 128], strides = [1, 1]} : vector<24x128xf32> to vector<8x128xf32>
    %135 = vector.extract_strided_slice %132 {offsets = [16, 0], sizes = [8, 128], strides = [1, 1]} : vector<24x128xf32> to vector<8x128xf32>
    %136 = arith.subf %133, %4 : vector<8x128xf32>
    %137 = vector.broadcast %118 : vector<1x128xf32> to vector<8x128xf32>
    %138 = arith.mulf %136, %137 : vector<8x128xf32>
    %139 = arith.mulf %138, %138 : vector<8x128xf32>
    %cst_36 = arith.constant dense<0.000000e+00> : vector<128xf32>
    %140 = vector.multi_reduction <add>, %139, %cst_36 [0] : vector<8x128xf32> to vector<128xf32>
    %141 = vector.shape_cast %140 : vector<128xf32> to vector<1x128xf32>
    %cst_37 = arith.constant 5.000000e-01 : f32
    %142 = vector.broadcast %cst_37 : f32 to vector<1x128xf32>
    %143 = arith.mulf %142, %141 : vector<1x128xf32>
    %cst_38 = arith.constant dense<0.000000e+00> : vector<1xf32>
    %144 = vector.multi_reduction <add>, %143, %cst_38 [1] : vector<1x128xf32> to vector<1xf32>
    %145 = vector.shape_cast %144 : vector<1xf32> to vector<1x1xf32>
    %cst_39 = arith.constant 1.000000e+00 : f32
    %146 = vector.broadcast %cst_39 : f32 to vector<1x1xf32>
    %147 = arith.maximumf %120, %146 : vector<1x1xf32>
    %148 = tpu.reciprocal %147 : vector<1x1xf32> -> vector<1x1xf32>
    %149 = arith.mulf %145, %148 : vector<1x1xf32>
    %150 = arith.mulf %134, %138 : vector<8x128xf32>
    %cst_40 = arith.constant dense<0.000000e+00> : vector<128xf32>
    %151 = vector.multi_reduction <add>, %150, %cst_40 [0] : vector<8x128xf32> to vector<128xf32>
    %152 = vector.shape_cast %151 : vector<128xf32> to vector<1x128xf32>
    %153 = arith.mulf %135, %138 : vector<8x128xf32>
    %cst_41 = arith.constant dense<0.000000e+00> : vector<128xf32>
    %154 = vector.multi_reduction <add>, %153, %cst_41 [0] : vector<8x128xf32> to vector<128xf32>
    %155 = vector.shape_cast %154 : vector<128xf32> to vector<1x128xf32>
    %156 = arith.mulf %134, %134 : vector<8x128xf32>
    %cst_42 = arith.constant dense<0.000000e+00> : vector<128xf32>
    %157 = vector.multi_reduction <add>, %156, %cst_42 [0] : vector<8x128xf32> to vector<128xf32>
    %158 = vector.shape_cast %157 : vector<128xf32> to vector<1x128xf32>
    %159 = arith.mulf %158, %118 : vector<1x128xf32>
    %160 = arith.mulf %134, %135 : vector<8x128xf32>
    %cst_43 = arith.constant dense<0.000000e+00> : vector<128xf32>
    %161 = vector.multi_reduction <add>, %160, %cst_43 [0] : vector<8x128xf32> to vector<128xf32>
    %162 = vector.shape_cast %161 : vector<128xf32> to vector<1x128xf32>
    %163 = arith.mulf %162, %118 : vector<1x128xf32>
    %164 = arith.mulf %135, %135 : vector<8x128xf32>
    %cst_44 = arith.constant dense<0.000000e+00> : vector<128xf32>
    %165 = vector.multi_reduction <add>, %164, %cst_44 [0] : vector<8x128xf32> to vector<128xf32>
    %166 = vector.shape_cast %165 : vector<128xf32> to vector<1x128xf32>
    %167 = arith.mulf %166, %118 : vector<1x128xf32>
    %168 = math.absf %51 : vector<1x128xf32>
    %cst_45 = arith.constant 9.99999996E-13 : f32
    %169 = vector.broadcast %cst_45 : f32 to vector<1x128xf32>
    %170 = arith.cmpf ogt, %168, %169 : vector<1x128xf32>
    %171 = arith.andi %103, %170 : vector<1x128xi1>
    %cst_46 = arith.constant 1.000000e+00 : f32
    %172 = vector.broadcast %cst_46 : f32 to vector<1x128xf32>
    %173 = arith.select %171, %51, %172 : vector<1x128xi1>, vector<1x128xf32>
    %174 = tpu.reciprocal %173 {approx = true} : vector<1x128xf32> -> vector<1x128xf32>
    %175 = vector.broadcast %22 : f32 to vector<1x128xf32>
    %176 = arith.mulf %175, %174 : vector<1x128xf32>
    %cst_47 = arith.constant 0.000000e+00 : f32
    %177 = arith.subf %cst_47, %22 : f32
    %178 = vector.broadcast %177 : f32 to vector<1x128xf32>
    %179 = arith.mulf %178, %49 : vector<1x128xf32>
    %180 = arith.mulf %179, %174 : vector<1x128xf32>
    %181 = arith.mulf %180, %174 : vector<1x128xf32>
    %182 = vector.broadcast %26 : f32 to vector<1x128xf32>
    %183 = arith.mulf %182, %174 : vector<1x128xf32>
    %cst_48 = arith.constant 0.000000e+00 : f32
    %184 = arith.subf %cst_48, %26 : f32
    %185 = vector.broadcast %184 : f32 to vector<1x128xf32>
    %186 = arith.mulf %185, %50 : vector<1x128xf32>
    %187 = arith.mulf %186, %174 : vector<1x128xf32>
    %188 = arith.mulf %187, %174 : vector<1x128xf32>
    %c0_i32_49 = arith.constant 0 : i32
    %189 = vector.broadcast %c0_i32_49 : i32 to vector<6x1xi32>
    %190 = arith.cmpi eq, %9, %189 : vector<6x1xi32>
    %191 = arith.extui %190 : vector<6x1xi1> to vector<6x1xi32>
    %192 = arith.sitofp %191 : vector<6x1xi32> to vector<6x1xf32>
    %c4_i32 = arith.constant 4 : i32
    %193 = vector.broadcast %c4_i32 : i32 to vector<6x1xi32>
    %194 = arith.cmpi eq, %9, %193 : vector<6x1xi32>
    %195 = arith.extui %194 : vector<6x1xi1> to vector<6x1xi32>
    %196 = arith.sitofp %195 : vector<6x1xi32> to vector<6x1xf32>
    %197 = vector.broadcast %196 : vector<6x1xf32> to vector<6x128xf32>
    %198 = vector.broadcast %51 : vector<1x128xf32> to vector<6x128xf32>
    %199 = arith.mulf %197, %198 : vector<6x128xf32>
    %200 = vector.broadcast %192 : vector<6x1xf32> to vector<6x128xf32>
    %201 = arith.addf %200, %199 : vector<6x128xf32>
    %c5_i32 = arith.constant 5 : i32
    %202 = vector.broadcast %c5_i32 : i32 to vector<6x1xi32>
    %203 = arith.cmpi eq, %9, %202 : vector<6x1xi32>
    %204 = arith.extui %203 : vector<6x1xi1> to vector<6x1xi32>
    %205 = arith.sitofp %204 : vector<6x1xi32> to vector<6x1xf32>
    %206 = vector.broadcast %205 : vector<6x1xf32> to vector<6x128xf32>
    %207 = vector.broadcast %50 : vector<1x128xf32> to vector<6x128xf32>
    %208 = arith.mulf %206, %207 : vector<6x128xf32>
    %209 = arith.subf %201, %208 : vector<6x128xf32>
    %c1_i32_50 = arith.constant 1 : i32
    %210 = vector.broadcast %c1_i32_50 : i32 to vector<6x1xi32>
    %211 = arith.cmpi eq, %9, %210 : vector<6x1xi32>
    %212 = arith.extui %211 : vector<6x1xi1> to vector<6x1xi32>
    %213 = arith.sitofp %212 : vector<6x1xi32> to vector<6x1xf32>
    %c3_i32 = arith.constant 3 : i32
    %214 = vector.broadcast %c3_i32 : i32 to vector<6x1xi32>
    %215 = arith.cmpi eq, %9, %214 : vector<6x1xi32>
    %216 = arith.extui %215 : vector<6x1xi1> to vector<6x1xi32>
    %217 = arith.sitofp %216 : vector<6x1xi32> to vector<6x1xf32>
    %218 = vector.broadcast %217 : vector<6x1xf32> to vector<6x128xf32>
    %219 = vector.broadcast %51 : vector<1x128xf32> to vector<6x128xf32>
    %220 = arith.mulf %218, %219 : vector<6x128xf32>
    %221 = vector.broadcast %213 : vector<6x1xf32> to vector<6x128xf32>
    %222 = arith.subf %221, %220 : vector<6x128xf32>
    %c5_i32_51 = arith.constant 5 : i32
    %223 = vector.broadcast %c5_i32_51 : i32 to vector<6x1xi32>
    %224 = arith.cmpi eq, %9, %223 : vector<6x1xi32>
    %225 = arith.extui %224 : vector<6x1xi1> to vector<6x1xi32>
    %226 = arith.sitofp %225 : vector<6x1xi32> to vector<6x1xf32>
    %227 = vector.broadcast %226 : vector<6x1xf32> to vector<6x128xf32>
    %228 = vector.broadcast %49 : vector<1x128xf32> to vector<6x128xf32>
    %229 = arith.mulf %227, %228 : vector<6x128xf32>
    %230 = arith.addf %222, %229 : vector<6x128xf32>
    %c2_i32 = arith.constant 2 : i32
    %231 = vector.broadcast %c2_i32 : i32 to vector<6x1xi32>
    %232 = arith.cmpi eq, %9, %231 : vector<6x1xi32>
    %233 = arith.extui %232 : vector<6x1xi1> to vector<6x1xi32>
    %234 = arith.sitofp %233 : vector<6x1xi32> to vector<6x1xf32>
    %c3_i32_52 = arith.constant 3 : i32
    %235 = vector.broadcast %c3_i32_52 : i32 to vector<6x1xi32>
    %236 = arith.cmpi eq, %9, %235 : vector<6x1xi32>
    %237 = arith.extui %236 : vector<6x1xi1> to vector<6x1xi32>
    %238 = arith.sitofp %237 : vector<6x1xi32> to vector<6x1xf32>
    %239 = vector.broadcast %238 : vector<6x1xf32> to vector<6x128xf32>
    %240 = vector.broadcast %50 : vector<1x128xf32> to vector<6x128xf32>
    %241 = arith.mulf %239, %240 : vector<6x128xf32>
    %242 = vector.broadcast %234 : vector<6x1xf32> to vector<6x128xf32>
    %243 = arith.addf %242, %241 : vector<6x128xf32>
    %c4_i32_53 = arith.constant 4 : i32
    %244 = vector.broadcast %c4_i32_53 : i32 to vector<6x1xi32>
    %245 = arith.cmpi eq, %9, %244 : vector<6x1xi32>
    %246 = arith.extui %245 : vector<6x1xi1> to vector<6x1xi32>
    %247 = arith.sitofp %246 : vector<6x1xi32> to vector<6x1xf32>
    %248 = vector.broadcast %247 : vector<6x1xf32> to vector<6x128xf32>
    %249 = vector.broadcast %49 : vector<1x128xf32> to vector<6x128xf32>
    %250 = arith.mulf %248, %249 : vector<6x128xf32>
    %251 = arith.subf %243, %250 : vector<6x128xf32>
    %252 = vector.broadcast %176 : vector<1x128xf32> to vector<6x128xf32>
    %253 = arith.mulf %252, %209 : vector<6x128xf32>
    %254 = vector.broadcast %181 : vector<1x128xf32> to vector<6x128xf32>
    %255 = arith.mulf %254, %251 : vector<6x128xf32>
    %256 = arith.addf %253, %255 : vector<6x128xf32>
    %257 = vector.broadcast %183 : vector<1x128xf32> to vector<6x128xf32>
    %258 = arith.mulf %257, %230 : vector<6x128xf32>
    %259 = vector.broadcast %188 : vector<1x128xf32> to vector<6x128xf32>
    %260 = arith.mulf %259, %251 : vector<6x128xf32>
    %261 = arith.addf %258, %260 : vector<6x128xf32>
    %262 = vector.broadcast %152 : vector<1x128xf32> to vector<6x128xf32>
    %263 = arith.mulf %256, %262 : vector<6x128xf32>
    %264 = vector.broadcast %155 : vector<1x128xf32> to vector<6x128xf32>
    %265 = arith.mulf %261, %264 : vector<6x128xf32>
    %266 = arith.addf %263, %265 : vector<6x128xf32>
    %cst_54 = arith.constant dense<0.000000e+00> : vector<6xf32>
    %267 = vector.multi_reduction <add>, %266, %cst_54 [1] : vector<6x128xf32> to vector<6xf32>
    %268 = vector.shape_cast %267 : vector<6xf32> to vector<6x1xf32>
    %269 = vector.broadcast %159 : vector<1x128xf32> to vector<6x128xf32>
    %270 = arith.mulf %269, %256 : vector<6x128xf32>
    %271 = vector.broadcast %163 : vector<1x128xf32> to vector<6x128xf32>
    %272 = arith.mulf %271, %261 : vector<6x128xf32>
    %273 = arith.addf %270, %272 : vector<6x128xf32>
    %274 = vector.broadcast %163 : vector<1x128xf32> to vector<6x128xf32>
    %275 = arith.mulf %274, %256 : vector<6x128xf32>
    %276 = vector.broadcast %167 : vector<1x128xf32> to vector<6x128xf32>
    %277 = arith.mulf %276, %261 : vector<6x128xf32>
    %278 = arith.addf %275, %277 : vector<6x128xf32>
    %cst_55 = arith.constant dense<0.000000e+00> : vector<6x6xf32>
    %279 = tpu.matmul %273, %256, %cst_55 {dimension_numbers = #tpu.dot_dimension_numbers<[1], [1], [0], [0], [0, 0, 1, 0], [], []>} : vector<6x128xf32>, vector<6x128xf32>, vector<6x6xf32> -> vector<6x6xf32>
    %cst_56 = arith.constant dense<0.000000e+00> : vector<6x6xf32>
    %280 = tpu.matmul %278, %261, %cst_56 {dimension_numbers = #tpu.dot_dimension_numbers<[1], [1], [0], [0], [0, 0, 1, 0], [], []>} : vector<6x128xf32>, vector<6x128xf32>, vector<6x6xf32> -> vector<6x6xf32>
    %281 = arith.addf %279, %280 : vector<6x6xf32>
    %cst_57 = arith.constant 5.000000e-01 : f32
    %282 = vector.broadcast %cst_57 : f32 to vector<1x1xf32>
    %283 = arith.cmpf olt, %120, %282 : vector<1x1xf32>
    %cst_58 = arith.constant 0.00999999977 : f32
    %284 = vector.broadcast %cst_58 : f32 to vector<1x1xf32>
    %cst_59 = arith.constant 1.000000e+00 : f32
    %285 = vector.broadcast %cst_59 : f32 to vector<1x1xf32>
    %cst_60 = arith.constant dense<true> : vector<1x1xi1>
    %286 = arith.xori %283, %cst_60 : vector<1x1xi1>
    %287 = arith.extui %286 : vector<1x1xi1> to vector<1x1xi32>
    %288 = arith.sitofp %287 : vector<1x1xi32> to vector<1x1xf32>
    %289 = arith.extui %283 : vector<1x1xi1> to vector<1x1xi32>
    %290 = arith.sitofp %289 : vector<1x1xi32> to vector<1x1xf32>
    %c0_i32_61 = arith.constant 0 : i32
    %c4_i32_62 = arith.constant 4 : i32
    %291 = arith.addi %c0_i32_61, %c4_i32_62 : i32
    %c1_i32_63 = arith.constant 1 : i32
    %292:12 = scf.for %arg7 = %c0_i32_61 to %291 step %c1_i32_63 iter_args(%arg8 = %31, %arg9 = %32, %arg10 = %31, %arg11 = %32, %arg12 = %268, %arg13 = %281, %arg14 = %149, %arg15 = %149, %arg16 = %284, %arg17 = %285, %arg18 = %288, %arg19 = %290) -> (vector<3x3xf32>, vector<3x1xf32>, vector<3x3xf32>, vector<3x1xf32>, vector<6x1xf32>, vector<6x6xf32>, vector<1x1xf32>, vector<1x1xf32>, vector<1x1xf32>, vector<1x1xf32>, vector<1x1xf32>, vector<1x1xf32>)  : i32 {
      %cst_67 = arith.constant 5.000000e-01 : f32
      %303 = vector.broadcast %cst_67 : f32 to vector<1x1xf32>
      %304 = arith.cmpf ogt, %arg18, %303 : vector<1x1xf32>
      %305 = arith.mulf %21, %arg13 : vector<6x6xf32>
      %cst_68 = arith.constant 9.99999971E-10 : f32
      %306 = vector.broadcast %cst_68 : f32 to vector<6x6xf32>
      %307 = arith.mulf %306, %21 : vector<6x6xf32>
      %308 = arith.addf %305, %307 : vector<6x6xf32>
      %309 = vector.broadcast %arg16 : vector<1x1xf32> to vector<6x6xf32>
      %310 = arith.mulf %309, %308 : vector<6x6xf32>
      %311 = arith.addf %arg13, %310 : vector<6x6xf32>
      %312 = vector.extract_strided_slice %311 {offsets = [0, 0], sizes = [1, 1], strides = [1, 1]} : vector<6x6xf32> to vector<1x1xf32>
      %cst_69 = arith.constant 1.000000e+00 : f32
      %313 = vector.broadcast %cst_69 : f32 to vector<1x1xf32>
      %314 = arith.divf %313, %312 : vector<1x1xf32>
      %315 = vector.extract_strided_slice %311 {offsets = [0, 0], sizes = [1, 6], strides = [1, 1]} : vector<6x6xf32> to vector<1x6xf32>
      %316 = vector.broadcast %314 : vector<1x1xf32> to vector<1x6xf32>
      %317 = arith.mulf %315, %316 : vector<1x6xf32>
      %318 = vector.extract_strided_slice %arg12 {offsets = [0, 0], sizes = [1, 1], strides = [1, 1]} : vector<6x1xf32> to vector<1x1xf32>
      %319 = arith.mulf %318, %314 : vector<1x1xf32>
      %320 = vector.extract_strided_slice %311 {offsets = [0, 0], sizes = [6, 1], strides = [1, 1]} : vector<6x6xf32> to vector<6x1xf32>
      %321 = vector.broadcast %320 : vector<6x1xf32> to vector<6x6xf32>
      %322 = vector.broadcast %317 : vector<1x6xf32> to vector<6x6xf32>
      %323 = arith.mulf %321, %322 : vector<6x6xf32>
      %324 = arith.subf %311, %323 : vector<6x6xf32>
      %325 = vector.broadcast %319 : vector<1x1xf32> to vector<6x1xf32>
      %326 = arith.mulf %320, %325 : vector<6x1xf32>
      %327 = arith.subf %arg12, %326 : vector<6x1xf32>
      %c0_i32_70 = arith.constant 0 : i32
      %328 = vector.broadcast %c0_i32_70 : i32 to vector<6x1xi32>
      %329 = arith.cmpi eq, %9, %328 : vector<6x1xi32>
      %330 = vector.shape_cast %329 : vector<6x1xi1> to vector<6x1xi1>
      %331 = vector.broadcast %330 : vector<6x1xi1> to vector<6x6xi1>
      %332 = vector.shape_cast %317 : vector<1x6xf32> to vector<1x6xf32>
      %333 = vector.broadcast %332 : vector<1x6xf32> to vector<6x6xf32>
      %334 = arith.select %331, %333, %324 : vector<6x6xi1>, vector<6x6xf32>
      %335 = vector.shape_cast %319 : vector<1x1xf32> to vector<1x1xf32>
      %336 = vector.broadcast %335 : vector<1x1xf32> to vector<6x1xf32>
      %337 = arith.select %329, %336, %327 : vector<6x1xi1>, vector<6x1xf32>
      %338 = vector.extract_strided_slice %334 {offsets = [1, 1], sizes = [1, 1], strides = [1, 1]} : vector<6x6xf32> to vector<1x1xf32>
      %cst_71 = arith.constant 1.000000e+00 : f32
      %339 = vector.broadcast %cst_71 : f32 to vector<1x1xf32>
      %340 = arith.divf %339, %338 : vector<1x1xf32>
      %341 = vector.extract_strided_slice %334 {offsets = [1, 0], sizes = [1, 6], strides = [1, 1]} : vector<6x6xf32> to vector<1x6xf32>
      %342 = vector.broadcast %340 : vector<1x1xf32> to vector<1x6xf32>
      %343 = arith.mulf %341, %342 : vector<1x6xf32>
      %344 = vector.extract_strided_slice %337 {offsets = [1, 0], sizes = [1, 1], strides = [1, 1]} : vector<6x1xf32> to vector<1x1xf32>
      %345 = arith.mulf %344, %340 : vector<1x1xf32>
      %346 = vector.extract_strided_slice %334 {offsets = [0, 1], sizes = [6, 1], strides = [1, 1]} : vector<6x6xf32> to vector<6x1xf32>
      %347 = vector.broadcast %346 : vector<6x1xf32> to vector<6x6xf32>
      %348 = vector.broadcast %343 : vector<1x6xf32> to vector<6x6xf32>
      %349 = arith.mulf %347, %348 : vector<6x6xf32>
      %350 = arith.subf %334, %349 : vector<6x6xf32>
      %351 = vector.broadcast %345 : vector<1x1xf32> to vector<6x1xf32>
      %352 = arith.mulf %346, %351 : vector<6x1xf32>
      %353 = arith.subf %337, %352 : vector<6x1xf32>
      %c1_i32_72 = arith.constant 1 : i32
      %354 = vector.broadcast %c1_i32_72 : i32 to vector<6x1xi32>
      %355 = arith.cmpi eq, %9, %354 : vector<6x1xi32>
      %356 = vector.shape_cast %355 : vector<6x1xi1> to vector<6x1xi1>
      %357 = vector.broadcast %356 : vector<6x1xi1> to vector<6x6xi1>
      %358 = vector.shape_cast %343 : vector<1x6xf32> to vector<1x6xf32>
      %359 = vector.broadcast %358 : vector<1x6xf32> to vector<6x6xf32>
      %360 = arith.select %357, %359, %350 : vector<6x6xi1>, vector<6x6xf32>
      %361 = vector.shape_cast %345 : vector<1x1xf32> to vector<1x1xf32>
      %362 = vector.broadcast %361 : vector<1x1xf32> to vector<6x1xf32>
      %363 = arith.select %355, %362, %353 : vector<6x1xi1>, vector<6x1xf32>
      %364 = vector.extract_strided_slice %360 {offsets = [2, 2], sizes = [1, 1], strides = [1, 1]} : vector<6x6xf32> to vector<1x1xf32>
      %cst_73 = arith.constant 1.000000e+00 : f32
      %365 = vector.broadcast %cst_73 : f32 to vector<1x1xf32>
      %366 = arith.divf %365, %364 : vector<1x1xf32>
      %367 = vector.extract_strided_slice %360 {offsets = [2, 0], sizes = [1, 6], strides = [1, 1]} : vector<6x6xf32> to vector<1x6xf32>
      %368 = vector.broadcast %366 : vector<1x1xf32> to vector<1x6xf32>
      %369 = arith.mulf %367, %368 : vector<1x6xf32>
      %370 = vector.extract_strided_slice %363 {offsets = [2, 0], sizes = [1, 1], strides = [1, 1]} : vector<6x1xf32> to vector<1x1xf32>
      %371 = arith.mulf %370, %366 : vector<1x1xf32>
      %372 = vector.extract_strided_slice %360 {offsets = [0, 2], sizes = [6, 1], strides = [1, 1]} : vector<6x6xf32> to vector<6x1xf32>
      %373 = vector.broadcast %372 : vector<6x1xf32> to vector<6x6xf32>
      %374 = vector.broadcast %369 : vector<1x6xf32> to vector<6x6xf32>
      %375 = arith.mulf %373, %374 : vector<6x6xf32>
      %376 = arith.subf %360, %375 : vector<6x6xf32>
      %377 = vector.broadcast %371 : vector<1x1xf32> to vector<6x1xf32>
      %378 = arith.mulf %372, %377 : vector<6x1xf32>
      %379 = arith.subf %363, %378 : vector<6x1xf32>
      %c2_i32_74 = arith.constant 2 : i32
      %380 = vector.broadcast %c2_i32_74 : i32 to vector<6x1xi32>
      %381 = arith.cmpi eq, %9, %380 : vector<6x1xi32>
      %382 = vector.shape_cast %381 : vector<6x1xi1> to vector<6x1xi1>
      %383 = vector.broadcast %382 : vector<6x1xi1> to vector<6x6xi1>
      %384 = vector.shape_cast %369 : vector<1x6xf32> to vector<1x6xf32>
      %385 = vector.broadcast %384 : vector<1x6xf32> to vector<6x6xf32>
      %386 = arith.select %383, %385, %376 : vector<6x6xi1>, vector<6x6xf32>
      %387 = vector.shape_cast %371 : vector<1x1xf32> to vector<1x1xf32>
      %388 = vector.broadcast %387 : vector<1x1xf32> to vector<6x1xf32>
      %389 = arith.select %381, %388, %379 : vector<6x1xi1>, vector<6x1xf32>
      %390 = vector.extract_strided_slice %386 {offsets = [3, 3], sizes = [1, 1], strides = [1, 1]} : vector<6x6xf32> to vector<1x1xf32>
      %cst_75 = arith.constant 1.000000e+00 : f32
      %391 = vector.broadcast %cst_75 : f32 to vector<1x1xf32>
      %392 = arith.divf %391, %390 : vector<1x1xf32>
      %393 = vector.extract_strided_slice %386 {offsets = [3, 0], sizes = [1, 6], strides = [1, 1]} : vector<6x6xf32> to vector<1x6xf32>
      %394 = vector.broadcast %392 : vector<1x1xf32> to vector<1x6xf32>
      %395 = arith.mulf %393, %394 : vector<1x6xf32>
      %396 = vector.extract_strided_slice %389 {offsets = [3, 0], sizes = [1, 1], strides = [1, 1]} : vector<6x1xf32> to vector<1x1xf32>
      %397 = arith.mulf %396, %392 : vector<1x1xf32>
      %398 = vector.extract_strided_slice %386 {offsets = [0, 3], sizes = [6, 1], strides = [1, 1]} : vector<6x6xf32> to vector<6x1xf32>
      %399 = vector.broadcast %398 : vector<6x1xf32> to vector<6x6xf32>
      %400 = vector.broadcast %395 : vector<1x6xf32> to vector<6x6xf32>
      %401 = arith.mulf %399, %400 : vector<6x6xf32>
      %402 = arith.subf %386, %401 : vector<6x6xf32>
      %403 = vector.broadcast %397 : vector<1x1xf32> to vector<6x1xf32>
      %404 = arith.mulf %398, %403 : vector<6x1xf32>
      %405 = arith.subf %389, %404 : vector<6x1xf32>
      %c3_i32_76 = arith.constant 3 : i32
      %406 = vector.broadcast %c3_i32_76 : i32 to vector<6x1xi32>
      %407 = arith.cmpi eq, %9, %406 : vector<6x1xi32>
      %408 = vector.shape_cast %407 : vector<6x1xi1> to vector<6x1xi1>
      %409 = vector.broadcast %408 : vector<6x1xi1> to vector<6x6xi1>
      %410 = vector.shape_cast %395 : vector<1x6xf32> to vector<1x6xf32>
      %411 = vector.broadcast %410 : vector<1x6xf32> to vector<6x6xf32>
      %412 = arith.select %409, %411, %402 : vector<6x6xi1>, vector<6x6xf32>
      %413 = vector.shape_cast %397 : vector<1x1xf32> to vector<1x1xf32>
      %414 = vector.broadcast %413 : vector<1x1xf32> to vector<6x1xf32>
      %415 = arith.select %407, %414, %405 : vector<6x1xi1>, vector<6x1xf32>
      %416 = vector.extract_strided_slice %412 {offsets = [4, 4], sizes = [1, 1], strides = [1, 1]} : vector<6x6xf32> to vector<1x1xf32>
      %cst_77 = arith.constant 1.000000e+00 : f32
      %417 = vector.broadcast %cst_77 : f32 to vector<1x1xf32>
      %418 = arith.divf %417, %416 : vector<1x1xf32>
      %419 = vector.extract_strided_slice %412 {offsets = [4, 0], sizes = [1, 6], strides = [1, 1]} : vector<6x6xf32> to vector<1x6xf32>
      %420 = vector.broadcast %418 : vector<1x1xf32> to vector<1x6xf32>
      %421 = arith.mulf %419, %420 : vector<1x6xf32>
      %422 = vector.extract_strided_slice %415 {offsets = [4, 0], sizes = [1, 1], strides = [1, 1]} : vector<6x1xf32> to vector<1x1xf32>
      %423 = arith.mulf %422, %418 : vector<1x1xf32>
      %424 = vector.extract_strided_slice %412 {offsets = [0, 4], sizes = [6, 1], strides = [1, 1]} : vector<6x6xf32> to vector<6x1xf32>
      %425 = vector.broadcast %424 : vector<6x1xf32> to vector<6x6xf32>
      %426 = vector.broadcast %421 : vector<1x6xf32> to vector<6x6xf32>
      %427 = arith.mulf %425, %426 : vector<6x6xf32>
      %428 = arith.subf %412, %427 : vector<6x6xf32>
      %429 = vector.broadcast %423 : vector<1x1xf32> to vector<6x1xf32>
      %430 = arith.mulf %424, %429 : vector<6x1xf32>
      %431 = arith.subf %415, %430 : vector<6x1xf32>
      %c4_i32_78 = arith.constant 4 : i32
      %432 = vector.broadcast %c4_i32_78 : i32 to vector<6x1xi32>
      %433 = arith.cmpi eq, %9, %432 : vector<6x1xi32>
      %434 = vector.shape_cast %433 : vector<6x1xi1> to vector<6x1xi1>
      %435 = vector.broadcast %434 : vector<6x1xi1> to vector<6x6xi1>
      %436 = vector.shape_cast %421 : vector<1x6xf32> to vector<1x6xf32>
      %437 = vector.broadcast %436 : vector<1x6xf32> to vector<6x6xf32>
      %438 = arith.select %435, %437, %428 : vector<6x6xi1>, vector<6x6xf32>
      %439 = vector.shape_cast %423 : vector<1x1xf32> to vector<1x1xf32>
      %440 = vector.broadcast %439 : vector<1x1xf32> to vector<6x1xf32>
      %441 = arith.select %433, %440, %431 : vector<6x1xi1>, vector<6x1xf32>
      %442 = vector.extract_strided_slice %438 {offsets = [5, 5], sizes = [1, 1], strides = [1, 1]} : vector<6x6xf32> to vector<1x1xf32>
      %cst_79 = arith.constant 1.000000e+00 : f32
      %443 = vector.broadcast %cst_79 : f32 to vector<1x1xf32>
      %444 = arith.divf %443, %442 : vector<1x1xf32>
      %445 = vector.extract_strided_slice %441 {offsets = [5, 0], sizes = [1, 1], strides = [1, 1]} : vector<6x1xf32> to vector<1x1xf32>
      %446 = arith.mulf %445, %444 : vector<1x1xf32>
      %447 = vector.extract_strided_slice %438 {offsets = [0, 5], sizes = [6, 1], strides = [1, 1]} : vector<6x6xf32> to vector<6x1xf32>
      %448 = vector.broadcast %446 : vector<1x1xf32> to vector<6x1xf32>
      %449 = arith.mulf %447, %448 : vector<6x1xf32>
      %450 = arith.subf %441, %449 : vector<6x1xf32>
      %c5_i32_80 = arith.constant 5 : i32
      %451 = vector.broadcast %c5_i32_80 : i32 to vector<6x1xi32>
      %452 = arith.cmpi eq, %9, %451 : vector<6x1xi32>
      %453 = vector.shape_cast %446 : vector<1x1xf32> to vector<1x1xf32>
      %454 = vector.broadcast %453 : vector<1x1xf32> to vector<6x1xf32>
      %455 = arith.select %452, %454, %450 : vector<6x1xi1>, vector<6x1xf32>
      %cst_81 = arith.constant 0.000000e+00 : f32
      %456 = vector.broadcast %cst_81 : f32 to vector<1x1xf32>
      %457 = arith.subf %456, %arg17 : vector<1x1xf32>
      %458 = vector.broadcast %457 : vector<1x1xf32> to vector<6x1xf32>
      %459 = arith.mulf %458, %455 : vector<6x1xf32>
      %460 = arith.cmpf oeq, %459, %459 : vector<6x1xf32>
      %cst_82 = arith.constant 0.000000e+00 : f32
      %cst_83 = arith.constant 1.000000e+00 : f32
      %461 = vector.broadcast %cst_82 : f32 to vector<6x1xf32>
      %462 = vector.broadcast %cst_83 : f32 to vector<6x1xf32>
      %463 = arith.select %460, %461, %462 : vector<6x1xi1>, vector<6x1xf32>
      %cst_84 = arith.constant dense<0xFF800000> : vector<1xf32>
      %464 = vector.multi_reduction <maximumf>, %463, %cst_84 [0] : vector<6x1xf32> to vector<1xf32>
      %465 = vector.shape_cast %464 : vector<1xf32> to vector<1x1xf32>
      %cst_85 = arith.constant 5.000000e-01 : f32
      %466 = vector.broadcast %cst_85 : f32 to vector<1x1xf32>
      %467 = arith.cmpf ogt, %465, %466 : vector<1x1xf32>
      %cst_86 = arith.constant 0.000000e+00 : f32
      %468 = vector.shape_cast %467 : vector<1x1xi1> to vector<1x1xi1>
      %469 = vector.broadcast %468 : vector<1x1xi1> to vector<6x1xi1>
      %470 = vector.broadcast %cst_86 : f32 to vector<6x1xf32>
      %471 = arith.select %469, %470, %459 : vector<6x1xi1>, vector<6x1xf32>
      %472 = vector.extract_strided_slice %471 {offsets = [0, 0], sizes = [3, 1], strides = [1, 1]} : vector<6x1xf32> to vector<3x1xf32>
      %473 = vector.extract_strided_slice %471 {offsets = [3, 0], sizes = [3, 1], strides = [1, 1]} : vector<6x1xf32> to vector<3x1xf32>
      %474 = vector.extract_strided_slice %473 {offsets = [0, 0], sizes = [1, 1], strides = [1, 1]} : vector<3x1xf32> to vector<1x1xf32>
      %475 = vector.extract_strided_slice %473 {offsets = [1, 0], sizes = [1, 1], strides = [1, 1]} : vector<3x1xf32> to vector<1x1xf32>
      %476 = vector.extract_strided_slice %473 {offsets = [2, 0], sizes = [1, 1], strides = [1, 1]} : vector<3x1xf32> to vector<1x1xf32>
      %c2_i32_87 = arith.constant 2 : i32
      %477 = vector.broadcast %c2_i32_87 : i32 to vector<3x1xi32>
      %478 = arith.cmpi eq, %10, %477 : vector<3x1xi32>
      %479 = arith.extui %478 : vector<3x1xi1> to vector<3x1xi32>
      %480 = arith.sitofp %479 : vector<3x1xi32> to vector<3x1xf32>
      %c1_i32_88 = arith.constant 1 : i32
      %481 = vector.broadcast %c1_i32_88 : i32 to vector<1x3xi32>
      %482 = arith.cmpi eq, %11, %481 : vector<1x3xi32>
      %483 = arith.extui %482 : vector<1x3xi1> to vector<1x3xi32>
      %484 = arith.sitofp %483 : vector<1x3xi32> to vector<1x3xf32>
      %485 = vector.broadcast %480 : vector<3x1xf32> to vector<3x3xf32>
      %486 = vector.broadcast %484 : vector<1x3xf32> to vector<3x3xf32>
      %487 = arith.mulf %485, %486 : vector<3x3xf32>
      %c1_i32_89 = arith.constant 1 : i32
      %488 = vector.broadcast %c1_i32_89 : i32 to vector<3x1xi32>
      %489 = arith.cmpi eq, %10, %488 : vector<3x1xi32>
      %490 = arith.extui %489 : vector<3x1xi1> to vector<3x1xi32>
      %491 = arith.sitofp %490 : vector<3x1xi32> to vector<3x1xf32>
      %c2_i32_90 = arith.constant 2 : i32
      %492 = vector.broadcast %c2_i32_90 : i32 to vector<1x3xi32>
      %493 = arith.cmpi eq, %11, %492 : vector<1x3xi32>
      %494 = arith.extui %493 : vector<1x3xi1> to vector<1x3xi32>
      %495 = arith.sitofp %494 : vector<1x3xi32> to vector<1x3xf32>
      %496 = vector.broadcast %491 : vector<3x1xf32> to vector<3x3xf32>
      %497 = vector.broadcast %495 : vector<1x3xf32> to vector<3x3xf32>
      %498 = arith.mulf %496, %497 : vector<3x3xf32>
      %499 = arith.subf %487, %498 : vector<3x3xf32>
      %500 = vector.broadcast %474 : vector<1x1xf32> to vector<3x3xf32>
      %501 = arith.mulf %500, %499 : vector<3x3xf32>
      %c0_i32_91 = arith.constant 0 : i32
      %502 = vector.broadcast %c0_i32_91 : i32 to vector<3x1xi32>
      %503 = arith.cmpi eq, %10, %502 : vector<3x1xi32>
      %504 = arith.extui %503 : vector<3x1xi1> to vector<3x1xi32>
      %505 = arith.sitofp %504 : vector<3x1xi32> to vector<3x1xf32>
      %c2_i32_92 = arith.constant 2 : i32
      %506 = vector.broadcast %c2_i32_92 : i32 to vector<1x3xi32>
      %507 = arith.cmpi eq, %11, %506 : vector<1x3xi32>
      %508 = arith.extui %507 : vector<1x3xi1> to vector<1x3xi32>
      %509 = arith.sitofp %508 : vector<1x3xi32> to vector<1x3xf32>
      %510 = vector.broadcast %505 : vector<3x1xf32> to vector<3x3xf32>
      %511 = vector.broadcast %509 : vector<1x3xf32> to vector<3x3xf32>
      %512 = arith.mulf %510, %511 : vector<3x3xf32>
      %c2_i32_93 = arith.constant 2 : i32
      %513 = vector.broadcast %c2_i32_93 : i32 to vector<3x1xi32>
      %514 = arith.cmpi eq, %10, %513 : vector<3x1xi32>
      %515 = arith.extui %514 : vector<3x1xi1> to vector<3x1xi32>
      %516 = arith.sitofp %515 : vector<3x1xi32> to vector<3x1xf32>
      %c0_i32_94 = arith.constant 0 : i32
      %517 = vector.broadcast %c0_i32_94 : i32 to vector<1x3xi32>
      %518 = arith.cmpi eq, %11, %517 : vector<1x3xi32>
      %519 = arith.extui %518 : vector<1x3xi1> to vector<1x3xi32>
      %520 = arith.sitofp %519 : vector<1x3xi32> to vector<1x3xf32>
      %521 = vector.broadcast %516 : vector<3x1xf32> to vector<3x3xf32>
      %522 = vector.broadcast %520 : vector<1x3xf32> to vector<3x3xf32>
      %523 = arith.mulf %521, %522 : vector<3x3xf32>
      %524 = arith.subf %512, %523 : vector<3x3xf32>
      %525 = vector.broadcast %475 : vector<1x1xf32> to vector<3x3xf32>
      %526 = arith.mulf %525, %524 : vector<3x3xf32>
      %527 = arith.addf %501, %526 : vector<3x3xf32>
      %c1_i32_95 = arith.constant 1 : i32
      %528 = vector.broadcast %c1_i32_95 : i32 to vector<3x1xi32>
      %529 = arith.cmpi eq, %10, %528 : vector<3x1xi32>
      %530 = arith.extui %529 : vector<3x1xi1> to vector<3x1xi32>
      %531 = arith.sitofp %530 : vector<3x1xi32> to vector<3x1xf32>
      %c0_i32_96 = arith.constant 0 : i32
      %532 = vector.broadcast %c0_i32_96 : i32 to vector<1x3xi32>
      %533 = arith.cmpi eq, %11, %532 : vector<1x3xi32>
      %534 = arith.extui %533 : vector<1x3xi1> to vector<1x3xi32>
      %535 = arith.sitofp %534 : vector<1x3xi32> to vector<1x3xf32>
      %536 = vector.broadcast %531 : vector<3x1xf32> to vector<3x3xf32>
      %537 = vector.broadcast %535 : vector<1x3xf32> to vector<3x3xf32>
      %538 = arith.mulf %536, %537 : vector<3x3xf32>
      %c0_i32_97 = arith.constant 0 : i32
      %539 = vector.broadcast %c0_i32_97 : i32 to vector<3x1xi32>
      %540 = arith.cmpi eq, %10, %539 : vector<3x1xi32>
      %541 = arith.extui %540 : vector<3x1xi1> to vector<3x1xi32>
      %542 = arith.sitofp %541 : vector<3x1xi32> to vector<3x1xf32>
      %c1_i32_98 = arith.constant 1 : i32
      %543 = vector.broadcast %c1_i32_98 : i32 to vector<1x3xi32>
      %544 = arith.cmpi eq, %11, %543 : vector<1x3xi32>
      %545 = arith.extui %544 : vector<1x3xi1> to vector<1x3xi32>
      %546 = arith.sitofp %545 : vector<1x3xi32> to vector<1x3xf32>
      %547 = vector.broadcast %542 : vector<3x1xf32> to vector<3x3xf32>
      %548 = vector.broadcast %546 : vector<1x3xf32> to vector<3x3xf32>
      %549 = arith.mulf %547, %548 : vector<3x3xf32>
      %550 = arith.subf %538, %549 : vector<3x3xf32>
      %551 = vector.broadcast %476 : vector<1x1xf32> to vector<3x3xf32>
      %552 = arith.mulf %551, %550 : vector<3x3xf32>
      %553 = arith.addf %527, %552 : vector<3x3xf32>
      %554 = arith.mulf %473, %473 : vector<3x1xf32>
      %cst_99 = arith.constant dense<0.000000e+00> : vector<1xf32>
      %555 = vector.multi_reduction <add>, %554, %cst_99 [0] : vector<3x1xf32> to vector<1xf32>
      %556 = vector.shape_cast %555 : vector<1xf32> to vector<1x1xf32>
      %557 = math.sqrt %556 : vector<1x1xf32>
      %cst_100 = arith.constant 1.000000e-07 : f32
      %558 = vector.broadcast %cst_100 : f32 to vector<1x1xf32>
      %559 = arith.cmpf olt, %557, %558 : vector<1x1xf32>
      %cst_101 = arith.constant 1.000000e+00 : f32
      %560 = vector.broadcast %cst_101 : f32 to vector<1x1xf32>
      %561 = arith.select %559, %560, %557 : vector<1x1xi1>, vector<1x1xf32>
      %562 = tpu.reciprocal %561 : vector<1x1xf32> -> vector<1x1xf32>
      %563 = vector.broadcast %562 : vector<1x1xf32> to vector<3x3xf32>
      %564 = arith.mulf %553, %563 : vector<3x3xf32>
      %565 = vector.extract_strided_slice %564 {offsets = [0, 0], sizes = [3, 1], strides = [1, 1]} : vector<3x3xf32> to vector<3x1xf32>
      %566 = vector.extract_strided_slice %564 {offsets = [0, 0], sizes = [1, 3], strides = [1, 1]} : vector<3x3xf32> to vector<1x3xf32>
      %567 = vector.broadcast %565 : vector<3x1xf32> to vector<3x3xf32>
      %568 = vector.broadcast %566 : vector<1x3xf32> to vector<3x3xf32>
      %569 = arith.mulf %567, %568 : vector<3x3xf32>
      %570 = vector.extract_strided_slice %564 {offsets = [0, 1], sizes = [3, 1], strides = [1, 1]} : vector<3x3xf32> to vector<3x1xf32>
      %571 = vector.extract_strided_slice %564 {offsets = [1, 0], sizes = [1, 3], strides = [1, 1]} : vector<3x3xf32> to vector<1x3xf32>
      %572 = vector.broadcast %570 : vector<3x1xf32> to vector<3x3xf32>
      %573 = vector.broadcast %571 : vector<1x3xf32> to vector<3x3xf32>
      %574 = arith.mulf %572, %573 : vector<3x3xf32>
      %575 = arith.addf %569, %574 : vector<3x3xf32>
      %576 = vector.extract_strided_slice %564 {offsets = [0, 2], sizes = [3, 1], strides = [1, 1]} : vector<3x3xf32> to vector<3x1xf32>
      %577 = vector.extract_strided_slice %564 {offsets = [2, 0], sizes = [1, 3], strides = [1, 1]} : vector<3x3xf32> to vector<1x3xf32>
      %578 = vector.broadcast %576 : vector<3x1xf32> to vector<3x3xf32>
      %579 = vector.broadcast %577 : vector<1x3xf32> to vector<3x3xf32>
      %580 = arith.mulf %578, %579 : vector<3x3xf32>
      %581 = arith.addf %575, %580 : vector<3x3xf32>
      %cst_102 = arith.constant 0.159154937 : f32
      %582 = vector.broadcast %cst_102 : f32 to vector<1x1xf32>
      %583 = arith.mulf %557, %582 : vector<1x1xf32>
      %584 = math.roundeven %583 : vector<1x1xf32>
      %cst_103 = arith.constant 6.28318548 : f32
      %585 = vector.broadcast %cst_103 : f32 to vector<1x1xf32>
      %586 = arith.mulf %585, %584 : vector<1x1xf32>
      %587 = arith.subf %557, %586 : vector<1x1xf32>
      %588 = arith.mulf %587, %587 : vector<1x1xf32>
      %cst_104 = arith.constant -7.6471636E-13 : f32
      %589 = vector.broadcast %cst_104 : f32 to vector<1x1xf32>
      %590 = arith.mulf %589, %588 : vector<1x1xf32>
      %cst_105 = arith.constant 1.60590444E-10 : f32
      %591 = vector.broadcast %cst_105 : f32 to vector<1x1xf32>
      %592 = arith.addf %590, %591 : vector<1x1xf32>
      %593 = arith.mulf %592, %588 : vector<1x1xf32>
      %cst_106 = arith.constant -2.50521079E-8 : f32
      %594 = vector.broadcast %cst_106 : f32 to vector<1x1xf32>
      %595 = arith.addf %593, %594 : vector<1x1xf32>
      %596 = arith.mulf %595, %588 : vector<1x1xf32>
      %cst_107 = arith.constant 2.75573188E-6 : f32
      %597 = vector.broadcast %cst_107 : f32 to vector<1x1xf32>
      %598 = arith.addf %596, %597 : vector<1x1xf32>
      %599 = arith.mulf %598, %588 : vector<1x1xf32>
      %cst_108 = arith.constant -1.98412701E-4 : f32
      %600 = vector.broadcast %cst_108 : f32 to vector<1x1xf32>
      %601 = arith.addf %599, %600 : vector<1x1xf32>
      %602 = arith.mulf %601, %588 : vector<1x1xf32>
      %cst_109 = arith.constant 0.00833333377 : f32
      %603 = vector.broadcast %cst_109 : f32 to vector<1x1xf32>
      %604 = arith.addf %602, %603 : vector<1x1xf32>
      %605 = arith.mulf %604, %588 : vector<1x1xf32>
      %cst_110 = arith.constant -0.166666672 : f32
      %606 = vector.broadcast %cst_110 : f32 to vector<1x1xf32>
      %607 = arith.addf %605, %606 : vector<1x1xf32>
      %608 = arith.mulf %607, %588 : vector<1x1xf32>
      %cst_111 = arith.constant 1.000000e+00 : f32
      %609 = vector.broadcast %cst_111 : f32 to vector<1x1xf32>
      %610 = arith.addf %608, %609 : vector<1x1xf32>
      %611 = arith.mulf %610, %587 : vector<1x1xf32>
      %cst_112 = arith.constant 4.77947726E-14 : f32
      %612 = vector.broadcast %cst_112 : f32 to vector<1x1xf32>
      %613 = arith.mulf %612, %588 : vector<1x1xf32>
      %cst_113 = arith.constant -1.14707454E-11 : f32
      %614 = vector.broadcast %cst_113 : f32 to vector<1x1xf32>
      %615 = arith.addf %613, %614 : vector<1x1xf32>
      %616 = arith.mulf %615, %588 : vector<1x1xf32>
      %cst_114 = arith.constant 2.08767559E-9 : f32
      %617 = vector.broadcast %cst_114 : f32 to vector<1x1xf32>
      %618 = arith.addf %616, %617 : vector<1x1xf32>
      %619 = arith.mulf %618, %588 : vector<1x1xf32>
      %cst_115 = arith.constant -2.755732E-7 : f32
      %620 = vector.broadcast %cst_115 : f32 to vector<1x1xf32>
      %621 = arith.addf %619, %620 : vector<1x1xf32>
      %622 = arith.mulf %621, %588 : vector<1x1xf32>
      %cst_116 = arith.constant 2.48015876E-5 : f32
      %623 = vector.broadcast %cst_116 : f32 to vector<1x1xf32>
      %624 = arith.addf %622, %623 : vector<1x1xf32>
      %625 = arith.mulf %624, %588 : vector<1x1xf32>
      %cst_117 = arith.constant -0.00138888892 : f32
      %626 = vector.broadcast %cst_117 : f32 to vector<1x1xf32>
      %627 = arith.addf %625, %626 : vector<1x1xf32>
      %628 = arith.mulf %627, %588 : vector<1x1xf32>
      %cst_118 = arith.constant 0.0416666679 : f32
      %629 = vector.broadcast %cst_118 : f32 to vector<1x1xf32>
      %630 = arith.addf %628, %629 : vector<1x1xf32>
      %631 = arith.mulf %630, %588 : vector<1x1xf32>
      %cst_119 = arith.constant -5.000000e-01 : f32
      %632 = vector.broadcast %cst_119 : f32 to vector<1x1xf32>
      %633 = arith.addf %631, %632 : vector<1x1xf32>
      %634 = arith.mulf %633, %588 : vector<1x1xf32>
      %cst_120 = arith.constant 1.000000e+00 : f32
      %635 = vector.broadcast %cst_120 : f32 to vector<1x1xf32>
      %636 = arith.addf %634, %635 : vector<1x1xf32>
      %637 = vector.broadcast %611 : vector<1x1xf32> to vector<3x3xf32>
      %638 = arith.mulf %564, %637 : vector<3x3xf32>
      %cst_121 = arith.constant 1.000000e+00 : f32
      %639 = vector.broadcast %cst_121 : f32 to vector<1x1xf32>
      %640 = arith.subf %639, %636 : vector<1x1xf32>
      %641 = vector.broadcast %640 : vector<1x1xf32> to vector<3x3xf32>
      %642 = arith.mulf %581, %641 : vector<3x3xf32>
      %643 = arith.addf %638, %642 : vector<3x3xf32>
      %644 = vector.shape_cast %559 : vector<1x1xi1> to vector<1x1xi1>
      %645 = vector.broadcast %644 : vector<1x1xi1> to vector<3x3xi1>
      %646 = arith.select %645, %564, %643 : vector<3x3xi1>, vector<3x3xf32>
      %647 = arith.addf %16, %646 : vector<3x3xf32>
      %648 = vector.extract_strided_slice %647 {offsets = [0, 0], sizes = [3, 1], strides = [1, 1]} : vector<3x3xf32> to vector<3x1xf32>
      %649 = vector.extract_strided_slice %arg8 {offsets = [0, 0], sizes = [1, 3], strides = [1, 1]} : vector<3x3xf32> to vector<1x3xf32>
      %650 = vector.broadcast %648 : vector<3x1xf32> to vector<3x3xf32>
      %651 = vector.broadcast %649 : vector<1x3xf32> to vector<3x3xf32>
      %652 = arith.mulf %650, %651 : vector<3x3xf32>
      %653 = vector.extract_strided_slice %647 {offsets = [0, 1], sizes = [3, 1], strides = [1, 1]} : vector<3x3xf32> to vector<3x1xf32>
      %654 = vector.extract_strided_slice %arg8 {offsets = [1, 0], sizes = [1, 3], strides = [1, 1]} : vector<3x3xf32> to vector<1x3xf32>
      %655 = vector.broadcast %653 : vector<3x1xf32> to vector<3x3xf32>
      %656 = vector.broadcast %654 : vector<1x3xf32> to vector<3x3xf32>
      %657 = arith.mulf %655, %656 : vector<3x3xf32>
      %658 = arith.addf %652, %657 : vector<3x3xf32>
      %659 = vector.extract_strided_slice %647 {offsets = [0, 2], sizes = [3, 1], strides = [1, 1]} : vector<3x3xf32> to vector<3x1xf32>
      %660 = vector.extract_strided_slice %arg8 {offsets = [2, 0], sizes = [1, 3], strides = [1, 1]} : vector<3x3xf32> to vector<1x3xf32>
      %661 = vector.broadcast %659 : vector<3x1xf32> to vector<3x3xf32>
      %662 = vector.broadcast %660 : vector<1x3xf32> to vector<3x3xf32>
      %663 = arith.mulf %661, %662 : vector<3x3xf32>
      %664 = arith.addf %658, %663 : vector<3x3xf32>
      %665 = vector.extract_strided_slice %647 {offsets = [0, 0], sizes = [3, 1], strides = [1, 1]} : vector<3x3xf32> to vector<3x1xf32>
      %666 = vector.extract_strided_slice %arg9 {offsets = [0, 0], sizes = [1, 1], strides = [1, 1]} : vector<3x1xf32> to vector<1x1xf32>
      %667 = vector.broadcast %666 : vector<1x1xf32> to vector<3x1xf32>
      %668 = arith.mulf %665, %667 : vector<3x1xf32>
      %669 = vector.extract_strided_slice %647 {offsets = [0, 1], sizes = [3, 1], strides = [1, 1]} : vector<3x3xf32> to vector<3x1xf32>
      %670 = vector.extract_strided_slice %arg9 {offsets = [1, 0], sizes = [1, 1], strides = [1, 1]} : vector<3x1xf32> to vector<1x1xf32>
      %671 = vector.broadcast %670 : vector<1x1xf32> to vector<3x1xf32>
      %672 = arith.mulf %669, %671 : vector<3x1xf32>
      %673 = arith.addf %668, %672 : vector<3x1xf32>
      %674 = vector.extract_strided_slice %647 {offsets = [0, 2], sizes = [3, 1], strides = [1, 1]} : vector<3x3xf32> to vector<3x1xf32>
      %675 = vector.extract_strided_slice %arg9 {offsets = [2, 0], sizes = [1, 1], strides = [1, 1]} : vector<3x1xf32> to vector<1x1xf32>
      %676 = vector.broadcast %675 : vector<1x1xf32> to vector<3x1xf32>
      %677 = arith.mulf %674, %676 : vector<3x1xf32>
      %678 = arith.addf %673, %677 : vector<3x1xf32>
      %679 = arith.addf %678, %472 : vector<3x1xf32>
      %680 = vector.extract_strided_slice %664 {offsets = [0, 0], sizes = [3, 1], strides = [1, 1]} : vector<3x3xf32> to vector<3x1xf32>
      %681 = vector.broadcast %680 : vector<3x1xf32> to vector<3x128xf32>
      %682 = vector.broadcast %1 : vector<1x128xf32> to vector<3x128xf32>
      %683 = arith.mulf %681, %682 : vector<3x128xf32>
      %684 = vector.extract_strided_slice %664 {offsets = [0, 1], sizes = [3, 1], strides = [1, 1]} : vector<3x3xf32> to vector<3x1xf32>
      %685 = vector.broadcast %684 : vector<3x1xf32> to vector<3x128xf32>
      %686 = vector.broadcast %2 : vector<1x128xf32> to vector<3x128xf32>
      %687 = arith.mulf %685, %686 : vector<3x128xf32>
      %688 = arith.addf %683, %687 : vector<3x128xf32>
      %689 = vector.extract_strided_slice %664 {offsets = [0, 2], sizes = [3, 1], strides = [1, 1]} : vector<3x3xf32> to vector<3x1xf32>
      %690 = vector.broadcast %689 : vector<3x1xf32> to vector<3x128xf32>
      %691 = vector.broadcast %3 : vector<1x128xf32> to vector<3x128xf32>
      %692 = arith.mulf %690, %691 : vector<3x128xf32>
      %693 = arith.addf %688, %692 : vector<3x128xf32>
      %694 = vector.broadcast %679 : vector<3x1xf32> to vector<3x128xf32>
      %695 = arith.addf %693, %694 : vector<3x128xf32>
      %696 = vector.extract_strided_slice %695 {offsets = [0, 0], sizes = [1, 128], strides = [1, 1]} : vector<3x128xf32> to vector<1x128xf32>
      %697 = vector.extract_strided_slice %695 {offsets = [1, 0], sizes = [1, 128], strides = [1, 1]} : vector<3x128xf32> to vector<1x128xf32>
      %698 = vector.extract_strided_slice %695 {offsets = [2, 0], sizes = [1, 128], strides = [1, 1]} : vector<3x128xf32> to vector<1x128xf32>
      %699 = vector.broadcast %22 : f32 to vector<1x128xf32>
      %700 = arith.mulf %699, %696 : vector<1x128xf32>
      %701 = vector.broadcast %23 : f32 to vector<1x128xf32>
      %702 = arith.mulf %701, %697 : vector<1x128xf32>
      %703 = arith.addf %700, %702 : vector<1x128xf32>
      %704 = vector.broadcast %24 : f32 to vector<1x128xf32>
      %705 = arith.mulf %704, %698 : vector<1x128xf32>
      %706 = arith.addf %703, %705 : vector<1x128xf32>
      %707 = vector.broadcast %25 : f32 to vector<1x128xf32>
      %708 = arith.mulf %707, %696 : vector<1x128xf32>
      %709 = vector.broadcast %26 : f32 to vector<1x128xf32>
      %710 = arith.mulf %709, %697 : vector<1x128xf32>
      %711 = arith.addf %708, %710 : vector<1x128xf32>
      %712 = vector.broadcast %27 : f32 to vector<1x128xf32>
      %713 = arith.mulf %712, %698 : vector<1x128xf32>
      %714 = arith.addf %711, %713 : vector<1x128xf32>
      %715 = vector.broadcast %28 : f32 to vector<1x128xf32>
      %716 = arith.mulf %715, %696 : vector<1x128xf32>
      %717 = vector.broadcast %29 : f32 to vector<1x128xf32>
      %718 = arith.mulf %717, %697 : vector<1x128xf32>
      %719 = arith.addf %716, %718 : vector<1x128xf32>
      %720 = vector.broadcast %30 : f32 to vector<1x128xf32>
      %721 = arith.mulf %720, %698 : vector<1x128xf32>
      %722 = arith.addf %719, %721 : vector<1x128xf32>
      %cst_122 = arith.constant 9.99999997E-7 : f32
      %723 = vector.broadcast %cst_122 : f32 to vector<1x128xf32>
      %724 = arith.cmpf ogt, %722, %723 : vector<1x128xf32>
      %cst_123 = arith.constant 1.000000e+00 : f32
      %725 = vector.broadcast %cst_123 : f32 to vector<1x128xf32>
      %726 = arith.select %724, %722, %725 : vector<1x128xi1>, vector<1x128xf32>
      %727 = tpu.reciprocal %726 : vector<1x128xf32> -> vector<1x128xf32>
      %728 = arith.mulf %706, %727 : vector<1x128xf32>
      %729 = math.roundeven %728 : vector<1x128xf32>
      %730 = arith.fptosi %729 : vector<1x128xf32> to vector<1x128xi32>
      %c1_i32_124 = arith.constant 1 : i32
      %731 = vector.broadcast %c1_i32_124 : i32 to vector<1x128xi32>
      %732 = arith.subi %730, %731 : vector<1x128xi32>
      %733 = arith.mulf %714, %727 : vector<1x128xf32>
      %734 = math.roundeven %733 : vector<1x128xf32>
      %735 = arith.fptosi %734 : vector<1x128xf32> to vector<1x128xi32>
      %c1_i32_125 = arith.constant 1 : i32
      %736 = vector.broadcast %c1_i32_125 : i32 to vector<1x128xi32>
      %737 = arith.subi %735, %736 : vector<1x128xi32>
      %738 = arith.andi %7, %724 : vector<1x128xi1>
      %c0_i32_126 = arith.constant 0 : i32
      %739 = vector.broadcast %c0_i32_126 : i32 to vector<1x128xi32>
      %740 = arith.cmpi sge, %732, %739 : vector<1x128xi32>
      %741 = arith.andi %738, %740 : vector<1x128xi1>
      %c0_i32_127 = arith.constant 0 : i32
      %742 = vector.broadcast %c0_i32_127 : i32 to vector<1x128xi32>
      %743 = arith.cmpi sge, %737, %742 : vector<1x128xi32>
      %744 = arith.andi %741, %743 : vector<1x128xi1>
      %c16_i32_128 = arith.constant 16 : i32
      %745 = vector.broadcast %c16_i32_128 : i32 to vector<1x128xi32>
      %746 = arith.cmpi slt, %732, %745 : vector<1x128xi32>
      %747 = arith.andi %744, %746 : vector<1x128xi1>
      %c16_i32_129 = arith.constant 16 : i32
      %748 = vector.broadcast %c16_i32_129 : i32 to vector<1x128xi32>
      %749 = arith.cmpi slt, %737, %748 : vector<1x128xi32>
      %750 = arith.andi %747, %749 : vector<1x128xi1>
      %751 = arith.sitofp %737 : vector<1x128xi32> to vector<1x128xf32>
      %cst_130 = arith.constant 1.000000e+00 : f32
      %752 = vector.broadcast %cst_130 : f32 to vector<1x128xf32>
      %753 = arith.mulf %751, %752 : vector<1x128xf32>
      %754 = math.floor %753 : vector<1x128xf32>
      %755 = arith.fptosi %754 : vector<1x128xf32> to vector<1x128xi32>
      %756 = arith.sitofp %732 : vector<1x128xi32> to vector<1x128xf32>
      %cst_131 = arith.constant 1.000000e+00 : f32
      %757 = vector.broadcast %cst_131 : f32 to vector<1x128xf32>
      %758 = arith.mulf %756, %757 : vector<1x128xf32>
      %759 = math.floor %758 : vector<1x128xf32>
      %760 = arith.fptosi %759 : vector<1x128xf32> to vector<1x128xi32>
      %c16_i32_132 = arith.constant 16 : i32
      %761 = vector.broadcast %c16_i32_132 : i32 to vector<1x128xi32>
      %762 = arith.muli %755, %761 : vector<1x128xi32>
      %763 = arith.addi %762, %760 : vector<1x128xi32>
      %764 = arith.extui %750 : vector<1x128xi1> to vector<1x128xi32>
      %765 = arith.sitofp %764 : vector<1x128xi32> to vector<1x128xf32>
      %cst_133 = arith.constant dense<0.000000e+00> : vector<1xf32>
      %766 = vector.multi_reduction <add>, %765, %cst_133 [1] : vector<1x128xf32> to vector<1xf32>
      %767 = vector.shape_cast %766 : vector<1xf32> to vector<1x1xf32>
      %c0_i32_134 = arith.constant 0 : i32
      %768 = vector.broadcast %c0_i32_134 : i32 to vector<1x128xi32>
      %769 = arith.subi %763, %768 : vector<1x128xi32>
      %770 = vector.broadcast %769 : vector<1x128xi32> to vector<256x128xi32>
      %771 = arith.cmpi eq, %8, %770 : vector<256x128xi32>
      %772 = vector.broadcast %750 : vector<1x128xi1> to vector<256x128xi1>
      %773 = arith.andi %771, %772 : vector<256x128xi1>
      %774 = arith.extui %773 : vector<256x128xi1> to vector<256x128xi32>
      %775 = arith.sitofp %774 : vector<256x128xi32> to vector<256x128xf32>
      %776 = arith.truncf %775 : vector<256x128xf32> to vector<256x128xbf16>
      %c0_135 = arith.constant 0 : index
      %c0_136 = arith.constant 0 : index
      %c0_137 = arith.constant 0 : index
      %777 = vector.load %arg5[%c0_135, %c0_136, %c0_137] : memref<1x24x256xbf16, #tpu.memory_space<vmem>>, vector<1x24x256xbf16>
      %778 = vector.shape_cast %777 : vector<1x24x256xbf16> to vector<24x256xbf16>
      %cst_138 = arith.constant dense<0.000000e+00> : vector<24x128xf32>
      %779 = tpu.matmul %778, %776, %cst_138 {dimension_numbers = #tpu.dot_dimension_numbers<[1], [0], [0], [1], [0, 0, 1, 1], [], []>} : vector<24x256xbf16>, vector<256x128xbf16>, vector<24x128xf32> -> vector<24x128xf32>
      %780 = vector.extract_strided_slice %779 {offsets = [0, 0], sizes = [8, 128], strides = [1, 1]} : vector<24x128xf32> to vector<8x128xf32>
      %781 = vector.extract_strided_slice %779 {offsets = [8, 0], sizes = [8, 128], strides = [1, 1]} : vector<24x128xf32> to vector<8x128xf32>
      %782 = vector.extract_strided_slice %779 {offsets = [16, 0], sizes = [8, 128], strides = [1, 1]} : vector<24x128xf32> to vector<8x128xf32>
      %783 = arith.subf %780, %4 : vector<8x128xf32>
      %784 = vector.broadcast %765 : vector<1x128xf32> to vector<8x128xf32>
      %785 = arith.mulf %783, %784 : vector<8x128xf32>
      %786 = arith.mulf %785, %785 : vector<8x128xf32>
      %cst_139 = arith.constant dense<0.000000e+00> : vector<128xf32>
      %787 = vector.multi_reduction <add>, %786, %cst_139 [0] : vector<8x128xf32> to vector<128xf32>
      %788 = vector.shape_cast %787 : vector<128xf32> to vector<1x128xf32>
      %cst_140 = arith.constant 5.000000e-01 : f32
      %789 = vector.broadcast %cst_140 : f32 to vector<1x128xf32>
      %790 = arith.mulf %789, %788 : vector<1x128xf32>
      %cst_141 = arith.constant dense<0.000000e+00> : vector<1xf32>
      %791 = vector.multi_reduction <add>, %790, %cst_141 [1] : vector<1x128xf32> to vector<1xf32>
      %792 = vector.shape_cast %791 : vector<1xf32> to vector<1x1xf32>
      %cst_142 = arith.constant 1.000000e+00 : f32
      %793 = vector.broadcast %cst_142 : f32 to vector<1x1xf32>
      %794 = arith.maximumf %767, %793 : vector<1x1xf32>
      %795 = tpu.reciprocal %794 : vector<1x1xf32> -> vector<1x1xf32>
      %796 = arith.mulf %792, %795 : vector<1x1xf32>
      %797 = arith.mulf %781, %785 : vector<8x128xf32>
      %cst_143 = arith.constant dense<0.000000e+00> : vector<128xf32>
      %798 = vector.multi_reduction <add>, %797, %cst_143 [0] : vector<8x128xf32> to vector<128xf32>
      %799 = vector.shape_cast %798 : vector<128xf32> to vector<1x128xf32>
      %800 = arith.mulf %782, %785 : vector<8x128xf32>
      %cst_144 = arith.constant dense<0.000000e+00> : vector<128xf32>
      %801 = vector.multi_reduction <add>, %800, %cst_144 [0] : vector<8x128xf32> to vector<128xf32>
      %802 = vector.shape_cast %801 : vector<128xf32> to vector<1x128xf32>
      %803 = arith.mulf %781, %781 : vector<8x128xf32>
      %cst_145 = arith.constant dense<0.000000e+00> : vector<128xf32>
      %804 = vector.multi_reduction <add>, %803, %cst_145 [0] : vector<8x128xf32> to vector<128xf32>
      %805 = vector.shape_cast %804 : vector<128xf32> to vector<1x128xf32>
      %806 = arith.mulf %805, %765 : vector<1x128xf32>
      %807 = arith.mulf %781, %782 : vector<8x128xf32>
      %cst_146 = arith.constant dense<0.000000e+00> : vector<128xf32>
      %808 = vector.multi_reduction <add>, %807, %cst_146 [0] : vector<8x128xf32> to vector<128xf32>
      %809 = vector.shape_cast %808 : vector<128xf32> to vector<1x128xf32>
      %810 = arith.mulf %809, %765 : vector<1x128xf32>
      %811 = arith.mulf %782, %782 : vector<8x128xf32>
      %cst_147 = arith.constant dense<0.000000e+00> : vector<128xf32>
      %812 = vector.multi_reduction <add>, %811, %cst_147 [0] : vector<8x128xf32> to vector<128xf32>
      %813 = vector.shape_cast %812 : vector<128xf32> to vector<1x128xf32>
      %814 = arith.mulf %813, %765 : vector<1x128xf32>
      %815 = math.absf %698 : vector<1x128xf32>
      %cst_148 = arith.constant 9.99999996E-13 : f32
      %816 = vector.broadcast %cst_148 : f32 to vector<1x128xf32>
      %817 = arith.cmpf ogt, %815, %816 : vector<1x128xf32>
      %818 = arith.andi %750, %817 : vector<1x128xi1>
      %cst_149 = arith.constant 1.000000e+00 : f32
      %819 = vector.broadcast %cst_149 : f32 to vector<1x128xf32>
      %820 = arith.select %818, %698, %819 : vector<1x128xi1>, vector<1x128xf32>
      %821 = tpu.reciprocal %820 {approx = true} : vector<1x128xf32> -> vector<1x128xf32>
      %822 = vector.broadcast %22 : f32 to vector<1x128xf32>
      %823 = arith.mulf %822, %821 : vector<1x128xf32>
      %cst_150 = arith.constant 0.000000e+00 : f32
      %824 = arith.subf %cst_150, %22 : f32
      %825 = vector.broadcast %824 : f32 to vector<1x128xf32>
      %826 = arith.mulf %825, %696 : vector<1x128xf32>
      %827 = arith.mulf %826, %821 : vector<1x128xf32>
      %828 = arith.mulf %827, %821 : vector<1x128xf32>
      %829 = vector.broadcast %26 : f32 to vector<1x128xf32>
      %830 = arith.mulf %829, %821 : vector<1x128xf32>
      %cst_151 = arith.constant 0.000000e+00 : f32
      %831 = arith.subf %cst_151, %26 : f32
      %832 = vector.broadcast %831 : f32 to vector<1x128xf32>
      %833 = arith.mulf %832, %697 : vector<1x128xf32>
      %834 = arith.mulf %833, %821 : vector<1x128xf32>
      %835 = arith.mulf %834, %821 : vector<1x128xf32>
      %c0_i32_152 = arith.constant 0 : i32
      %836 = vector.broadcast %c0_i32_152 : i32 to vector<6x1xi32>
      %837 = arith.cmpi eq, %9, %836 : vector<6x1xi32>
      %838 = arith.extui %837 : vector<6x1xi1> to vector<6x1xi32>
      %839 = arith.sitofp %838 : vector<6x1xi32> to vector<6x1xf32>
      %c4_i32_153 = arith.constant 4 : i32
      %840 = vector.broadcast %c4_i32_153 : i32 to vector<6x1xi32>
      %841 = arith.cmpi eq, %9, %840 : vector<6x1xi32>
      %842 = arith.extui %841 : vector<6x1xi1> to vector<6x1xi32>
      %843 = arith.sitofp %842 : vector<6x1xi32> to vector<6x1xf32>
      %844 = vector.broadcast %843 : vector<6x1xf32> to vector<6x128xf32>
      %845 = vector.broadcast %698 : vector<1x128xf32> to vector<6x128xf32>
      %846 = arith.mulf %844, %845 : vector<6x128xf32>
      %847 = vector.broadcast %839 : vector<6x1xf32> to vector<6x128xf32>
      %848 = arith.addf %847, %846 : vector<6x128xf32>
      %c5_i32_154 = arith.constant 5 : i32
      %849 = vector.broadcast %c5_i32_154 : i32 to vector<6x1xi32>
      %850 = arith.cmpi eq, %9, %849 : vector<6x1xi32>
      %851 = arith.extui %850 : vector<6x1xi1> to vector<6x1xi32>
      %852 = arith.sitofp %851 : vector<6x1xi32> to vector<6x1xf32>
      %853 = vector.broadcast %852 : vector<6x1xf32> to vector<6x128xf32>
      %854 = vector.broadcast %697 : vector<1x128xf32> to vector<6x128xf32>
      %855 = arith.mulf %853, %854 : vector<6x128xf32>
      %856 = arith.subf %848, %855 : vector<6x128xf32>
      %c1_i32_155 = arith.constant 1 : i32
      %857 = vector.broadcast %c1_i32_155 : i32 to vector<6x1xi32>
      %858 = arith.cmpi eq, %9, %857 : vector<6x1xi32>
      %859 = arith.extui %858 : vector<6x1xi1> to vector<6x1xi32>
      %860 = arith.sitofp %859 : vector<6x1xi32> to vector<6x1xf32>
      %c3_i32_156 = arith.constant 3 : i32
      %861 = vector.broadcast %c3_i32_156 : i32 to vector<6x1xi32>
      %862 = arith.cmpi eq, %9, %861 : vector<6x1xi32>
      %863 = arith.extui %862 : vector<6x1xi1> to vector<6x1xi32>
      %864 = arith.sitofp %863 : vector<6x1xi32> to vector<6x1xf32>
      %865 = vector.broadcast %864 : vector<6x1xf32> to vector<6x128xf32>
      %866 = vector.broadcast %698 : vector<1x128xf32> to vector<6x128xf32>
      %867 = arith.mulf %865, %866 : vector<6x128xf32>
      %868 = vector.broadcast %860 : vector<6x1xf32> to vector<6x128xf32>
      %869 = arith.subf %868, %867 : vector<6x128xf32>
      %c5_i32_157 = arith.constant 5 : i32
      %870 = vector.broadcast %c5_i32_157 : i32 to vector<6x1xi32>
      %871 = arith.cmpi eq, %9, %870 : vector<6x1xi32>
      %872 = arith.extui %871 : vector<6x1xi1> to vector<6x1xi32>
      %873 = arith.sitofp %872 : vector<6x1xi32> to vector<6x1xf32>
      %874 = vector.broadcast %873 : vector<6x1xf32> to vector<6x128xf32>
      %875 = vector.broadcast %696 : vector<1x128xf32> to vector<6x128xf32>
      %876 = arith.mulf %874, %875 : vector<6x128xf32>
      %877 = arith.addf %869, %876 : vector<6x128xf32>
      %c2_i32_158 = arith.constant 2 : i32
      %878 = vector.broadcast %c2_i32_158 : i32 to vector<6x1xi32>
      %879 = arith.cmpi eq, %9, %878 : vector<6x1xi32>
      %880 = arith.extui %879 : vector<6x1xi1> to vector<6x1xi32>
      %881 = arith.sitofp %880 : vector<6x1xi32> to vector<6x1xf32>
      %c3_i32_159 = arith.constant 3 : i32
      %882 = vector.broadcast %c3_i32_159 : i32 to vector<6x1xi32>
      %883 = arith.cmpi eq, %9, %882 : vector<6x1xi32>
      %884 = arith.extui %883 : vector<6x1xi1> to vector<6x1xi32>
      %885 = arith.sitofp %884 : vector<6x1xi32> to vector<6x1xf32>
      %886 = vector.broadcast %885 : vector<6x1xf32> to vector<6x128xf32>
      %887 = vector.broadcast %697 : vector<1x128xf32> to vector<6x128xf32>
      %888 = arith.mulf %886, %887 : vector<6x128xf32>
      %889 = vector.broadcast %881 : vector<6x1xf32> to vector<6x128xf32>
      %890 = arith.addf %889, %888 : vector<6x128xf32>
      %c4_i32_160 = arith.constant 4 : i32
      %891 = vector.broadcast %c4_i32_160 : i32 to vector<6x1xi32>
      %892 = arith.cmpi eq, %9, %891 : vector<6x1xi32>
      %893 = arith.extui %892 : vector<6x1xi1> to vector<6x1xi32>
      %894 = arith.sitofp %893 : vector<6x1xi32> to vector<6x1xf32>
      %895 = vector.broadcast %894 : vector<6x1xf32> to vector<6x128xf32>
      %896 = vector.broadcast %696 : vector<1x128xf32> to vector<6x128xf32>
      %897 = arith.mulf %895, %896 : vector<6x128xf32>
      %898 = arith.subf %890, %897 : vector<6x128xf32>
      %899 = vector.broadcast %823 : vector<1x128xf32> to vector<6x128xf32>
      %900 = arith.mulf %899, %856 : vector<6x128xf32>
      %901 = vector.broadcast %828 : vector<1x128xf32> to vector<6x128xf32>
      %902 = arith.mulf %901, %898 : vector<6x128xf32>
      %903 = arith.addf %900, %902 : vector<6x128xf32>
      %904 = vector.broadcast %830 : vector<1x128xf32> to vector<6x128xf32>
      %905 = arith.mulf %904, %877 : vector<6x128xf32>
      %906 = vector.broadcast %835 : vector<1x128xf32> to vector<6x128xf32>
      %907 = arith.mulf %906, %898 : vector<6x128xf32>
      %908 = arith.addf %905, %907 : vector<6x128xf32>
      %909 = vector.broadcast %799 : vector<1x128xf32> to vector<6x128xf32>
      %910 = arith.mulf %903, %909 : vector<6x128xf32>
      %911 = vector.broadcast %802 : vector<1x128xf32> to vector<6x128xf32>
      %912 = arith.mulf %908, %911 : vector<6x128xf32>
      %913 = arith.addf %910, %912 : vector<6x128xf32>
      %cst_161 = arith.constant dense<0.000000e+00> : vector<6xf32>
      %914 = vector.multi_reduction <add>, %913, %cst_161 [1] : vector<6x128xf32> to vector<6xf32>
      %915 = vector.shape_cast %914 : vector<6xf32> to vector<6x1xf32>
      %916 = vector.broadcast %806 : vector<1x128xf32> to vector<6x128xf32>
      %917 = arith.mulf %916, %903 : vector<6x128xf32>
      %918 = vector.broadcast %810 : vector<1x128xf32> to vector<6x128xf32>
      %919 = arith.mulf %918, %908 : vector<6x128xf32>
      %920 = arith.addf %917, %919 : vector<6x128xf32>
      %921 = vector.broadcast %810 : vector<1x128xf32> to vector<6x128xf32>
      %922 = arith.mulf %921, %903 : vector<6x128xf32>
      %923 = vector.broadcast %814 : vector<1x128xf32> to vector<6x128xf32>
      %924 = arith.mulf %923, %908 : vector<6x128xf32>
      %925 = arith.addf %922, %924 : vector<6x128xf32>
      %cst_162 = arith.constant dense<0.000000e+00> : vector<6x6xf32>
      %926 = tpu.matmul %920, %903, %cst_162 {dimension_numbers = #tpu.dot_dimension_numbers<[1], [1], [0], [0], [0, 0, 1, 0], [], []>} : vector<6x128xf32>, vector<6x128xf32>, vector<6x6xf32> -> vector<6x6xf32>
      %cst_163 = arith.constant dense<0.000000e+00> : vector<6x6xf32>
      %927 = tpu.matmul %925, %908, %cst_163 {dimension_numbers = #tpu.dot_dimension_numbers<[1], [1], [0], [0], [0, 0, 1, 0], [], []>} : vector<6x128xf32>, vector<6x128xf32>, vector<6x6xf32> -> vector<6x6xf32>
      %928 = arith.addf %926, %927 : vector<6x6xf32>
      %cst_164 = arith.constant 5.000000e-01 : f32
      %929 = vector.broadcast %cst_164 : f32 to vector<1x1xf32>
      %930 = arith.cmpf olt, %767, %929 : vector<1x1xf32>
      %cst_165 = arith.constant dense<true> : vector<1x1xi1>
      %931 = arith.xori %467, %cst_165 : vector<1x1xi1>
      %932 = arith.andi %304, %931 : vector<1x1xi1>
      %cst_166 = arith.constant dense<true> : vector<1x1xi1>
      %933 = arith.xori %930, %cst_166 : vector<1x1xi1>
      %934 = arith.andi %932, %933 : vector<1x1xi1>
      %935 = arith.cmpf ogt, %796, %arg14 : vector<1x1xf32>
      %cst_167 = arith.constant 1.000000e+01 : f32
      %cst_168 = arith.constant 1.000000e-01 : f32
      %936 = vector.broadcast %cst_167 : f32 to vector<1x1xf32>
      %937 = vector.broadcast %cst_168 : f32 to vector<1x1xf32>
      %938 = arith.select %935, %936, %937 : vector<1x1xi1>, vector<1x1xf32>
      %939 = arith.mulf %arg16, %938 : vector<1x1xf32>
      %cst_169 = arith.constant 9.99999997E-7 : f32
      %cst_170 = arith.constant 1.000000e+04 : f32
      %940 = vector.broadcast %cst_169 : f32 to vector<1x1xf32>
      %941 = arith.maximumf %940, %939 : vector<1x1xf32>
      %942 = vector.broadcast %cst_170 : f32 to vector<1x1xf32>
      %943 = arith.minimumf %942, %941 : vector<1x1xf32>
      %944 = arith.select %934, %943, %arg16 : vector<1x1xi1>, vector<1x1xf32>
      %cst_171 = arith.constant 1.000000e-01 : f32
      %945 = vector.broadcast %cst_171 : f32 to vector<1x1xf32>
      %946 = arith.mulf %945, %arg17 : vector<1x1xf32>
      %cst_172 = arith.constant 1.000000e-03 : f32
      %cst_173 = arith.constant 1.000000e+00 : f32
      %947 = vector.broadcast %cst_172 : f32 to vector<1x1xf32>
      %948 = arith.maximumf %947, %946 : vector<1x1xf32>
      %949 = vector.broadcast %cst_173 : f32 to vector<1x1xf32>
      %950 = arith.minimumf %949, %948 : vector<1x1xf32>
      %cst_174 = arith.constant 1.000000e+00 : f32
      %951 = vector.broadcast %cst_174 : f32 to vector<1x1xf32>
      %952 = arith.select %935, %950, %951 : vector<1x1xi1>, vector<1x1xf32>
      %953 = arith.select %934, %952, %arg17 : vector<1x1xi1>, vector<1x1xf32>
      %cst_175 = arith.constant dense<true> : vector<1x1xi1>
      %954 = arith.xori %935, %cst_175 : vector<1x1xi1>
      %955 = arith.andi %934, %954 : vector<1x1xi1>
      %956 = arith.cmpf olt, %796, %arg15 : vector<1x1xf32>
      %957 = arith.andi %955, %956 : vector<1x1xi1>
      %958 = vector.shape_cast %957 : vector<1x1xi1> to vector<1x1xi1>
      %959 = vector.broadcast %958 : vector<1x1xi1> to vector<3x3xi1>
      %960 = arith.select %959, %664, %arg10 : vector<3x3xi1>, vector<3x3xf32>
      %961 = vector.shape_cast %957 : vector<1x1xi1> to vector<1x1xi1>
      %962 = vector.broadcast %961 : vector<1x1xi1> to vector<3x1xi1>
      %963 = arith.select %962, %679, %arg11 : vector<3x1xi1>, vector<3x1xf32>
      %964 = arith.select %957, %796, %arg15 : vector<1x1xi1>, vector<1x1xf32>
      %965 = vector.shape_cast %955 : vector<1x1xi1> to vector<1x1xi1>
      %966 = vector.broadcast %965 : vector<1x1xi1> to vector<3x3xi1>
      %967 = arith.select %966, %664, %arg8 : vector<3x3xi1>, vector<3x3xf32>
      %968 = vector.shape_cast %955 : vector<1x1xi1> to vector<1x1xi1>
      %969 = vector.broadcast %968 : vector<1x1xi1> to vector<3x1xi1>
      %970 = arith.select %969, %679, %arg9 : vector<3x1xi1>, vector<3x1xf32>
      %971 = arith.select %955, %796, %arg14 : vector<1x1xi1>, vector<1x1xf32>
      %972 = vector.shape_cast %955 : vector<1x1xi1> to vector<1x1xi1>
      %973 = vector.broadcast %972 : vector<1x1xi1> to vector<6x1xi1>
      %974 = arith.select %973, %915, %arg12 : vector<6x1xi1>, vector<6x1xf32>
      %975 = vector.shape_cast %955 : vector<1x1xi1> to vector<1x1xi1>
      %976 = vector.broadcast %975 : vector<1x1xi1> to vector<6x6xi1>
      %977 = arith.select %976, %928, %arg13 : vector<6x6xi1>, vector<6x6xf32>
      %cst_176 = arith.constant dense<true> : vector<1x1xi1>
      %978 = arith.xori %467, %cst_176 : vector<1x1xi1>
      %979 = arith.andi %304, %978 : vector<1x1xi1>
      %980 = arith.andi %979, %930 : vector<1x1xi1>
      %cst_177 = arith.constant 1.000000e+00 : f32
      %981 = vector.broadcast %cst_177 : f32 to vector<1x1xf32>
      %982 = arith.select %980, %981, %arg19 : vector<1x1xi1>, vector<1x1xf32>
      %983 = arith.ori %467, %930 : vector<1x1xi1>
      %cst_178 = arith.constant 0.000000e+00 : f32
      %984 = vector.broadcast %cst_178 : f32 to vector<1x1xf32>
      %985 = arith.select %983, %984, %arg18 : vector<1x1xi1>, vector<1x1xf32>
      scf.yield %967, %970, %960, %963, %974, %977, %971, %964, %944, %953, %985, %982 : vector<3x3xf32>, vector<3x1xf32>, vector<3x3xf32>, vector<3x1xf32>, vector<6x1xf32>, vector<6x6xf32>, vector<1x1xf32>, vector<1x1xf32>, vector<1x1xf32>, vector<1x1xf32>, vector<1x1xf32>, vector<1x1xf32>
    }
    %cst_64 = arith.constant 5.000000e-01 : f32
    %293 = vector.broadcast %cst_64 : f32 to vector<1x1xf32>
    %294 = arith.cmpf ogt, %292#11, %293 : vector<1x1xf32>
    %295 = vector.shape_cast %294 : vector<1x1xi1> to vector<1x1xi1>
    %296 = vector.broadcast %295 : vector<1x1xi1> to vector<3x3xi1>
    %297 = arith.select %296, %292#0, %292#2 : vector<3x3xi1>, vector<3x3xf32>
    %298 = vector.shape_cast %294 : vector<1x1xi1> to vector<1x1xi1>
    %299 = vector.broadcast %298 : vector<1x1xi1> to vector<3x1xi1>
    %300 = arith.select %299, %292#1, %292#3 : vector<3x1xi1>, vector<3x1xf32>
    %301 = tpu.concatenate %297, %300 in 1 : vector<3x3xf32>, vector<3x1xf32> -> vector<3x4xf32>
    %c0_65 = arith.constant 0 : index
    %c0_66 = arith.constant 0 : index
    %302 = vector.load %arg6[%c0_65, %c0_66] : memref<3x4xf32, #tpu.memory_space<vmem>>, vector<3x4xf32>
    tpu.vector_store %arg6[%c0_65, %c0_66], %301 {strides = array<i32>} : memref<3x4xf32, #tpu.memory_space<vmem>>, vector<3x4xf32>,
    return
  }
}

</mosaic_0001>

<bundles_post_ra>
// kernel: tpu_custom_call.1
= control target key start
LH: loop header
LB: loop body
LE: loop exit
PB: predicated region body
PF: predicated region fallthrough
CT: control target
= control target key end

     0   :  { %11 = vsyncpa [#allocation5], 0  ;;  %s3879_s0 = inlined_call_operand.vmem [shape: f32[3,3], index: 0, kind: input, shape index: {}]   ;;  %s3880_s1 = inlined_call_operand.hbm [shape: f32[3,3], index: 1, kind: input, shape index: {}]   ;;  %s3881_s2 = inlined_call_operand.vmem [shape: f32[3,1], index: 2, kind: input, shape index: {}]   ;;  %s3882_s3 = inlined_call_operand.hbm [shape: f32[3,128], index: 3, kind: input, shape index: {}]   ;;  %s3883_s4 = inlined_call_operand.vmem [shape: f32[8,128], index: 4, kind: input, shape index: {}]   ;;  %s3884_s5 = inlined_call_operand.hbm [shape: bf16[1,24,256], index: 5, kind: input, shape index: {}]   ;;  %s3885_s6 = inlined_call_operand.hbm [shape: f32[3,4], index: 6, kind: output, shape index: {}]  }
   0x1   :  { %12 = vsyncpa [#allocation3], 0 }
   0x2   :  { %13 = vsyncpa [#allocation8], 0 }
   0x3   :  { %14 = vsyncpa [#allocation4], 0  ;;  %s21_s23 = sshll.u32 %s3879_s0, 4  ;;  %s2670_s24 = smov [#allocation7]   ;;  %s22_s23 = int_to_ptr.vmem [resolvable:$true] %s21_s23 }
   0x4   :  { %s43_s25 = sshll.u32 %s2670_s24, 4  ;;  %s44_s25 = int_to_ptr.vmem [resolvable:$true] %s43_s25 }
   0x5   :  { %s2474_s26 = scalar_lea.vmem %s44_s25, 64  ;;  %p2479_p1 = scmp.lt.s32.totalorder %s44_s25, %s44_s25 }
   0x6   :  { %p2475_p0 = scmp.ne.s32.totalorder %s44_s25, %s2474_s26  ;;  %p2480_p2 = scmp.lt.s32.totalorder %s2474_s26, %s2474_s26 }
   0x8   :  { %p2481_p3 = por %p2480_p2, %p2479_p1 }
   0xa   :  { %p2482_p4 = pnand %p2481_p3, %p2475_p0 }
   0xc   :  { %2485 = shalt.err (!%p2482_p4)
}
   0xd   :  { %46 = dma.hbm_to_vmem [thread:$0]  %s3882_s3, 64, %s44_s25, [#allocation8]  }
   0xe   :  { %s2486_s29 = scalar_lea.vmem %s22_s23, 64  ;;  %p2491_p6 = scmp.lt.s32.totalorder %s22_s23, %s22_s23 }
   0xf   :  { %p2487_p5 = scmp.ne.s32.totalorder %s22_s23, %s2486_s29  ;;  %p2492_p7 = scmp.lt.s32.totalorder %s2486_s29, %s2486_s29 }
  0x11   :  { %p2493_p8 = por %p2492_p7, %p2491_p6 }
  0x13   :  { %p2494_p9 = pnand %p2493_p8, %p2487_p5 }
  0x15   :  { %2497 = shalt.err (!%p2494_p9)
}
  0x16   :  { %s2671_s0 = smov [#allocation2]   ;;  %s2672_s30 = smov [#allocation6]  }
  0x17   :  { %24 = dma.vmem_to_smem %s22_s23, 64, %s2671_s0, [#allocation5]  }
  0x18   :  { %s31_s7 = sshll.u32 %s2672_s30, 4  ;;  %s2673_s8 = smov [#allocation9]   ;;  %s32_s7 = int_to_ptr.vmem [resolvable:$true] %s31_s7 }
  0x19   :  { %s54_s9 = sshll.u32 %s2673_s8, 4  ;;  %s2506_s10 = scalar_lea.vmem %s32_s7, 64  ;;  %s55_s9 = int_to_ptr.vmem [resolvable:$true] %s54_s9 }
  0x1a   :  { %p2507_p10 = scmp.ne.s32.totalorder %s32_s7, %s2506_s10  ;;  %p2511_p11 = scmp.lt.s32.totalorder %s32_s7, %s32_s7 }
  0x1b   :  { %p2512_p12 = scmp.lt.s32.totalorder %s2506_s10, %s2506_s10 }
  0x1d   :  { %p2513_p13 = por %p2512_p12, %p2511_p11 }
  0x1f   :  { %p2514_p0 = pnand %p2513_p13, %p2507_p10 }
  0x21   :  { %2517 = shalt.err (!%p2514_p0)
}
  0x22   :  { %34 = dma.hbm_to_vmem [thread:$0]  %s3880_s1, 64, %s32_s7, [#allocation3]  }
  0x23   :  { %s2526_s12 = scalar_lea.vmem %s55_s9, 384  ;;  %p2531_p2 = scmp.lt.s32.totalorder %s55_s9, %s55_s9 }
  0x24   :  { %p2527_p1 = scmp.ne.s32.totalorder %s55_s9, %s2526_s12  ;;  %p2532_p3 = scmp.lt.s32.totalorder %s2526_s12, %s2526_s12 }
  0x26   :  { %p2533_p4 = por %p2532_p3, %p2531_p2 }
  0x28   :  { %p2534_p5 = pnand %p2533_p4, %p2527_p1 }
  0x2a   :  { %2537 = shalt.err (!%p2534_p5)
}
  0x2b   :  { %s2674_s13 = smov 128   ;;  %s2675_s14 = smov 8  }
  0x2c   :  { %60 = dma.hbm_to_vmem [thread:$0]  %s3884_s5, 384, %s55_s9, [#allocation8], %s2674_s13, %s2674_s13, %s2675_s14  }
  0x2d   :  { %2610 = dma.done.wait [#allocation5], 64  }
  0x2e   :  { %2611 = vsyncadd [#allocation5], 4294967232 }
  0x2f   :  { %2612 = dma.done.wait [#allocation3], 64  }
  0x30   :  { %2613 = vsyncadd [#allocation3], 4294967232 }
  0x31   :  { %2614 = dma.done.wait [#allocation8], 448  }
  0x32   :  { %2615 = vsyncadd [#allocation8], 4294966848 }
  0x33   :  { %73 = sfence }
  0x34   :  { %v2753_v0 = vld [vmem:[#allocation6] sm:$0x7]   ;;  %v3886_v1 = vmov 0   ;;  %v2677_v2 = vmov 2   ;;  %v77_v4 = vlaneseq  ;;  %v2678_v5 = vmov 1   ;;  %s2797_s17 = sld [smem:[#allocation2 + $0x101]] }
  0x35   :  { %2404 = vset.pattern.permute.xlu0 %v3886_v1  ;;  %2406 = vset.pattern.permute.xlu1 %v2677_v2  ;;  %v2761_v3 = vld [vmem:[%s3881_s2] sm:$0x7]   ;;  %v3905_v8 = vmov 0.0   ;;  %v2411_v10 = vld [vmem:[#allocation9 + $0x4] ss:$8 sps:$4 sm:$0xff]   ;;  %s2795_s2 = sld [smem:[#allocation2]] }
  0x36   :  { %129 = vperm.xlu0 %2404, %v2753_v0   ;;  %148 = vperm.xlu1 %2406, %v2753_v0   ;;  %v2766_v6 = vshrl.u32 %v77_v4, 7  ;;  %v2768_v7 = vand.u32 127, %v77_v4  ;;  %v75_v14 = vld [vmem:[#allocation7] sm:$0x7]  ;;  %s2799_s18 = sld [smem:[#allocation2 + $0x102]]  ;;  %vm3887_vm15 = vcmask 1040384  }
  0x37   :  { %2202 = vmatprep.subr.mxu1 %v3905_v8  ;;  %442 = vmatprep.mubr.bf16.mxu0 %v2411_v10  ;;  %s2804_s19 = sld [smem:[#allocation2 + $0x100]] }
  0x38   :  { %3951 = vst [vmem:[#allocation15_spill] sm:$0xff] %v2766_v6  ;;  %3952 = vst [vmem:[#allocation16_spill] sm:$0xff] %v2768_v7  ;;  %vm113_vm0 = vcmp.eq.s32.totalorder %v2766_v6, %v2768_v7  ;;  %v2778_v11 = vsub.s32 0, %v2766_v6  ;;  %v2781_v12 = vsub.s32 1, %v2766_v6  ;;  %v2784_v13 = vsub.s32 2, %v2766_v6  ;;  %s2811_s21 = sld [smem:[#allocation2 + $0x1]] }
  0x39   :  { %v2775_v9 = vsel %vm113_vm0, 1.0, %v3905_v8  ;;  %s2819_s22 = sld [smem:[#allocation2 + $0x81]]  ;;  %vm3892_vm1 = vcmp.eq.s32.totalorder %v2766_v6, 4  ;;  %vm3891_vm2 = vcmp.eq.s32.totalorder %v2766_v6, 5  ;;  %vm3935_vm3 = vcmp.eq.s32.totalorder %v2766_v6, 0 }
  0x3a   :  { %2405 = vset.pattern.permute.xlu0 %v2678_v5  ;;  %2407 = vset.pattern.permute.xlu1 %v3886_v1  ;;  %3953 = vst [vmem:[#allocation17_spill] sm:$0xff] %v2775_v9  ;;  %3954 = vst [vmem:[#allocation18_spill] sm:$0xff] %v2781_v12  ;;  %v2787_v16 = vrot.slane %v75_v14, %v2778_v11  ;;  %v2790_v17 = vrot.slane %v75_v14, %v2781_v12  ;;  %v3897_v28 = vstv %s2797_s17  ;;  %s2829_s23 = sld [smem:[#allocation2 + $0x2]] }
  0x3b   :  { %138 = vperm.xlu0 %2405, %v2753_v0   ;;  %159 = vperm.xlu1 %2407, %v2761_v3   ;;  %3955 = vst [vmem:[#allocation19_spill] sm:$0xff] %v2784_v13  ;;  %v2793_v18 = vrot.slane %v75_v14, %v2784_v13  ;;  %s527_s20 = ssub.f32 0.0, %s2795_s2  ;;  %v2841_v39 = vsel %vm3892_vm1, 1.0, %v3905_v8  ;;  %v2846_v40 = vsel %vm3891_vm2, 1.0, %v3905_v8  ;;  %v2861_v44 = vsel %vm3935_vm3, 1.0, %v3905_v8 }
  0x3c   :  { %3956 = vst [vmem:[#allocation20_spill] sm:$0xff] %v2787_v16  ;;  %3957 = vst [vmem:[#allocation21_spill] sm:$0xff] %v2790_v17  ;;  %v3896_v29 = vstv %s2799_s18  ;;  %s2836_s24 = sld [smem:[#allocation2 + $0x80]]  ;;  %v2885_v54 = vstv %s2795_s2  ;;  %vm3890_vm6 = vcmp.lt.s32.totalorder %v2768_v7, 8 }
  0x3d   :  { %v3895_v30 = vstv %s2804_s19  ;;  %v2817_v32 = vstv %s527_s20  ;;  %s2848_s25 = sld [smem:[#allocation2 + $0x82]] }
  0x3e   :  { %3958 = vst [vmem:[#allocation22_spill] sm:$0xff] %v2817_v32  ;;  %v3894_v45 = vstv %s2811_s21 }
  0x3f   :  { %2408 = vset.pattern.permute.xlu0 %v3886_v1  ;;  %v2865_v46 = vstv %s2819_s22  ;;  %s533_s26 = ssub.f32 0.0, %s2819_s22 }
  0x40   :  { %v3893_v55 = vstv %s2829_s23 }
  0x42   :  { %v3889_v56 = vstv %s2836_s24 }
  0x43   :  { %v3888_v57 = vstv %s2848_s25 }
  0xb1   :  { %v130_v15 = vpop.permute.xlu0 %129  ;;  %v149_v19 = vpop.permute.xlu1 %148 }
  0xb2   :  { %v136_v21 = vmul.f32 %v2787_v16, %v130_v15  ;;  %v155_v23 = vmul.f32 %v2793_v18, %v149_v19 }
  0xb6   :  { %v139_v20 = vpop.permute.xlu0 %138  ;;  %v160_v25 = vpop.permute.xlu1 %159 }
  0xb7   :  { %v145_v22 = vmul.f32 %v2790_v17, %v139_v20 }
  0xb9   :  { %v146_v24 = vadd.f32 %v145_v22, %v136_v21 }
  0xbb   :  { %v156_v26 = vadd.f32 %v155_v23, %v146_v24 }
  0xbd   :  { %v2807_v27 = vadd.f32 %v160_v25, %v156_v26 }
  0xbf   :  { %v194_v31 = vmul.f32 %v3897_v28, %v2807_v27  ;;  %v200_v33 = vmul.f32 %v3896_v29, %v2807_v27  ;;  %v192_v34 = vmul.f32 %v3895_v30, %v2807_v27  ;;  %v2833_v36 = vmul.f32 %v2817_v32, %v2807_v27 }
  0xc0   :  { %v2852_v41 = vrot.slane %v2807_v27, %v2784_v13  ;;  %v2856_v42 = vrot.slane %v2807_v27, %v2781_v12  ;;  %v166_v51 = vmul.f32 %v3894_v45, %v2807_v27  ;;  %v180_v52 = vmul.f32 %v2865_v46, %v2807_v27  ;;  %v2409_v45 = vld [vmem:[#allocation9] ss:$8 sps:$4 sm:$0xff]  }
  0xc1   :  { %v196_v35 = vrot.slane %v194_v31, 1  ;;  %v202_v38 = vrot.slane %v200_v33, 2  ;;  %v164_v60 = vmul.f32 %v2885_v54, %v2807_v27  ;;  %v172_v61 = vmul.f32 %v3893_v55, %v2807_v27  ;;  %v392_v55 = vld [vmem:[#allocation9 + $0x10] sm:$0xff] }
  0xc2   :  { %v551_v47 = vmul.f32 %v2841_v39, %v2852_v41  ;;  %v2871_v48 = vmul.f32 %v2846_v40, %v2856_v42  ;;  %v168_v58 = vrot.slane %v166_v51, 1  ;;  %v182_v59 = vrot.slane %v180_v52, 1 }
  0xc3   :  { %v198_v37 = vadd.f32 %v196_v35, %v192_v34  ;;  %v178_v62 = vmul.f32 %v3889_v56, %v2807_v27  ;;  %v186_v63 = vmul.f32 %v3888_v57, %v2807_v27  ;;  %v174_v5 = vrot.slane %v172_v61, 2 }
  0xc4   :  { %v2875_v50 = vadd.f32 %v2861_v44, %v551_v47  ;;  %v170_v2 = vadd.f32 %v168_v58, %v164_v60  ;;  %v515_v14 = vand.u32 2147483647, %v2807_v27  ;;  %v3199_v57 = vadd.s32 136, %v2766_v6 }
  0xc5   :  { %v204_v43 = vadd.f32 %v202_v38, %v198_v37  ;;  %v184_v4 = vadd.f32 %v182_v59, %v178_v62  ;;  %v188_v10 = vrot.slane %v186_v63, 2  ;;  %v3211_v56 = vadd.s32 8, %v2766_v6 }
  0xc6   :  { %v561_v53 = vsub.f32 %v2875_v50, %v2871_v48  ;;  %v176_v15 = vadd.f32 %v174_v5, %v170_v2  ;;  %vm516_vm5 = vcmp.gt.f32.partialorder %v515_v14, 1e-12  ;;  %v2920_v5 = vadd.s32 248, %v2766_v6  ;;  %3992 = vst [vmem:[#allocation50_spill] sm:$0xff] %v3199_v57 }
  0xc7   :  { %vm205_vm4 = vcmp.gt.f32.partialorder %v204_v43, 1e-06  ;;  %v190_v19 = vadd.f32 %v188_v10, %v184_v4  ;;  %v517_v25 = vsel %vm516_vm5, 1, %v3886_v1  ;;  %v2917_v4 = vadd.s32 240, %v2766_v6  ;;  %3993 = vst [vmem:[#allocation51_spill] sm:$0xff] %v3211_v56 }
  0xc8   :  { %v206_v49 = vsel %vm205_vm4, %v204_v43, 1.0  ;;  %vm214_vm7 = vmand %vm3890_vm6, %vm205_vm4  ;;  %v518_v33 = vrot.slane %v517_v25, 2  ;;  %v522_v43 = vrot.slane %v2807_v27, 2  ;;  %3960 = vst [vmem:[#allocation24_spill] sm:$0xff] %v2920_v5  ;;  %v2923_v10 = vadd.s32 112, %v2766_v6 }
  0xc9   :  { %2414 = vrcp.f32 %v206_v49  ;;  %3959 = vst [vmem:[#allocation23_spill] sm:$0xff] %v2917_v4  ;;  %v2969_v25 = vadd.s32 96, %v2766_v6  ;;  %v3090_v48 = vadd.s32 72, %v2766_v6  ;;  %v2023_v30 = vcombine.high %v392_v55, %v392_v55 }
  0xca   :  { %vm519_vm5 = vcmp.ne.s32.totalorder %v518_v33, 0  ;;  %3961 = vst [vmem:[#allocation25_spill] sm:$0xff] %v2923_v10  ;;  %v2022_v29 = vcombine.low %v392_v55, %v392_v55 }
  0xcb   :  { %3965 = vst [vmem:[#allocation27_spill] sm:$0xff] %v2969_v25  ;;  %3978 = vst [vmem:[#allocation36_spill] sm:$0xff] %v3090_v48 }
  0xd6   :  { %v2415_v20 = vpop.eup %2414 }
  0xd7   :  { %v208_v21 = vmul.f32 %v2415_v20, %v176_v15  ;;  %v211_v22 = vmul.f32 %v2415_v20, %v190_v19  ;;  %v2929_v15 = vadd.s32 120, %v2766_v6 }
  0xd9   :  { %v2224_v23 = vcvt.f32.s32 %v208_v21  ;;  %v2227_v24 = vcvt.f32.s32 %v211_v22  ;;  %3962 = vst [vmem:[#allocation26_spill] sm:$0xff] %v2929_v15  ;;  %v2947_v21 = vadd.s32 224, %v2766_v6  ;;  %v2954_v22 = vadd.s32 232, %v2766_v6 }
  0xdb   :  { %v1985_v26 = vadd.s32 4294967295, %v2224_v23  ;;  %v1986_v31 = vadd.s32 4294967295, %v2227_v24 }
  0xdd   :  { %vm215_vm8 = vcmp.ge.s32.totalorder %v1985_v26, 0  ;;  %vm217_vm9 = vcmp.ge.s32.totalorder %v1986_v31, 0  ;;  %v223_v34 = vcvt.s32.f32 %v1986_v31  ;;  %v226_v35 = vcvt.s32.f32 %v1985_v26 }
  0xde   :  { %vm216_vm10 = vmand %vm214_vm7, %vm215_vm8  ;;  %vm219_vm12 = vcmp.lt.s32.totalorder %v1985_v26, 16  ;;  %vm221_vm14 = vcmp.lt.s32.totalorder %v1986_v31, 16  ;;  %vm565_vm7 = vcmp.eq.s32.totalorder %v2766_v6, 3  ;;  %vm576_vm8 = vcmp.eq.s32.totalorder %v2766_v6, 2 }
  0xdf   :  { %vm218_vm11 = vmand %vm216_vm10, %vm217_vm9  ;;  %v224_v37 = vfloor.f32 %v223_v34  ;;  %v227_v38 = vfloor.f32 %v226_v35  ;;  %v2934_v19 = vsel %vm565_vm7, 1.0, %v3905_v8  ;;  %v2966_v24 = vsel %vm576_vm8, 1.0, %v3905_v8 }
  0xe0   :  { %vm220_vm13 = vmand %vm218_vm11, %vm219_vm12  ;;  %v579_v23 = vmul.f32 %v2934_v19, %v2856_v42  ;;  %v2971_v26 = vstv %s533_s26  ;;  %v573_v42 = vrot.slane %v2807_v27, %v2778_v11  ;;  %v2680_v31 = vmov 1.0|1.0  }
  0xe1   :  { %vm222_vm0 = vmand %vm220_vm13, %vm221_vm14  ;;  %v2228_v47 = vtrunc.f32 %v224_v37  ;;  %v2230_v49 = vtrunc.f32 %v227_v38  ;;  %v2985_v34 = vadd.s32 104, %v2766_v6  ;;  %v568_v35 = vmul.f32 %v2934_v19, %v2852_v41 }
  0xe2   :  { %v2909_v51 = vsel %vm222_vm0, 1.0, %v3905_v8  ;;  %vm520_vm4 = vmand %vm222_vm0, %vm519_vm5  ;;  %v231_v60 = vsel %vm222_vm0, 1, %v3886_v1  ;;  %vm3936_vm5 = vcmp.eq.s32.totalorder %v2766_v6, 1  ;;  %v2994_v38 = vadd.s32 208, %v2766_v6 }
  0xe3   :  { %v234_v52 = vsel %vm3887_vm15, %v2909_v51, 0.0  ;;  %v524_v58 = vsel %vm520_vm4, %v522_v43, 1.0  ;;  %v2229_v59 = vcvt.f32.s32 %v2228_v47  ;;  %v2231_v61 = vcvt.f32.s32 %v2230_v49  ;;  %3968 = vst [vmem:[#allocation28_spill] sm:$0xff] %v2985_v34 }
  0xe4   :  { %2416 = vrcp.f32 %v524_v58  ;;  %235 = vadd.xlane.f32.xlu1 %v234_v52  ;;  %v276_v2 = vrot.slane %v231_v60, %v2778_v11  ;;  %3969 = vst [vmem:[#allocation29_spill] sm:$0xff] %v2994_v38  ;;  %v2999_v43 = vsel %vm3936_vm5, 1.0, %v3905_v8  ;;  %v580_v47 = vadd.f32 %v2966_v24, %v579_v23 }
  0xe5   :  { %v229_v62 = vmul.u32 16, %v2229_v59  ;;  %v535_v52 = vmul.f32 %v2971_v26, %v2807_v27  ;;  %v3024_v27 = vadd.s32 80, %v2766_v6  ;;  %v581_v60 = vmul.f32 %v2841_v39, %v573_v42 }
  0xe6   :  { %vm2938_vm9 = vcmp.eq.s32.totalorder %v276_v2, 1  ;;  %v3038_v2 = vadd.s32 88, %v2766_v6  ;;  %v574_v23 = vmul.f32 %v2846_v40, %v573_v42 }
  0xe7   :  { %v230_v63 = vadd.s32 %v2231_v61, %v229_v62  ;;  %3973 = vst [vmem:[#allocation31_spill] sm:$0xff] %v3024_v27  ;;  %v582_v33 = vsub.f32 %v580_v47, %v581_v60 }
  0xe8   :  { %3974 = vst [vmem:[#allocation32_spill] sm:$0xff] %v3038_v2 }
  0xe9   :  { %v2926_v14 = vrot.slane %v230_v63, %v2778_v11  ;;  %v569_v63 = vsub.f32 %v2999_v43, %v568_v35 }
  0xeb   :  { %vm271_vm10 = vcmp.eq.s32.totalorder %v2917_v4, %v2926_v14  ;;  %vm272_vm11 = vcmp.eq.s32.totalorder %v2920_v5, %v2926_v14  ;;  %vm255_vm13 = vcmp.eq.s32.totalorder %v2923_v10, %v2926_v14  ;;  %vm256_vm0 = vcmp.eq.s32.totalorder %v2929_v15, %v2926_v14 }
  0xec   :  { %vm308_vm12 = vmand %vm271_vm10, %vm2938_vm9  ;;  %v575_v47 = vadd.f32 %v574_v23, %v569_v63  ;;  %v3108_v23 = vadd.s32 184, %v2766_v6 }
  0xed   :  { %vm309_vm14 = vmand %vm272_vm11, %vm2938_vm9  ;;  %vm269_vm11 = vcmp.eq.s32.totalorder %v2947_v21, %v2926_v14 }
  0xee   :  { %vm2040_vm4 = vmpackc.low %vm309_vm14, %vm308_vm12  ;;  %vm270_vm14 = vcmp.eq.s32.totalorder %v2954_v22, %v2926_v14  ;;  %3980 = vst [vmem:[#allocation38_spill] sm:$0xff] %v3108_v23 }
  0xef   :  { %2138 = vmatprep.subr.msk.bf16.mxu0 %vm2040_vm4, %v2680_v31  ;;  %vm2978_vm10 = vmand %vm255_vm13, %vm2938_vm9  ;;  %vm253_vm4 = vcmp.eq.s32.totalorder %v2969_v25, %v2926_v14 }
  0xf0   :  { %vm293_vm12 = vmand %vm256_vm0, %vm2938_vm9 }
  0xf1   :  { %v2417_v37 = vpop.eup %2416  ;;  %vm2024_vm13 = vmpackc.low %vm293_vm12, %vm2978_vm10 }
  0xf2   :  { %v530_v41 = vmul.f32 %v2417_v37, %v2833_v36  ;;  %v532_v49 = vmul.f32 %v2417_v37, %v2865_v46  ;;  %v537_v58 = vrot.slane %v2417_v37, 7  ;;  %2139 = vmatpush3.bf16.msk.msra.mxu0 %vm2024_vm13, %v2680_v31  ;;  %vm3014_vm0 = vmand %vm269_vm11, %vm2938_vm9  ;;  %v3021_v36 = vadd.s32 216, %v2766_v6 }
  0xf3   :  { %vm307_vm10 = vmand %vm270_vm14, %vm2938_vm9  ;;  %vm254_vm11 = vcmp.eq.s32.totalorder %v2985_v34, %v2926_v14  ;;  %v526_v1 = vmul.f32 %v2417_v37, %v2885_v54  ;;  %vm267_vm13 = vcmp.eq.s32.totalorder %v2994_v38, %v2926_v14 }
  0xf4   :  { %3972 = vst [vmem:[#allocation30_spill] sm:$0xff] %v3021_v36  ;;  %v531_v61 = vmul.f32 %v2417_v37, %v530_v41  ;;  %v539_v62 = vmul.f32 %v537_v58, %v535_v52  ;;  %vm2042_vm12 = vmpackc.low %vm307_vm10, %vm3014_vm0  ;;  %v597_v52 = vrot.slane %v532_v49, %v2778_v11  ;;  %vm268_vm10 = vcmp.eq.s32.totalorder %v3021_v36, %v2926_v14 }
  0xf5   :  { %2140 = vmatprep.subr.msk.bf16.mxu0 %vm2042_vm12, %v2680_v31  ;;  %vm290_vm14 = vmand %vm253_vm4, %vm2938_vm9  ;;  %v586_v42 = vrot.slane %v526_v1, %v2778_v11  ;;  %v3061_v37 = vadd.s32 192, %v2766_v6  ;;  %v3070_v49 = vadd.s32 200, %v2766_v6 }
  0xf6   :  { %v540_v35 = vmul.f32 %v539_v62, %v537_v58  ;;  %v591_v41 = vrot.slane %v531_v61, %v2778_v11  ;;  %vm291_vm0 = vmand %vm254_vm11, %vm2938_vm9  ;;  %vm251_vm11 = vcmp.eq.s32.totalorder %v3024_v27, %v2926_v14  ;;  %v598_v60 = vmul.f32 %v597_v52, %v575_v47 }
  0xf7   :  { %vm2026_vm4 = vmpackc.low %vm291_vm0, %vm290_vm14  ;;  %3975 = vst [vmem:[#allocation33_spill] sm:$0xff] %v3061_v37  ;;  %v587_v1 = vmul.f32 %v586_v42, %v561_v53  ;;  %vm252_vm0 = vcmp.eq.s32.totalorder %v3038_v2, %v2926_v14  ;;  %v3080_v62 = vadd.s32 64, %v2766_v6  ;;  %vm265_vm15 = vcmp.eq.s32.totalorder %v3061_v37, %v2926_v14 }
  0xf8   :  { %v592_v58 = vmul.f32 %v591_v41, %v582_v33  ;;  %v602_v59 = vrot.slane %v540_v35, %v2781_v12  ;;  %2141 = vmatpush3.bf16.msk.msra.mxu0 %vm2026_vm4, %v2680_v31  ;;  %vm304_vm12 = vmand %vm267_vm13, %vm2938_vm9  ;;  %3976 = vst [vmem:[#allocation34_spill] sm:$0xff] %v3070_v49  ;;  %v3099_v53 = vadd.s32 176, %v2766_v6  ;;  %v3124_v35 = vadd.s32 56, %v2766_v6 }
  0xf9   :  { %vm305_vm14 = vmand %vm268_vm10, %vm2938_vm9  ;;  %3977 = vst [vmem:[#allocation35_spill] sm:$0xff] %v3080_v62  ;;  %v3131_v41 = vadd.s32 160, %v2766_v6  ;;  %v3139_v52 = vadd.s32 168, %v2766_v6  ;;  %v3146_v42 = vadd.s32 32, %v2766_v6  ;;  %v3154_v47 = vadd.s32 40, %v2766_v6 }
  0xfa   :  { %v603_v61 = vmul.f32 %v602_v59, %v582_v33  ;;  %vm2044_vm4 = vmpackc.low %vm305_vm14, %vm304_vm12  ;;  %v3082_v63 = vadd.f32 %v592_v58, %v587_v1  ;;  %vm266_vm12 = vcmp.eq.s32.totalorder %v3070_v49, %v2926_v14  ;;  %3979 = vst [vmem:[#allocation37_spill] sm:$0xff] %v3099_v53  ;;  %v3116_v33 = vadd.s32 48, %v2766_v6 }
  0xfb   :  { %2142 = vmatprep.subr.msk.bf16.mxu0 %vm2044_vm4, %v2680_v31  ;;  %vm288_vm13 = vmand %vm251_vm11, %vm2938_vm9  ;;  %vm249_vm4 = vcmp.eq.s32.totalorder %v3080_v62, %v2926_v14  ;;  %3982 = vst [vmem:[#allocation40_spill] sm:$0xff] %v3124_v35  ;;  %v3161_v58 = vadd.s32 144, %v2766_v6  ;;  %v3169_v59 = vadd.s32 152, %v2766_v6  ;;  %v3176_v1 = vadd.s32 16, %v2766_v6 }
  0xfc   :  { %v3092_v50 = vadd.f32 %v603_v61, %v598_v60  ;;  %vm289_vm10 = vmand %vm252_vm0, %vm2938_vm9  ;;  %3981 = vst [vmem:[#allocation39_spill] sm:$0xff] %v3116_v33  ;;  %v3184_v60 = vadd.s32 24, %v2766_v6  ;;  %v3191_v61 = vadd.s32 128, %v2766_v6 }
  0xfd   :  { %vm2028_vm14 = vmpackc.low %vm289_vm10, %vm288_vm13  ;;  %vm250_vm13 = vcmp.eq.s32.totalorder %v3090_v48, %v2926_v14  ;;  %3983 = vst [vmem:[#allocation41_spill] sm:$0xff] %v3131_v41 }
  0xfe   :  { %2203 = vmatpush3.xpose.msra.mxu1 %v3092_v50  ;;  %2143 = vmatpush3.bf16.msk.msra.mxu0 %vm2028_vm14, %v2680_v31  ;;  %vm302_vm11 = vmand %vm265_vm15, %vm2938_vm9  ;;  %vm263_vm14 = vcmp.eq.s32.totalorder %v3099_v53, %v2926_v14  ;;  %3984 = vst [vmem:[#allocation42_spill] sm:$0xff] %v3139_v52 }
  0xff   :  { %2207 = vmatprep.subr.mxu1 %v3905_v8  ;;  %vm303_vm0 = vmand %vm266_vm12, %vm2938_vm9  ;;  %3985 = vst [vmem:[#allocation43_spill] sm:$0xff] %v3146_v42 }
 0x100   :  { %vm2046_vm10 = vmpackc.low %vm303_vm0, %vm302_vm11  ;;  %vm264_vm11 = vcmp.eq.s32.totalorder %v3108_v23, %v2926_v14  ;;  %3986 = vst [vmem:[#allocation44_spill] sm:$0xff] %v3154_v47 }
 0x101   :  { %2144 = vmatprep.subr.msk.bf16.mxu0 %vm2046_vm10, %v2680_v31  ;;  %vm286_vm15 = vmand %vm249_vm4, %vm2938_vm9  ;;  %vm247_vm10 = vcmp.eq.s32.totalorder %v3116_v33, %v2926_v14  ;;  %3987 = vst [vmem:[#allocation45_spill] sm:$0xff] %v3161_v58 }
 0x102   :  { %vm287_vm12 = vmand %vm250_vm13, %vm2938_vm9  ;;  %3988 = vst [vmem:[#allocation46_spill] sm:$0xff] %v3169_v59 }
 0x103   :  { %vm2030_vm0 = vmpackc.low %vm287_vm12, %vm286_vm15  ;;  %vm248_vm15 = vcmp.eq.s32.totalorder %v3124_v35, %v2926_v14  ;;  %3989 = vst [vmem:[#allocation47_spill] sm:$0xff] %v3176_v1 }
 0x104   :  { %2145 = vmatpush3.bf16.msk.msra.mxu0 %vm2030_vm0, %v2680_v31  ;;  %vm300_vm4 = vmand %vm263_vm14, %vm2938_vm9  ;;  %vm261_vm0 = vcmp.eq.s32.totalorder %v3131_v41, %v2926_v14  ;;  %3990 = vst [vmem:[#allocation48_spill] sm:$0xff] %v3184_v60 }
 0x105   :  { %vm301_vm13 = vmand %vm264_vm11, %vm2938_vm9  ;;  %3991 = vst [vmem:[#allocation49_spill] sm:$0xff] %v3191_v61 }
 0x106   :  { %vm2048_vm12 = vmpackc.low %vm301_vm13, %vm300_vm4  ;;  %vm262_vm4 = vcmp.eq.s32.totalorder %v3139_v52, %v2926_v14 }
 0x107   :  { %2146 = vmatprep.subr.msk.bf16.mxu0 %vm2048_vm12, %v2680_v31  ;;  %vm284_vm14 = vmand %vm247_vm10, %vm2938_vm9  ;;  %vm245_vm12 = vcmp.eq.s32.totalorder %v3146_v42, %v2926_v14 }
 0x108   :  { %vm285_vm11 = vmand %vm248_vm15, %vm2938_vm9 }
 0x109   :  { %vm2032_vm13 = vmpackc.low %vm285_vm11, %vm284_vm14  ;;  %vm246_vm14 = vcmp.eq.s32.totalorder %v3154_v47, %v2926_v14 }
 0x10a   :  { %2147 = vmatpush3.bf16.msk.msra.mxu0 %vm2032_vm13, %v2680_v31  ;;  %vm298_vm10 = vmand %vm261_vm0, %vm2938_vm9  ;;  %vm259_vm13 = vcmp.eq.s32.totalorder %v3161_v58, %v2926_v14 }
 0x10b   :  { %vm299_vm15 = vmand %vm262_vm4, %vm2938_vm9 }
 0x10c   :  { %vm2050_vm11 = vmpackc.low %vm299_vm15, %vm298_vm10  ;;  %vm260_vm10 = vcmp.eq.s32.totalorder %v3169_v59, %v2926_v14 }
 0x10d   :  { %2148 = vmatprep.subr.msk.bf16.mxu0 %vm2050_vm11, %v2680_v31  ;;  %vm282_vm0 = vmand %vm245_vm12, %vm2938_vm9  ;;  %vm243_vm11 = vcmp.eq.s32.totalorder %v3176_v1, %v2926_v14 }
 0x10e   :  { %vm283_vm4 = vmand %vm246_vm14, %vm2938_vm9 }
 0x10f   :  { %vm2034_vm15 = vmpackc.low %vm283_vm4, %vm282_vm0  ;;  %vm244_vm0 = vcmp.eq.s32.totalorder %v3184_v60, %v2926_v14 }
 0x110   :  { %2149 = vmatpush3.bf16.msk.msra.mxu0 %vm2034_vm15, %v2680_v31  ;;  %vm296_vm12 = vmand %vm259_vm13, %vm2938_vm9  ;;  %vm257_vm13 = vcmp.eq.s32.totalorder %v3191_v61, %v2926_v14 }
 0x111   :  { %vm297_vm14 = vmand %vm260_vm10, %vm2938_vm9  ;;  %vm258_vm10 = vcmp.eq.s32.totalorder %v3199_v57, %v2926_v14  ;;  %v462_v57 = vrot.slane %v2909_v51, %v2778_v11 }
 0x112   :  { %vm2052_vm4 = vmpackc.low %vm297_vm14, %vm296_vm12 }
 0x113   :  { %2150 = vmatprep.subr.msk.bf16.mxu0 %vm2052_vm4, %v2680_v31  ;;  %vm280_vm15 = vmand %vm243_vm11, %vm2938_vm9  ;;  %vm241_vm11 = vcmp.eq.s32.totalorder %v2766_v6, %v2926_v14  ;;  %vm242_vm4 = vcmp.eq.s32.totalorder %v3211_v56, %v2926_v14 }
 0x114   :  { %vm281_vm6 = vmand %vm244_vm0, %vm2938_vm9 }
 0x115   :  { %vm2036_vm2 = vmpackc.low %vm281_vm6, %vm280_vm15  ;;  %vm2681_vm15 = vmmov 1  }
 0x116   :  { %2151 = vmatpush3.bf16.msk.msra.mxu0 %vm2036_vm2, %v2680_v31  ;;  %vm294_vm12 = vmand %vm257_vm13, %vm2938_vm9 }
 0x117   :  { %vm295_vm14 = vmand %vm258_vm10, %vm2938_vm9  ;;  %vm608_vm10 = vcmask 1045504  }
 0x118   :  { %vm2054_vm1 = vmpackc.low %vm295_vm14, %vm294_vm12 }
 0x119   :  { %2152 = vmatprep.subr.msk.bf16.mxu0 %vm2054_vm1, %v2680_v31  ;;  %vm278_vm6 = vmand %vm241_vm11, %vm2938_vm9 }
 0x11a   :  { %vm279_vm2 = vmand %vm242_vm4, %vm2938_vm9  ;;  %vm2682_vm9 = vmmov 0  }
 0x11b   :  { %vm2038_vm0 = vmpackc.low %vm279_vm2, %vm278_vm6  ;;  %2204 = vmatprep.mubr.msk.f32.mxu1 %vm2682_vm9, %v3905_v8 }
 0x11c   :  { %2153 = vmatpush3.bf16.msk.msra.mxu0 %vm2038_vm0, %v2680_v31 }
 0x11f   :  { %443 = vmatmul.mubr.bf16.vlgmr.msra.gmra.mxu0 %v2409_v45 }
 0x120   :  { %450 = vmatprep.mubr.bf16.mxu0 %v2023_v30 }
 0x127   :  { %451 = vmatmul.mubr.bf16.gmra.mxu0 %v2022_v29  ;;  %v3246_v29 = vld [vmem:[%s3883_s4] sm:$0xff]  ;;  %s3298_s4 = smov 0  }
 0x128   :  { %3994 = vst [vmem:[#allocation52_spill] sm:$0xff] %v3246_v29 }
 0x16d   :  { %v3232_v14 = vpop.xlane.xlu1 %235 }
 0x16e   :  { %vm770_vm1 = vcmp.lt.f32.partialorder %v3232_v14, 0.5 }
 0x16f   :  { %vm771_vm13 = vmxor %vm770_vm1, %vm2681_vm15  ;;  %v3236_v28 = vsel %vm770_vm1, 1.0, %v3905_v8  }
 0x170   :  { %v3239_v20 = vsel %vm771_vm13, 1.0, %v3905_v8  }
 0x1df   :  { %v2154_v45 = vpop.f32.mrf.mxu0 }
 0x1e1   :  { %v2155_v30 = vpop.f32.mrf.mxu0 }
 0x1e2   :  { %v2156_v55 = vadd.f32 %v2155_v30, %v2154_v45 }
 0x1e3   :  { %v2157_v31 = vpop.f32.mrf.mxu0 }
 0x1e4   :  { %v458_v56 = vsub.f32 %v2156_v55, %v3246_v29 }
 0x1e5   :  { %v2158_v61 = vpop.f32.mrf.mxu0 }
 0x1e6   :  { %v463_v60 = vmul.f32 %v462_v57, %v458_v56  ;;  %v2159_v1 = vadd.f32 %v2158_v61, %v2157_v31 }
 0x1e7   :  { %v2160_v59 = vpop.f32.mrf.mxu0 }
 0x1e8   :  { %v477_v58 = vmul.f32 %v2159_v1, %v463_v60  ;;  %v491_v8 = vmul.f32 %v2159_v1, %v2159_v1  ;;  %v464_v47 = vmul.f32 %v463_v60, %v463_v60 }
 0x1e9   :  { %v2161_v42 = vpop.f32.mrf.mxu0 }
 0x1ea   :  { %v478_v52 = vrot.slane %v477_v58, 4  ;;  %v492_v41 = vrot.slane %v491_v8, 4  ;;  %v2162_v35 = vadd.f32 %v2161_v42, %v2160_v59  ;;  %v465_v33 = vrot.slane %v464_v47, 4 }
 0x1eb   :  { %v2163_v23 = vpop.f32.mrf.mxu0 }
 0x1ec   :  { %v479_v45 = vadd.f32 %v478_v52, %v477_v58  ;;  %v493_v30 = vadd.f32 %v492_v41, %v491_v8  ;;  %v484_v53 = vmul.f32 %v2162_v35, %v463_v60  ;;  %v499_v55 = vmul.f32 %v2162_v35, %v2159_v1 }
 0x1ed   :  { %v507_v29 = vmul.f32 %v2162_v35, %v2162_v35  ;;  %v2164_v48 = vpop.f32.mrf.mxu0  ;;  %v466_v62 = vadd.f32 %v465_v33, %v464_v47 }
 0x1ee   :  { %v480_v49 = vrot.slane %v479_v45, 2  ;;  %v494_v56 = vrot.slane %v493_v30, 2  ;;  %v485_v57 = vrot.slane %v484_v53, 4  ;;  %v500_v61 = vrot.slane %v499_v55, 4 }
 0x1ef   :  { %v508_v31 = vrot.slane %v507_v29, 4  ;;  %v467_v37 = vrot.slane %v466_v62, 2 }
 0x1f0   :  { %v495_v2 = vadd.f32 %v494_v56, %v493_v30  ;;  %v486_v27 = vadd.f32 %v485_v57, %v484_v53  ;;  %v501_v36 = vadd.f32 %v500_v61, %v499_v55  ;;  %v481_v38 = vadd.f32 %v480_v49, %v479_v45 }
 0x1f1   :  { %v509_v42 = vadd.f32 %v508_v31, %v507_v29  ;;  %v468_v59 = vadd.f32 %v467_v37, %v466_v62 }
 0x1f2   :  { %v487_v23 = vrot.slane %v486_v27, 2  ;;  %v502_v52 = vrot.slane %v501_v36, 2  ;;  %v482_v8 = vrot.slane %v481_v38, 1  ;;  %v496_v41 = vrot.slane %v495_v2, 1 }
 0x1f3   :  { %v510_v58 = vrot.slane %v509_v42, 2  ;;  %v469_v35 = vrot.slane %v468_v59, 1 }
 0x1f4   :  { %v503_v48 = vadd.f32 %v502_v52, %v501_v36  ;;  %v488_v33 = vadd.f32 %v487_v23, %v486_v27  ;;  %v483_v34 = vadd.f32 %v482_v8, %v481_v38  ;;  %v497_v25 = vadd.f32 %v496_v41, %v495_v2 }
 0x1f5   :  { %v511_v47 = vadd.f32 %v510_v58, %v509_v42  ;;  %v470_v1 = vadd.f32 %v469_v35, %v468_v59  ;;  %v3995_v42 = vmov 0.0   ;;  %v474_v23 = vmax.f32 %v3232_v14, 1.0 }
 0x1f6   :  { %v504_v60 = vrot.slane %v503_v48, 1  ;;  %v489_v32 = vrot.slane %v488_v33, 1  ;;  %v605_v37 = vmul.f32 %v3082_v63, %v483_v34  ;;  %v498_v36 = vmul.f32 %v2909_v51, %v497_v25 }
 0x1f7   :  { %v512_v30 = vrot.slane %v511_v47, 1  ;;  %v471_v53 = vmul.f32 0.5, %v470_v1  ;;  %2418 = vrcp.f32 %v474_v23  ;;  %v3276_v1 = vmov 0.01  }
 0x1f8   :  { %v505_v55 = vadd.f32 %v504_v60, %v503_v48  ;;  %v490_v49 = vadd.f32 %v489_v32, %v488_v33  ;;  %v615_v61 = vrot.slane %v498_v36, %v2778_v11  ;;  %v3997_v60 = vmov %v2761_v3 }
 0x1f9   :  { %v513_v29 = vadd.f32 %v512_v30, %v511_v47  ;;  %472 = vadd.xlane.f32.xlu0 %v471_v53  ;;  %v3998_v30 = vmov %v2753_v0 }
 0x1fa   :  { %v606_v62 = vmul.f32 %v3092_v50, %v490_v49  ;;  %v506_v45 = vmul.f32 %v2909_v51, %v505_v55 }
 0x1fb   :  { %v514_v27 = vmul.f32 %v2909_v51, %v513_v29  ;;  %v616_v51 = vmul.f32 %v615_v61, %v3082_v63 }
 0x1fc   :  { %v607_v38 = vadd.f32 %v606_v62, %v605_v37  ;;  %v620_v2 = vrot.slane %v506_v45, %v2778_v11 }
 0x1fd   :  { %v627_v56 = vrot.slane %v514_v27, %v2778_v11 }
 0x1fe   :  { %v609_v32 = vsel %vm608_vm10, %v607_v38, 0.0  ;;  %v623_v57 = vmul.f32 %v620_v2, %v3082_v63  ;;  %v621_v25 = vmul.f32 %v620_v2, %v3092_v50 }
 0x1ff   :  { %610 = vadd.xlane.f32.xlu0 %v609_v32  ;;  %v628_v34 = vmul.f32 %v627_v56, %v3092_v50 }
 0x200   :  { %v622_v59 = vadd.f32 %v621_v25, %v616_v51 }
 0x201   :  { %v629_v31 = vadd.f32 %v628_v34, %v623_v57 }
 0x203   :  { %2205 = vmatmul.mubr.f32.vlgmr.msra.gmra.mxu1 %v629_v31 }
 0x204   :  { %2208 = vmatpush3.xpose.msra.mxu1 %v3082_v63  ;;  %2209 = vmatprep.mubr.msk.f32.mxu1 %vm2682_vm9, %v3995_v42  ;;  %v2419_v52 = vpop.eup %2418  ;;  %v3274_v63 = vmov 1.0  }
 0x207   :  { %2210 = vmatmul.mubr.f32.vlgmr.msra.gmra.mxu1 %v622_v59 }
 0x282   :  { %v473_v8 = vpop.xlane.xlu0 %472 }
 0x283   :  { %v476_v41 = vmul.f32 %v2419_v52, %v473_v8  }
 0x285   :  { %v3996_v14 = vmov %v476_v41 }
 0x288   :  { %v611_v58 = vpop.xlane.xlu0 %610  }
 0x2c3   :  { %v696_v35 = vpop.f32.mrf.mxu1 }
 0x2c5   :  { %v2206_v48 = vpop.f32.mrf.mxu1 }
 0x2c7   :  { %v766_v50 = vpop.f32.mrf.mxu1 }
 0x2c8   :  { %v767_v33 = vadd.f32 %v766_v50, %v696_v35  }
 0x2c9   :  { %v2211_v47 = vpop.f32.mrf.mxu1 }
 0x2ca LB: > { %v3999_v13 = vld [vmem:[#allocation19_spill] sm:$0xff]  ;;  %v4000_v12 = vld [vmem:[#allocation18_spill] sm:$0xff]  ;;  %v4001_v7 = vld [vmem:[#allocation16_spill] sm:$0xff]  ;;  %4004 = vst [vmem:[#allocation53_spill] sm:$0xff] %v2644_v33  ;;  %v3929_v53 = vmov 0   ;;  %v3926_v27 = vmov 1   ;;  %v2636_v14 = vphi %v3996_v14, %v1879_v14   ;;  %v2632_v1 = vphi %v3276_v1, %v1858_v1   ;;  %v2628_v63 = vphi %v3274_v63, %v1863_v63   ;;  %v2624_v20 = vphi %v3239_v20, %v4081_v20   ;;  %v2620_v28 = vphi %v3236_v28, %v4080_v28   ;;  %s2668_s4 = sphi %s3298_s4, %s781_s4   ;;  %v2664_v0 = vphi %v2753_v0, %v4085_v0   ;;  %v2660_v3 = vphi %v2761_v3, %v4084_v3   ;;  %v2656_v30 = vphi %v3998_v30, %v4083_v30   ;;  %v2652_v60 = vphi %v3997_v60, %v4082_v60   ;;  %v2648_v58 = vphi %v611_v58, %v1892_v58   ;;  %v2644_v33 = vphi %v767_v33, %v1893_v33   ;;  %v2640_v41 = vphi %v476_v41, %v1891_v41  }
 0x2cb   : > { %v4002_v6 = vld [vmem:[#allocation15_spill] sm:$0xff]  ;;  %v4003_v9 = vld [vmem:[#allocation17_spill] sm:$0xff]  ;;  %4005 = vst [vmem:[#allocation54_spill] sm:$0xff] %v2652_v60  ;;  %4006 = vst [vmem:[#allocation55_spill] sm:$0xff] %v2656_v30  ;;  %2420 = vset.pattern.permute.xlu0 %v3929_v53  ;;  %2421 = vset.pattern.permute.xlu1 %v3926_v27  ;;  %s2685_s0 = smov 127   ;;  %v3931_v25 = vmov 2  }
 0x2cc   : > { %2232 = vpush %v2632_v1  ;;  %v795_v55 = vmul.f32 %v2644_v33, %v4003_v9  ;;  %v796_v49 = vmul.f32 1e-09, %v4003_v9  ;;  %vm4007_vm3 = vcmp.eq.s32.totalorder %v4002_v6, 0  ;;  %s2687_s30 = smov 1   ;;  %vm4008_vm5 = vcmp.eq.s32.totalorder %v4002_v6, 1  ;;  %s2688_s7 = smov 126  }
 0x2cd   : > { %s2690_s8 = smov 2   ;;  %s2691_s9 = smov 125   ;;  %vm4009_vm12 = vcmp.eq.s32.totalorder %v4002_v6, 4  ;;  %vm4011_vm14 = vcmp.eq.s32.totalorder %v4002_v6, 5  ;;  %vm1023_vm4 = vcmask 5120   ;;  %vm1075_vm0 = vcmask 2048  }
 0x2ce   : > { %v797_v29 = vadd.f32 %v796_v49, %v795_v55  ;;  %s2693_s10 = smov 3   ;;  %s2694_s3 = smov 124   ;;  %vm4010_vm11 = vmmov %vm4009_vm12  ;;  %v4015_v17 = vld [vmem:[#allocation21_spill] sm:$0xff]  ;;  %v4016_v16 = vld [vmem:[#allocation20_spill] sm:$0xff] }
 0x2cf   : > { %s2695_s11 = smov 4   ;;  %s2696_s12 = smov 123   ;;  %v4029_v4 = vld [vmem:[#allocation23_spill] sm:$0xff]  ;;  %v4030_v5 = vld [vmem:[#allocation24_spill] sm:$0xff]  ;;  %v4031_v10 = vld [vmem:[#allocation25_spill] sm:$0xff] }
 0x2d0   : > { %s2697_s13 = smov 5   ;;  %v4032_v15 = vld [vmem:[#allocation26_spill] sm:$0xff]  ;;  %s781_s4 = sadd.s32 1, %s2668_s4  }
 0x2d1   : > { %p3836_p6 = scmp.ge.s32.totalorder %s781_s4, 4  }
 0x2d2   :  { %s2704_s20 = smov (%p3836_p6), 3   ;;  %s2705_s26 = smov (%p3836_p6), [#allocation10]  }
 0x2d3   :  { %s1924_s27 = sshll.u32 (%p3836_p6), %s2705_s26, 4  ;;  %s1925_s27 = int_to_ptr.vmem [resolvable:$true] %s1924_s27 }
 0x2d4   :  { %p2543_p8 = scmp.lt.s32.totalorder (%p3836_p6), %s1925_s27, %s1925_s27 }
 0x2fd   : > { %s2233_s29 = spop %2232 }
 0x2fe   : > { %v800_v37 = vstv %s2233_s29 }
 0x2ff   : > { %v802_v62 = vmul.f32 %v800_v37, %v797_v29 }
 0x301   : > { %v803_v45 = vadd.f32 %v2644_v33, %v802_v62 }
 0x303   : > { %2444 = vrcp.f32 %v803_v45 }
 0x310   : > { %v2445_v36 = vpop.eup %2444 }
 0x311   : > { %808 = vperm.xlu0 %2420, %v2445_v36   ;;  %v812_v51 = vmul.f32 %v2648_v58, %v2445_v36 }
 0x313   : > { %v827_v42 = vrot.slane %v812_v51, %v2778_v11 }
 0x315   : > { %815 = vperm.xlu0 %2420, %v803_v45   ;;  %v828_v59 = vmul.f32 %v827_v42, %v803_v45 }
 0x317   : > { %v829_v23 = vsub.f32 %v2648_v58, %v828_v59 }
 0x319   : > { %2422 = vset.pattern.permute.xlu0 %v3926_v27  ;;  %v832_v8 = vsel %vm4007_vm3, %v827_v42, %v829_v23 }
 0x38c   : > { %v809_v38 = vpop.permute.xlu0 %808 }
 0x38d   : > { %v811_v2 = vmul.f32 %v809_v38, %v803_v45 }
 0x38f   : > { %v821_v56 = vrot.slane %v811_v2, %v2778_v11  ;;  %v2689_v2 = vmov 3  }
 0x390   : > { %v816_v32 = vpop.permute.xlu0 %815 }
 0x391   : > { %v822_v57 = vmul.f32 %v821_v56, %v816_v32 }
 0x393   : > { %v823_v34 = vsub.f32 %v803_v45, %v822_v57 }
 0x395   : > { %v831_v61 = vsel %vm4007_vm3, %v821_v56, %v823_v34 }
 0x396   : > { %2446 = vrcp.f32 %v831_v61  ;;  %847 = vperm.xlu0 %2422, %v831_v61  }
 0x39a   : > { %2424 = vset.pattern.permute.xlu0 %v3931_v25 }
 0x3a3   : > { %v2447_v31 = vpop.eup %2446 }
 0x3a4   : > { %841 = vrot.lane.b32.xlu1 %v2447_v31, %s2685_s0 }
 0x3a8   : > { %837 = vperm.xlu1 %2421, %v2447_v31  }
 0x3ac   : > { %2423 = vset.pattern.permute.xlu1 %v3931_v25 }
 0x411   : > { %v848_v49 = vpop.permute.xlu0 %847 }
 0x416   : > { %v842_v52 = vpop.permute.xlu1 %841 }
 0x417   : > { %v844_v35 = vmul.f32 %v842_v52, %v832_v8 }
 0x419   : > { %v859_v48 = vrot.slane %v844_v35, %v4000_v12 }
 0x41b   : > { %861 = vrot.lane.b32.xlu1 %v859_v48, %s2687_s30 }
 0x423   : > { %v838_v50 = vpop.permute.xlu1 %837 }
 0x424   : > { %v840_v47 = vmul.f32 %v838_v50, %v831_v61 }
 0x426   : > { %v853_v55 = vrot.slane %v840_v47, %v4000_v12 }
 0x428   : > { %v854_v29 = vmul.f32 %v853_v55, %v848_v49 }
 0x42a   : > { %v855_v37 = vsub.f32 %v831_v61, %v854_v29 }
 0x42c   : > { %v871_v62 = vsel %vm4008_vm5, %v853_v55, %v855_v37  ;;  %v2692_v55 = vmov 4   ;;  %v932_v37 = vsub.s32 3, %v4002_v6 }
 0x42d   : > { %2448 = vrcp.f32 %v871_v62 }
 0x43a   : > { %v2449_v45 = vpop.eup %2448 }
 0x43b   : > { %881 = vrot.lane.b32.xlu0 %v2449_v45, %s2688_s7 }
 0x43f   : > { %887 = vperm.xlu0 %2424, %v871_v62  }
 0x443   : > { %2426 = vset.pattern.permute.xlu0 %v2689_v2 }
 0x48d   : > { %v862_v36 = vpop.permute.xlu1 %861 }
 0x48e   : > { %v864_v38 = vmul.f32 %v862_v36, %v831_v61 }
 0x490   : > { %866 = vrot.lane.b32.xlu1 %v864_v38, %s2685_s0 }
 0x494   : > { %877 = vperm.xlu1 %2423, %v2449_v45  }
 0x498   : > { %2425 = vset.pattern.permute.xlu1 %v2689_v2 }
 0x4ad   : > { %v882_v57 = vpop.permute.xlu0 %881 }
 0x4ba   : > { %v888_v23 = vpop.permute.xlu0 %887 }
 0x502   : > { %v867_v56 = vpop.permute.xlu1 %866 }
 0x503   : > { %v869_v32 = vsub.f32 %v832_v8, %v867_v56 }
 0x505   : > { %v872_v34 = vsel %vm4008_vm5, %v859_v48, %v869_v32 }
 0x506   : > { %v884_v31 = vmul.f32 %v882_v57, %v872_v34 }
 0x508   : > { %v899_v51 = vrot.slane %v884_v31, %v3999_v13 }
 0x50a   : > { %901 = vrot.lane.b32.xlu1 %v899_v51, %s2690_s8 }
 0x50f   : > { %v878_v42 = vpop.permute.xlu1 %877 }
 0x510   : > { %v880_v61 = vmul.f32 %v878_v42, %v871_v62 }
 0x512   : > { %v893_v59 = vrot.slane %v880_v61, %v3999_v13 }
 0x514   : > { %v894_v52 = vmul.f32 %v893_v59, %v888_v23 }
 0x516   : > { %v895_v35 = vsub.f32 %v871_v62, %v894_v52 }
 0x518   : > { %v911_v8 = vsel %vm576_vm8, %v893_v59, %v895_v35  ;;  %v972_v35 = vsub.s32 4, %v4002_v6 }
 0x519   : > { %2450 = vrcp.f32 %v911_v8 }
 0x526   : > { %v2451_v50 = vpop.eup %2450 }
 0x527   : > { %921 = vrot.lane.b32.xlu0 %v2451_v50, %s2691_s9 }
 0x52b   : > { %927 = vperm.xlu0 %2426, %v911_v8  }
 0x52f   : > { %2428 = vset.pattern.permute.xlu0 %v2692_v55 }
 0x57c   : > { %v902_v48 = vpop.permute.xlu1 %901 }
 0x57d   : > { %v904_v47 = vmul.f32 %v902_v48, %v871_v62 }
 0x57f   : > { %906 = vrot.lane.b32.xlu1 %v904_v47, %s2688_s7 }
 0x583   : > { %917 = vperm.xlu1 %2425, %v2451_v50  }
 0x587   : > { %2427 = vset.pattern.permute.xlu1 %v2692_v55 }
 0x599   : > { %v922_v45 = vpop.permute.xlu0 %921 }
 0x5a6   : > { %v928_v57 = vpop.permute.xlu0 %927 }
 0x5f1   : > { %v907_v49 = vpop.permute.xlu1 %906 }
 0x5f2   : > { %v909_v29 = vsub.f32 %v872_v34, %v907_v49 }
 0x5f4   : > { %v912_v36 = vsel %vm576_vm8, %v899_v51, %v909_v29 }
 0x5f5   : > { %v924_v38 = vmul.f32 %v922_v45, %v912_v36 }
 0x5f7   : > { %v939_v2 = vrot.slane %v924_v38, %v932_v37 }
 0x5f9   : > { %941 = vrot.lane.b32.xlu1 %v939_v2, %s2693_s10 }
 0x5fe   : > { %v918_v56 = vpop.permute.xlu1 %917 }
 0x5ff   : > { %v920_v62 = vmul.f32 %v918_v56, %v911_v8 }
 0x601   : > { %v933_v32 = vrot.slane %v920_v62, %v932_v37 }
 0x603   : > { %v934_v31 = vmul.f32 %v933_v32, %v928_v57 }
 0x605   : > { %v935_v42 = vsub.f32 %v911_v8, %v934_v31  ;;  %v1002_v31 = vsub.s32 5, %v4002_v6 }
 0x607   : > { %v951_v61 = vsel %vm565_vm7, %v933_v32, %v935_v42 }
 0x608   : > { %2452 = vrcp.f32 %v951_v61 }
 0x615   : > { %v2453_v34 = vpop.eup %2452 }
 0x616   : > { %961 = vrot.lane.b32.xlu0 %v2453_v34, %s2694_s3 }
 0x61a   : > { %967 = vperm.xlu0 %2428, %v951_v61  }
 0x61e   : > { %2430 = vset.pattern.permute.xlu0 %v3929_v53 }
 0x66b   : > { %v942_v51 = vpop.permute.xlu1 %941 }
 0x66c   : > { %v944_v59 = vmul.f32 %v942_v51, %v911_v8 }
 0x66e   : > { %946 = vrot.lane.b32.xlu1 %v944_v59, %s2691_s9 }
 0x672   : > { %957 = vperm.xlu1 %2427, %v2453_v34  }
 0x676   : > { %2429 = vset.pattern.permute.xlu1 %v3929_v53 }
 0x688   : > { %v962_v50 = vpop.permute.xlu0 %961 }
 0x695   : > { %v968_v37 = vpop.permute.xlu0 %967 }
 0x6e0   : > { %v947_v23 = vpop.permute.xlu1 %946 }
 0x6e1   : > { %v949_v52 = vsub.f32 %v912_v36, %v947_v23 }
 0x6e3   : > { %v952_v48 = vsel %vm565_vm7, %v939_v2, %v949_v52 }
 0x6e4   : > { %v964_v47 = vmul.f32 %v962_v50, %v952_v48 }
 0x6e6   : > { %v979_v55 = vrot.slane %v964_v47, %v972_v35 }
 0x6e8   : > { %981 = vrot.lane.b32.xlu1 %v979_v55, %s2695_s11 }
 0x6ed   : > { %v958_v49 = vpop.permute.xlu1 %957 }
 0x6ee   : > { %v960_v29 = vmul.f32 %v958_v49, %v951_v61 }
 0x6f0   : > { %v973_v8 = vrot.slane %v960_v29, %v972_v35  ;;  %v3927_v35 = vmov 0.0   ;;  %v2699_v29 = vmov 1.0  }
 0x6f1   : > { %2212 = vmatprep.subr.mxu1 %v3927_v35 }
 0x6f2   : > { %v974_v45 = vmul.f32 %v973_v8, %v968_v37 }
 0x6f4   : > { %v975_v38 = vsub.f32 %v951_v61, %v974_v45 }
 0x6f6   : > { %v991_v56 = vsel %vm4009_vm12, %v973_v8, %v975_v38  ;;  %vm1035_vm12 = vcmp.eq.s32.totalorder %v4001_v7, 1 }
 0x6f7   : > { %2454 = vrcp.f32 %v991_v56 }
 0x704   : > { %v2455_v36 = vpop.eup %2454 }
 0x705   : > { %996 = vrot.lane.b32.xlu0 %v2455_v36, %s2696_s12 }
 0x75a   : > { %v982_v62 = vpop.permute.xlu1 %981 }
 0x75b   : > { %v984_v32 = vmul.f32 %v982_v62, %v951_v61  ;;  %v1015_v61 = vsub.f32 0.0, %v2628_v63 }
 0x75d   : > { %986 = vrot.lane.b32.xlu1 %v984_v32, %s2694_s3 }
 0x777   : > { %v997_v42 = vpop.permute.xlu0 %996 }
 0x7cf   : > { %v987_v2 = vpop.permute.xlu1 %986 }
 0x7d0   : > { %v989_v57 = vsub.f32 %v952_v48, %v987_v2  ;;  %v1019_v48 = vrot.slane %v1015_v61, %v2778_v11 }
 0x7d2   : > { %v992_v34 = vsel %vm4010_vm11, %v979_v55, %v989_v57  ;;  %vm1039_vm11 = vcmp.eq.s32.totalorder %v4001_v7, 2 }
 0x7d3   : > { %v999_v51 = vmul.f32 %v997_v42, %v992_v34 }
 0x7d5   : > { %v1003_v59 = vrot.slane %v999_v51, %v1002_v31 }
 0x7d7   : > { %1005 = vrot.lane.b32.xlu1 %v1003_v59, %s2697_s13 }
 0x849   : > { %v1006_v23 = vpop.permute.xlu1 %1005 }
 0x84a   : > { %v1008_v52 = vmul.f32 %v1006_v23, %v991_v56 }
 0x84c   : > { %1010 = vrot.lane.b32.xlu0 %v1008_v52, %s2696_s12 }
 0x8be   : > { %v1011_v50 = vpop.permute.xlu0 %1010 }
 0x8bf   : > { %v1013_v47 = vsub.f32 %v992_v34, %v1011_v50 }
 0x8c1   : > { %v1014_v49 = vsel %vm4011_vm14, %v1003_v59, %v1013_v47  ;;  %vm1051_vm14 = vcmp.eq.s32.totalorder %v4001_v7, 0 }
 0x8c2   : > { %v1020_v55 = vmul.f32 %v1019_v48, %v1014_v49 }
 0x8c4   : > { %vm1021_vm6 = vcmp.eq.f32.partialorder %v1020_v55, %v1020_v55 }
 0x8c5   : > { %v1022_v8 = vsel %vm1021_vm6, 0.0, %v2699_v29 }
 0x8c6   : > { %v1024_v37 = vsel %vm1023_vm4, %v1022_v8, -inf }
 0x8c7   : > { %v1025_v45 = vrot.slane %v1024_v37, 4 }
 0x8c9   : > { %v1026_v38 = vmax.f32 %v1024_v37, %v1025_v45 }
 0x8cb   : > { %v1027_v56 = vrot.slane %v1026_v38, 2 }
 0x8cd   : > { %v1028_v36 = vmax.f32 %v1026_v38, %v1027_v56 }
 0x8cf   : > { %v1029_v62 = vrot.slane %v1028_v36, 1 }
 0x8d1   : > { %v3397_v32 = vmax.f32 %v1028_v36, %v1029_v62 }
 0x8d3   : > { %vm1031_vm2 = vcmp.gt.f32.partialorder %v3397_v32, 0.5 }
 0x8d4   : > { %v3402_v2 = vsel %vm1031_vm2, 0.0, %v1020_v55 }
 0x8d5   : > { %v1071_v57 = vmul.f32 %v3402_v2, %v3402_v2  ;;  %v1045_v31 = vrot.slane %v3402_v2, 3  ;;  %v1056_v42 = vrot.slane %v3402_v2, 4  ;;  %v1065_v34 = vrot.slane %v3402_v2, 5 }
 0x8d7   : > { %v1073_v51 = vrot.slane %v1071_v57, 3  ;;  %2234 = vpush %v1045_v31 }
 0x8d8   : > { %2236 = vpush %v1056_v42 }
 0x8d9   : > { %v1076_v59 = vsel %vm1075_vm0, %v1073_v51, 0.0  ;;  %2238 = vpush %v1065_v34 }
 0x8da   : > { %v1077_v23 = vrot.slane %v1076_v59, 4 }
 0x8dc   : > { %v1078_v52 = vadd.f32 %v1077_v23, %v1076_v59 }
 0x8de   : > { %v1079_v61 = vrot.slane %v1078_v52, 2 }
 0x8e0   : > { %v1080_v50 = vadd.f32 %v1079_v61, %v1078_v52 }
 0x8e2   : > { %v1081_v48 = vrot.slane %v1080_v50, 1 }
 0x8e4   : > { %v1082_v47 = vadd.f32 %v1081_v48, %v1080_v50 }
 0x8e6   : > { %2456 = vrsqrt.f32 %v1082_v47  ;;  %vm1085_vm1 = vcmp.eq.f32.partialorder %v1082_v47, inf  ;;  %v1088_v29 = vand.u32 2147483648, %v1082_v47  ;;  %vm1087_vm15 = vcmp.eq.f32.partialorder %v1082_v47, 0.0 }
 0x8f3   : > { %v2457_v49 = vpop.eup %2456 }
 0x8f4   : > { %v1084_v55 = vmul.f32 %v2457_v49, %v1082_v47 }
 0x8f6   : > { %v1086_v8 = vsel %vm1085_vm1, %v1082_v47, %v1084_v55  ;;  %vm4024_vm1 = vcmp.lt.s32.totalorder %v4001_v7, 8 }
 0x8f7   : > { %v3409_v37 = vsel %vm1087_vm15, %v1088_v29, %v1086_v8 }
 0x8f8   : > { %vm1090_vm13 = vcmp.lt.f32.partialorder %v3409_v37, 1e-07  ;;  %v1129_v56 = vmul.f32 0.15915494, %v3409_v37 }
 0x8f9   : > { %v1091_v45 = vsel %vm1090_vm13, 1.0, %v3409_v37 }
 0x8fa   : > { %2458 = vrcp.f32 %v1091_v45  ;;  %v2242_v36 = vcvt.f32.s32 %v1129_v56  ;;  %v2245_v31 = vand.u32 2147483648, %v1129_v56  ;;  %v2240_v42 = vand.u32 2147483647, %v1129_v56 }
 0x8fc   : > { %v2243_v62 = vcvt.s32.f32 %v2242_v36  ;;  %vm2241_vm9 = vcmp.lt.f32.partialorder %v2240_v42, 8388608.0  ;;  %v2064_v42 = vsel %vm1035_vm12, 1.0, %v3927_v35 }
 0x8fe   : > { %v2244_v57 = vand.u32 2147483647, %v2243_v62 }
 0x900   : > { %v2246_v34 = vor.u32 %v2245_v31, %v2244_v57 }
 0x902   : > { %v2247_v51 = vsel %vm2241_vm9, %v2246_v34, %v1129_v56 }
 0x903   : > { %v1131_v59 = vmul.f32 6.2831855, %v2247_v51  ;;  %v2065_v51 = vsel %vm1039_vm11, 1.0, %v3927_v35 }
 0x905   : > { %v1132_v23 = vsub.f32 %v3409_v37, %v1131_v59  ;;  %v2066_v59 = vsel %vm1051_vm14, 1.0, %v3927_v35 }
 0x907   : > { %v2459_v38 = vpop.eup %2458  ;;  %v1133_v52 = vmul.f32 %v1132_v23, %v1132_v23 }
 0x908   : > { %1095 = vperm.xlu1 %2429, %v2459_v38   ;;  %s2235_s14 = spop %2234 }
 0x909   : > { %v1149_v61 = vmul.f32 4.7794773e-14, %v1133_v52  ;;  %v1134_v50 = vmul.f32 -7.6471636e-13, %v1133_v52  ;;  %s2237_s15 = spop %2236 }
 0x90a   : > { %s2239_s16 = spop %2238 }
 0x90b   : > { %v1150_v48 = vadd.f32 -1.1470745e-11, %v1149_v61  ;;  %v1135_v47 = vadd.f32 1.6059044e-10, %v1134_v50  ;;  %v1038_v50 = vmul.f32 %v2064_v42, %v2966_v24  ;;  %v1067_v33 = vstv %s2239_s16 }
 0x90c   : > { %2431 = vset.pattern.permute.xlu1 %v3926_v27 }
 0x90d   : > { %v1151_v49 = vmul.f32 %v1150_v48, %v1133_v52  ;;  %v1136_v55 = vmul.f32 %v1135_v47, %v1133_v52  ;;  %v1042_v48 = vmul.f32 %v2065_v51, %v2999_v43  ;;  %v1054_v47 = vmul.f32 %v2066_v59, %v2966_v24 }
 0x90f   : > { %v1152_v29 = vadd.f32 2.0876756e-09, %v1151_v49  ;;  %v1137_v8 = vadd.f32 -2.5052108e-08, %v1136_v55 }
 0x911   : > { %v1153_v45 = vmul.f32 %v1152_v29, %v1133_v52  ;;  %v1138_v38 = vmul.f32 %v1137_v8, %v1133_v52  ;;  %v1043_v29 = vsub.f32 %v1038_v50, %v1042_v48 }
 0x913   : > { %v1154_v36 = vadd.f32 -2.755732e-07, %v1153_v45  ;;  %v1139_v62 = vadd.f32 2.7557319e-06, %v1138_v38  ;;  %v1047_v38 = vstv %s2235_s14 }
 0x915   : > { %v1155_v27 = vmul.f32 %v1154_v36, %v1133_v52  ;;  %v1140_v57 = vmul.f32 %v1139_v62, %v1133_v52  ;;  %v1058_v36 = vstv %s2237_s15  ;;  %v1062_v62 = vmul.f32 %v2066_v59, %v2999_v43 }
 0x917   : > { %v1156_v31 = vadd.f32 2.4801588e-05, %v1155_v27  ;;  %v1141_v56 = vadd.f32 -0.0001984127, %v1140_v57  ;;  %v1050_v27 = vmul.f32 %v2065_v51, %v2861_v44  ;;  %v1063_v57 = vmul.f32 %v2064_v42, %v2861_v44 }
 0x919   : > { %v1157_v34 = vmul.f32 %v1156_v31, %v1133_v52  ;;  %v1142_v61 = vmul.f32 %v1141_v56, %v1133_v52  ;;  %v1055_v8 = vsub.f32 %v1050_v27, %v1054_v47  ;;  %v1049_v56 = vmul.f32 %v1047_v38, %v1043_v29 }
 0x91a   : > { %v1064_v51 = vsub.f32 %v1062_v62, %v1063_v57 }
 0x91b   : > { %v1158_v49 = vadd.f32 -0.0013888889, %v1157_v34  ;;  %v1143_v55 = vadd.f32 0.008333334, %v1142_v61  ;;  %v1060_v35 = vmul.f32 %v1058_v36, %v1055_v8  ;;  %v4013_v8 = vmov 0  }
 0x91c   : > { %v1069_v61 = vmul.f32 %v1067_v33, %v1064_v51 }
 0x91d   : > { %v1159_v45 = vmul.f32 %v1158_v49, %v1133_v52  ;;  %v1144_v31 = vmul.f32 %v1143_v55, %v1133_v52  ;;  %v1061_v34 = vadd.f32 %v1060_v35, %v1049_v56  ;;  %v4012_v55 = vmov 2  }
 0x91f   : > { %v1160_v53 = vadd.f32 0.041666668, %v1159_v45  ;;  %v1145_v25 = vadd.f32 -0.16666667, %v1144_v31  ;;  %v1070_v48 = vadd.f32 %v1069_v61, %v1061_v34 }
 0x921   : > { %v1161_v30 = vmul.f32 %v1160_v53, %v1133_v52  ;;  %v1146_v50 = vmul.f32 %v1145_v25, %v1133_v52  ;;  %v1179_v53 = vsel %vm1090_vm13, 1, %v4013_v8  ;;  %v4014_v25 = vmov 1  }
 0x923   : > { %v1162_v27 = vadd.f32 -0.5, %v1161_v30  ;;  %v1147_v60 = vadd.f32 1.0, %v1146_v50  ;;  %v1238_v30 = vrot.slane %v2660_v3, %v3999_v13 }
 0x925   : > { %v1163_v42 = vmul.f32 %v1162_v27, %v1133_v52  ;;  %v1148_v59 = vmul.f32 %v1147_v60, %v1132_v23  ;;  %v1224_v60 = vrot.slane %v2660_v3, %v4000_v12 }
 0x927   : > { %v1164_v29 = vadd.f32 1.0, %v1163_v42 }
 0x929   : > { %v1171_v33 = vsub.f32 1.0, %v1164_v29 }
 0x983   : > { %v1096_v47 = vpop.permute.xlu1 %1095 }
 0x984   : > { %v1098_v49 = vmul.f32 %v1096_v47, %v1070_v48 }
 0x986   : > { %1110 = vperm.xlu1 %2431, %v1098_v49   ;;  %1101 = vperm.xlu0 %2430, %v1098_v49   ;;  %v1116_v37 = vrot.slane %v1098_v49, %v4000_v12  ;;  %v1107_v52 = vrot.slane %v1098_v49, %v2778_v11  ;;  %v1126_v36 = vrot.slane %v1098_v49, %v3999_v13 }
 0x98a   : > { %2432 = vset.pattern.permute.xlu1 %v4012_v55  ;;  %1167 = vperm.xlu0 %2430, %v1148_v59  }
 0x98b   : > { %1120 = vperm.xlu1 %2432, %v1098_v49  }
 0x98e   : > { %1181 = vperm.xlu0 %2430, %v1179_v53  }
 0x98f   : > { %2433 = vset.pattern.permute.xlu1 %v4013_v8 }
 0x990   : > { %1174 = vperm.xlu1 %2433, %v1171_v33  }
 0x992   : > { %1240 = vrot.lane.b32.xlu0 %v1238_v30, %s2690_s8  ;;  %v1194_v30 = vrot.slane %v2664_v0, %v2778_v11 }
 0x993   : > { %2434 = vset.pattern.permute.xlu0 %v4014_v25 }
 0x994   : > { %1226 = vrot.lane.b32.xlu1 %v1224_v60, %s2687_s30 }
 0xa01   : > { %v1111_v35 = vpop.permute.xlu1 %1110  ;;  %v1102_v23 = vpop.permute.xlu0 %1101 }
 0xa02   : > { %v1117_v45 = vmul.f32 %v1116_v37, %v1111_v35  ;;  %v1108_v38 = vmul.f32 %v1107_v52, %v1102_v23  ;;  %v1213_v23 = vrot.slane %v2664_v0, %v3999_v13  ;;  %v1219_v52 = vrot.slane %v2660_v3, %v2778_v11 }
 0xa04   : > { %v1118_v31 = vadd.f32 %v1117_v45, %v1108_v38 }
 0xa05   : > { %v1168_v62 = vpop.permute.xlu0 %1167 }
 0xa06   : > { %v1121_v57 = vpop.permute.xlu1 %1120  ;;  %v1170_v61 = vmul.f32 %v1168_v62, %v1098_v49 }
 0xa07   : > { %v1127_v56 = vmul.f32 %v1126_v36, %v1121_v57 }
 0xa09   : > { %v1128_v51 = vadd.f32 %v1127_v56, %v1118_v31  ;;  %v1182_v50 = vpop.permute.xlu0 %1181 }
 0xa0a   : > { %vm1183_vm4 = vcmp.eq.s32.totalorder %v1182_v50, 1  ;;  %v2441_v50 = vld [vmem:[#allocation9 + $0x4] ss:$8 sps:$4 sm:$0xff]  }
 0xa0b   : > { %v1175_v34 = vpop.permute.xlu1 %1174  ;;  %1543 = vmatprep.mubr.bf16.mxu0 %v2441_v50 }
 0xa0c   : > { %v1177_v48 = vmul.f32 %v1175_v34, %v1128_v51 }
 0xa0d   : > { %v1241_v59 = vpop.permute.xlu0 %1240 }
 0xa0e   : > { %v1178_v27 = vadd.f32 %v1177_v48, %v1170_v61 }
 0xa0f   : > { %v1227_v53 = vpop.permute.xlu1 %1226 }
 0xa10   : > { %v1184_v47 = vsel %vm1183_vm4, %v1098_v49, %v1178_v27  ;;  %v1203_v49 = vrot.slane %v2664_v0, %v4000_v12 }
 0xa11   : > { %v1185_v42 = vadd.f32 %v4003_v9, %v1184_v47 }
 0xa13   : > { %1197 = vperm.xlu0 %2434, %v1185_v42   ;;  %1188 = vperm.xlu1 %2433, %v1185_v42   ;;  %v1243_v29 = vmul.f32 %v1241_v59, %v1185_v42  ;;  %v1229_v33 = vmul.f32 %v1227_v53, %v1185_v42  ;;  %v1220_v57 = vmul.f32 %v1219_v52, %v1185_v42 }
 0xa17   : > { %2435 = vset.pattern.permute.xlu1 %v4012_v55  ;;  %1245 = vrot.lane.b32.xlu0 %v1243_v29, %s2688_s7 }
 0xa18   : > { %1207 = vperm.xlu1 %2435, %v1185_v42  }
 0xa1c   : > { %1231 = vrot.lane.b32.xlu1 %v1229_v33, %s2685_s0 }
 0xa1d   : > { %2436 = vset.pattern.permute.xlu1 %v4013_v8 }
 0xa8e   : > { %v1198_v60 = vpop.permute.xlu0 %1197  ;;  %v1189_v25 = vpop.permute.xlu1 %1188 }
 0xa8f   : > { %v1204_v35 = vmul.f32 %v1203_v49, %v1198_v60  ;;  %v1195_v37 = vmul.f32 %v1194_v30, %v1189_v25  ;;  %v4017_v49 = vstv %s2797_s17  ;;  %v4018_v60 = vstv %s2799_s18  ;;  %s2538_s17 = scalar_lea.vmem (%p3836_p6), %s1925_s27, 64 }
 0xa90   :  { %p2539_p7 = scmp.ne.s32.totalorder (%p3836_p6), %s1925_s27, %s2538_s17  ;;  %p2544_p9 = scmp.lt.s32.totalorder (%p3836_p6), %s2538_s17, %s2538_s17 }
 0xa91   : > { %v1205_v38 = vadd.f32 %v1204_v35, %v1195_v37  ;;  %v4019_v35 = vstv %s2804_s19 }
 0xa92   : > { %v1246_v51 = vpop.permute.xlu0 %1245  ;;  %p2545_p10 = por (%p3836_p6), %p2544_p9, %p2543_p8 }
 0xa93   : > { %v1208_v45 = vpop.permute.xlu1 %1207 }
 0xa94   : > { %v1214_v36 = vmul.f32 %v1213_v23, %v1208_v45  ;;  %p2546_p11 = pnand (%p3836_p6), %p2545_p10, %p2539_p7 }
 0xa96   : > { %v3458_v62 = vadd.f32 %v1214_v36, %v1205_v38 }
 0xa97   : > { %v1232_v31 = vpop.permute.xlu1 %1231 }
 0xa98   : > { %v1234_v56 = vadd.f32 %v1232_v31, %v1220_v57  ;;  %1257 = vperm.xlu0 %2434, %v3458_v62   ;;  %1252 = vperm.xlu1 %2436, %v3458_v62  }
 0xa9a   : > { %v1248_v34 = vadd.f32 %v1246_v51, %v1234_v56  ;;  %v4020_v56 = vstv %s2811_s21 }
 0xa9c   : > { %2437 = vset.pattern.permute.xlu1 %v4012_v55  ;;  %2438 = vset.pattern.permute.xlu0 %v4013_v8  ;;  %v3465_v61 = vadd.f32 %v1248_v34, %v3402_v2 }
 0xa9d   : > { %1263 = vperm.xlu1 %2437, %v3458_v62  }
 0xa9e   : > { %1270 = vperm.xlu0 %2438, %v3465_v61  }
 0xb13   : > { %v1258_v48 = vpop.permute.xlu0 %1257  ;;  %v1253_v27 = vpop.permute.xlu1 %1252 }
 0xb14   : > { %v1260_v47 = vmul.f32 %v1258_v48, %v4015_v17  ;;  %v1255_v55 = vmul.f32 %v1253_v27, %v4016_v16 }
 0xb16   : > { %v1261_v59 = vadd.f32 %v1260_v47, %v1255_v55 }
 0xb18   : > { %v1264_v42 = vpop.permute.xlu1 %1263 }
 0xb19   : > { %v1266_v2 = vmul.f32 %v1264_v42, %v2793_v18  ;;  %v1271_v53 = vpop.permute.xlu0 %1270 }
 0xb1b   : > { %v1267_v29 = vadd.f32 %v1266_v2, %v1261_v59  ;;  %v4021_v2 = vstv %s2829_s23 }
 0xb1d   : > { %v3472_v33 = vadd.f32 %v1271_v53, %v1267_v29  ;;  %v4022_v53 = vstv %s2836_s24 }
 0xb1f   : > { %v1297_v30 = vmul.f32 %v3472_v33, %v4017_v49  ;;  %v1302_v25 = vmul.f32 %v3472_v33, %v4018_v60  ;;  %v1296_v37 = vmul.f32 %v3472_v33, %v4019_v35  ;;  %v3485_v38 = vrot.slane %v3472_v33, %v3999_v13 }
 0xb20   : > { %v3489_v57 = vrot.slane %v3472_v33, %v4000_v12  ;;  %v1275_v51 = vmul.f32 %v3472_v33, %v4020_v56  ;;  %v1286_v50 = vmul.f32 %v3472_v33, %v2865_v46  ;;  %v1274_v59 = vmul.f32 %v3472_v33, %v2885_v54 }
 0xb21   : > { %v1299_v23 = vrot.slane %v1297_v30, 1  ;;  %v1304_v45 = vrot.slane %v1302_v25, 2  ;;  %v1642_v31 = vmul.f32 %v2841_v39, %v3485_v38  ;;  %v1280_v29 = vmul.f32 %v3472_v33, %v4021_v2 }
 0xb22   : > { %v3504_v27 = vmul.f32 %v2846_v40, %v3489_v57  ;;  %v1277_v55 = vrot.slane %v1275_v51, 1  ;;  %v1288_v42 = vrot.slane %v1286_v50, 1  ;;  %v1285_v49 = vmul.f32 %v3472_v33, %v4022_v53 }
 0xb23   : > { %v1301_v52 = vadd.f32 %v1299_v23, %v1296_v37  ;;  %v3500_v48 = vadd.f32 %v2861_v44, %v1642_v31  ;;  %v4023_v30 = vstv %s2848_s25  ;;  %v1282_v37 = vrot.slane %v1280_v29, 2 }
 0xb24   : > { %v1291_v60 = vmul.f32 %v3472_v33, %v4023_v30  ;;  %v1279_v25 = vadd.f32 %v1277_v55, %v1274_v59  ;;  %v1290_v35 = vadd.f32 %v1288_v42, %v1285_v49  ;;  %v1623_v30 = vrot.slane %v3472_v33, 2 }
 0xb25   : > { %v1306_v36 = vadd.f32 %v1304_v45, %v1301_v52  ;;  %v1616_v52 = vand.u32 2147483647, %v3472_v33 }
 0xb26   : > { %v1293_v23 = vrot.slane %v1291_v60, 2  ;;  %v1284_v45 = vadd.f32 %v1282_v37, %v1279_v25  ;;  %v4025_v25 = vmov 0.0  }
 0xb27   : > { %vm1307_vm6 = vcmp.gt.f32.partialorder %v1306_v36, 1e-06  ;;  %vm1617_vm0 = vcmp.gt.f32.partialorder %v1616_v52, 1e-12 }
 0xb28   : > { %v1308_v34 = vsel %vm1307_vm6, %v1306_v36, 1.0  ;;  %v1295_v31 = vadd.f32 %v1293_v23, %v1290_v35  ;;  %v1618_v47 = vsel %vm1617_vm0, 1, %v4013_v8  ;;  %vm1316_vm15 = vmand %vm4024_vm1, %vm1307_vm6  ;;  %vm4026_vm1 = vcmask 1040384  }
 0xb29   : > { %2460 = vrcp.f32 %v1308_v34  ;;  %v1619_v55 = vrot.slane %v1618_v47, 2 }
 0xb2b   : > { %vm1620_vm0 = vcmp.ne.s32.totalorder %v1619_v55, 0 }
 0xb36   : > { %v2461_v56 = vpop.eup %2460 }
 0xb37   : > { %v1310_v51 = vmul.f32 %v2461_v56, %v1284_v45  ;;  %v1313_v34 = vmul.f32 %v2461_v56, %v1295_v31 }
 0xb39   : > { %v2250_v50 = vcvt.f32.s32 %v1310_v51  ;;  %v2253_v2 = vcvt.f32.s32 %v1313_v34 }
 0xb3b   : > { %v2067_v53 = vadd.s32 4294967295, %v2250_v50  ;;  %v2068_v9 = vadd.s32 4294967295, %v2253_v2  ;;  %v2700_v50 = vmov 1.0|1.0   ;;  %v1650_v2 = vmul.f32 %v2934_v19, %v3485_v38 }
 0xb3d   : > { %vm1317_vm13 = vcmp.ge.s32.totalorder %v2067_v53, 0  ;;  %vm1319_vm9 = vcmp.ge.s32.totalorder %v2068_v9, 0  ;;  %v1325_v42 = vcvt.s32.f32 %v2068_v9  ;;  %v1328_v59 = vcvt.s32.f32 %v2067_v53 }
 0xb3e   : > { %vm1318_vm12 = vmand %vm1316_vm15, %vm1317_vm13  ;;  %vm1321_vm14 = vcmp.lt.s32.totalorder %v2067_v53, 16  ;;  %vm1323_vm3 = vcmp.lt.s32.totalorder %v2068_v9, 16  ;;  %v1658_v53 = vmul.f32 %v2934_v19, %v3489_v57  ;;  %v4033_v57 = vld [vmem:[#allocation27_spill] sm:$0xff] }
 0xb3f   : > { %vm1320_vm11 = vmand %vm1318_vm12, %vm1319_vm9  ;;  %v1326_v29 = vfloor.f32 %v1325_v42  ;;  %v1329_v49 = vfloor.f32 %v1328_v59  ;;  %v1655_v42 = vrot.slane %v3472_v33, %v2778_v11 }
 0xb40   : > { %vm1322_vm4 = vmand %vm1320_vm11, %vm1321_vm14 }
 0xb41   : > { %vm1324_vm5 = vmand %vm1322_vm4, %vm1323_vm3  ;;  %v2254_v36 = vtrunc.f32 %v1326_v29  ;;  %v2256_v60 = vtrunc.f32 %v1329_v49  ;;  %v1632_v29 = vmul.f32 %v3472_v33, %v2971_v26  ;;  %v4034_v49 = vld [vmem:[#allocation22_spill] sm:$0xff] }
 0xb42   : > { %v3526_v35 = vsel %vm1324_vm5, 1.0, %v4025_v25  ;;  %vm1621_vm6 = vmand %vm1324_vm5, %vm1620_vm0  ;;  %v1333_v9 = vsel %vm1324_vm5, 1, %v4013_v8 }
 0xb43   : > { %v1335_v47 = vsel %vm4026_vm1, %v3526_v35, 0.0  ;;  %v1625_v37 = vsel %vm1621_vm6, %v1623_v30, 1.0  ;;  %v2255_v23 = vcvt.f32.s32 %v2254_v36  ;;  %v2257_v52 = vcvt.f32.s32 %v2256_v60  ;;  %v4035_v36 = vld [vmem:[#allocation28_spill] sm:$0xff] }
 0xb44   : > { %2462 = vrcp.f32 %v1625_v37  ;;  %1336 = vadd.xlane.f32.xlu1 %v1335_v47  ;;  %v1377_v56 = vrot.slane %v1333_v9, %v2778_v11  ;;  %v1628_v30 = vmul.f32 %v3472_v33, %v4034_v49  ;;  %v1651_v47 = vsub.f32 %v2999_v43, %v1650_v2  ;;  %v4036_v33 = vld [vmem:[#allocation29_spill] sm:$0xff]  ;;  %v4037_v2 = vld [vmem:[#allocation30_spill] sm:$0xff] }
 0xb45   : > { %v1331_v45 = vmul.u32 16, %v2255_v23  ;;  %v1659_v37 = vadd.f32 %v2966_v24, %v1658_v53  ;;  %v1656_v23 = vmul.f32 %v2846_v40, %v1655_v42  ;;  %v1563_v32 = vrot.slane %v3526_v35, %v2778_v11 }
 0xb46   : > { %vm3535_vm3 = vcmp.eq.s32.totalorder %v1377_v56, 1 }
 0xb47   : > { %v1332_v31 = vadd.s32 %v2257_v52, %v1331_v45 }
 0xb49   : > { %v3533_v51 = vrot.slane %v1332_v31, %v2778_v11  ;;  %v1660_v31 = vmul.f32 %v2841_v39, %v1655_v42  ;;  %v4038_v42 = vld [vmem:[#allocation31_spill] sm:$0xff] }
 0xb4b   : > { %vm1372_vm15 = vcmp.eq.s32.totalorder %v4029_v4, %v3533_v51  ;;  %vm1373_vm13 = vcmp.eq.s32.totalorder %v4030_v5, %v3533_v51  ;;  %vm1356_vm9 = vcmp.eq.s32.totalorder %v4031_v10, %v3533_v51  ;;  %vm1357_vm11 = vcmp.eq.s32.totalorder %v4032_v15, %v3533_v51 }
 0xb4c   : > { %vm1409_vm5 = vmand %vm1372_vm15, %vm3535_vm3  ;;  %vm1370_vm0 = vcmp.eq.s32.totalorder %v2947_v21, %v3533_v51  ;;  %vm1371_vm1 = vcmp.eq.s32.totalorder %v2954_v22, %v3533_v51  ;;  %v1661_v49 = vsub.f32 %v1659_v37, %v1660_v31  ;;  %v4046_v31 = vld [vmem:[#allocation38_spill] sm:$0xff] }
 0xb4d   : > { %vm1410_vm12 = vmand %vm1373_vm13, %vm3535_vm3 }
 0xb4e   : > { %vm2122_vm14 = vmpackc.low %vm1410_vm12, %vm1409_vm5  ;;  %vm1354_vm5 = vcmp.eq.s32.totalorder %v4033_v57, %v3533_v51  ;;  %vm1355_vm12 = vcmp.eq.s32.totalorder %v4035_v36, %v3533_v51  ;;  %v1657_v57 = vadd.f32 %v1656_v23, %v1651_v47  ;;  %v4040_v36 = vld [vmem:[#allocation32_spill] sm:$0xff]  ;;  %v4042_v23 = vld [vmem:[#allocation34_spill] sm:$0xff] }
 0xb4f   : > { %2170 = vmatprep.subr.msk.bf16.mxu0 %vm2122_vm14, %v2700_v50  ;;  %vm1393_vm4 = vmand %vm1356_vm9, %vm3535_vm3 }
 0xb50   : > { %vm1394_vm6 = vmand %vm1357_vm11, %vm3535_vm3 }
 0xb51   : > { %v2463_v55 = vpop.eup %2462  ;;  %vm2106_vm15 = vmpackc.low %vm1394_vm6, %vm1393_vm4  ;;  %vm1368_vm4 = vcmp.eq.s32.totalorder %v4036_v33, %v3533_v51  ;;  %vm1369_vm6 = vcmp.eq.s32.totalorder %v4037_v2, %v3533_v51  ;;  %v4044_v33 = vld [vmem:[#allocation36_spill] sm:$0xff] }
 0xb52   : > { %v1631_v59 = vmul.f32 %v2463_v55, %v2865_v46  ;;  %v1634_v38 = vrot.slane %v2463_v55, 7  ;;  %2171 = vmatpush3.bf16.msk.msra.mxu0 %vm2106_vm15, %v2700_v50  ;;  %vm1407_vm13 = vmand %vm1370_vm0, %vm3535_vm3  ;;  %v1627_v9 = vmul.f32 %v2463_v55, %v2885_v54  ;;  %v1629_v52 = vmul.f32 %v2463_v55, %v1628_v30  ;;  %v4048_v2 = vld [vmem:[#allocation40_spill] sm:$0xff] }
 0xb53   : > { %vm1408_vm9 = vmand %vm1371_vm1, %vm3535_vm3 }
 0xb54   : > { %v1636_v60 = vmul.f32 %v1634_v38, %v1632_v29  ;;  %vm2124_vm11 = vmpackc.low %vm1408_vm9, %vm1407_vm13  ;;  %v1676_v56 = vrot.slane %v1631_v59, %v2778_v11  ;;  %v1630_v53 = vmul.f32 %v2463_v55, %v1629_v52  ;;  %v1665_v29 = vrot.slane %v1627_v9, %v2778_v11  ;;  %v4043_v52 = vld [vmem:[#allocation35_spill] sm:$0xff] }
 0xb55   : > { %2172 = vmatprep.subr.msk.bf16.mxu0 %vm2124_vm11, %v2700_v50  ;;  %vm1391_vm14 = vmand %vm1354_vm5, %vm3535_vm3  ;;  %vm1352_vm13 = vcmp.eq.s32.totalorder %v4038_v42, %v3533_v51  ;;  %v4039_v59 = vsub.f32 %v3500_v48, %v3504_v27  ;;  %vm1353_vm9 = vcmp.eq.s32.totalorder %v4040_v36, %v3533_v51  ;;  %v4041_v48 = vld [vmem:[#allocation33_spill] sm:$0xff]  ;;  %v4054_v42 = vld [vmem:[#allocation46_spill] sm:$0xff] }
 0xb56   : > { %v1637_v45 = vmul.f32 %v1636_v60, %v1634_v38  ;;  %vm1392_vm0 = vmand %vm1355_vm12, %vm3535_vm3  ;;  %v1670_v55 = vrot.slane %v1630_v53, %v2778_v11  ;;  %v1677_v60 = vmul.f32 %v1676_v56, %v1657_v57  ;;  %v4047_v56 = vld [vmem:[#allocation39_spill] sm:$0xff]  ;;  %v4049_v53 = vld [vmem:[#allocation41_spill] sm:$0xff] }
 0xb57   : > { %vm2108_vm1 = vmpackc.low %vm1392_vm0, %vm1391_vm14  ;;  %v1666_v38 = vmul.f32 %v1665_v29, %v4039_v59  ;;  %vm1366_vm14 = vcmp.eq.s32.totalorder %v4041_v48, %v3533_v51  ;;  %vm1367_vm0 = vcmp.eq.s32.totalorder %v4042_v23, %v3533_v51  ;;  %v4050_v29 = vld [vmem:[#allocation42_spill] sm:$0xff]  ;;  %v4051_v57 = vld [vmem:[#allocation43_spill] sm:$0xff] }
 0xb58   : > { %v1681_v30 = vrot.slane %v1637_v45, %v4000_v12  ;;  %2173 = vmatpush3.bf16.msk.msra.mxu0 %vm2108_vm1, %v2700_v50  ;;  %vm1405_vm15 = vmand %vm1368_vm4, %vm3535_vm3  ;;  %v1671_v37 = vmul.f32 %v1670_v55, %v1661_v49  ;;  %v4045_v45 = vld [vmem:[#allocation37_spill] sm:$0xff]  ;;  %v4055_v59 = vld [vmem:[#allocation47_spill] sm:$0xff] }
 0xb59   : > { %vm1406_vm5 = vmand %vm1369_vm6, %vm3535_vm3  ;;  %v4057_v55 = vld [vmem:[#allocation49_spill] sm:$0xff]  ;;  %v4058_v36 = vld [vmem:[#allocation50_spill] sm:$0xff] }
 0xb5a   : > { %v1682_v47 = vmul.f32 %v1681_v30, %v1661_v49  ;;  %vm2126_vm12 = vmpackc.low %vm1406_vm5, %vm1405_vm15  ;;  %v3621_v9 = vadd.f32 %v1671_v37, %v1666_v38  ;;  %vm1350_vm15 = vcmp.eq.s32.totalorder %v4043_v52, %v3533_v51  ;;  %vm1351_vm5 = vcmp.eq.s32.totalorder %v4044_v33, %v3533_v51  ;;  %v4052_v49 = vld [vmem:[#allocation44_spill] sm:$0xff]  ;;  %v4053_v30 = vld [vmem:[#allocation45_spill] sm:$0xff] }
 0xb5b   : > { %2174 = vmatprep.subr.msk.bf16.mxu0 %vm2126_vm12, %v2700_v50  ;;  %vm1389_vm11 = vmand %vm1352_vm13, %vm3535_vm3  ;;  %v4056_v38 = vld [vmem:[#allocation48_spill] sm:$0xff] }
 0xb5c   : > { %v3615_v27 = vadd.f32 %v1682_v47, %v1677_v60  ;;  %vm1390_vm4 = vmand %vm1353_vm9, %vm3535_vm3  ;;  %v4059_v60 = vld [vmem:[#allocation51_spill] sm:$0xff]  ;;  %v1493_v47 = vld [vmem:[#allocation9 + $0x10] sm:$0xff] }
 0xb5d   : > { %vm2110_vm6 = vmpackc.low %vm1390_vm4, %vm1389_vm11  ;;  %vm1364_vm11 = vcmp.eq.s32.totalorder %v4045_v45, %v3533_v51  ;;  %vm1365_vm4 = vcmp.eq.s32.totalorder %v4046_v31, %v3533_v51  ;;  %v2439_v37 = vld [vmem:[#allocation9] ss:$8 sps:$4 sm:$0xff]   ;;  %v2105_v48 = vcombine.high %v1493_v47, %v1493_v47  ;;  %v2104_v23 = vcombine.low %v1493_v47, %v1493_v47 }
 0xb5e   : > { %2213 = vmatpush3.xpose.msra.mxu1 %v3615_v27  ;;  %2175 = vmatpush3.bf16.msk.msra.mxu0 %vm2110_vm6, %v2700_v50  ;;  %vm1403_vm1 = vmand %vm1366_vm14, %vm3535_vm3 }
 0xb5f   : > { %2217 = vmatprep.subr.mxu1 %v4025_v25  ;;  %vm1404_vm13 = vmand %vm1367_vm0, %vm3535_vm3 }
 0xb60   : > { %vm2128_vm9 = vmpackc.low %vm1404_vm13, %vm1403_vm1  ;;  %vm1348_vm1 = vcmp.eq.s32.totalorder %v4047_v56, %v3533_v51  ;;  %vm1349_vm13 = vcmp.eq.s32.totalorder %v4048_v2, %v3533_v51  ;;  %v4065_v2 = vld [vmem:[#allocation52_spill] sm:$0xff] }
 0xb61   : > { %2176 = vmatprep.subr.msk.bf16.mxu0 %vm2128_vm9, %v2700_v50  ;;  %vm1387_vm12 = vmand %vm1350_vm15, %vm3535_vm3 }
 0xb62   : > { %vm1388_vm14 = vmand %vm1351_vm5, %vm3535_vm3 }
 0xb63   : > { %vm2112_vm6 = vmpackc.low %vm1388_vm14, %vm1387_vm12  ;;  %vm1362_vm12 = vcmp.eq.s32.totalorder %v4049_v53, %v3533_v51  ;;  %vm1363_vm14 = vcmp.eq.s32.totalorder %v4050_v29, %v3533_v51 }
 0xb64   : > { %2177 = vmatpush3.bf16.msk.msra.mxu0 %vm2112_vm6, %v2700_v50  ;;  %vm1401_vm0 = vmand %vm1364_vm11, %vm3535_vm3 }
 0xb65   : > { %vm1402_vm15 = vmand %vm1365_vm4, %vm3535_vm3 }
 0xb66   : > { %vm2130_vm9 = vmpackc.low %vm1402_vm15, %vm1401_vm0  ;;  %vm1346_vm0 = vcmp.eq.s32.totalorder %v4051_v57, %v3533_v51  ;;  %vm1347_vm15 = vcmp.eq.s32.totalorder %v4052_v49, %v3533_v51 }
 0xb67   : > { %2178 = vmatprep.subr.msk.bf16.mxu0 %vm2130_vm9, %v2700_v50  ;;  %vm1385_vm5 = vmand %vm1348_vm1, %vm3535_vm3 }
 0xb68   : > { %vm1386_vm11 = vmand %vm1349_vm13, %vm3535_vm3 }
 0xb69   : > { %vm2114_vm6 = vmpackc.low %vm1386_vm11, %vm1385_vm5  ;;  %vm1360_vm5 = vcmp.eq.s32.totalorder %v4053_v30, %v3533_v51  ;;  %vm1361_vm11 = vcmp.eq.s32.totalorder %v4054_v42, %v3533_v51 }
 0xb6a   : > { %2179 = vmatpush3.bf16.msk.msra.mxu0 %vm2114_vm6, %v2700_v50  ;;  %vm1399_vm4 = vmand %vm1362_vm12, %vm3535_vm3 }
 0xb6b   : > { %vm1400_vm1 = vmand %vm1363_vm14, %vm3535_vm3 }
 0xb6c   : > { %vm2132_vm9 = vmpackc.low %vm1400_vm1, %vm1399_vm4  ;;  %vm1344_vm4 = vcmp.eq.s32.totalorder %v4055_v59, %v3533_v51  ;;  %vm1345_vm1 = vcmp.eq.s32.totalorder %v4056_v38, %v3533_v51 }
 0xb6d   : > { %2180 = vmatprep.subr.msk.bf16.mxu0 %vm2132_vm9, %v2700_v50  ;;  %vm1383_vm13 = vmand %vm1346_vm0, %vm3535_vm3 }
 0xb6e   : > { %vm1384_vm12 = vmand %vm1347_vm15, %vm3535_vm3 }
 0xb6f   : > { %vm2116_vm6 = vmpackc.low %vm1384_vm12, %vm1383_vm13  ;;  %vm1358_vm13 = vcmp.eq.s32.totalorder %v4057_v55, %v3533_v51  ;;  %vm1359_vm12 = vcmp.eq.s32.totalorder %v4058_v36, %v3533_v51 }
 0xb70   : > { %2181 = vmatpush3.bf16.msk.msra.mxu0 %vm2116_vm6, %v2700_v50  ;;  %vm1397_vm14 = vmand %vm1360_vm5, %vm3535_vm3 }
 0xb71   : > { %vm1398_vm0 = vmand %vm1361_vm11, %vm3535_vm3 }
 0xb72   : > { %vm2134_vm9 = vmpackc.low %vm1398_vm0, %vm1397_vm14  ;;  %vm1342_vm14 = vcmp.eq.s32.totalorder %v4002_v6, %v3533_v51  ;;  %vm1343_vm0 = vcmp.eq.s32.totalorder %v4059_v60, %v3533_v51 }
 0xb73   : > { %2182 = vmatprep.subr.msk.bf16.mxu0 %vm2134_vm9, %v2700_v50  ;;  %vm1381_vm15 = vmand %vm1344_vm4, %vm3535_vm3 }
 0xb74   : > { %vm1382_vm5 = vmand %vm1345_vm1, %vm3535_vm3 }
 0xb75   : > { %vm2118_vm6 = vmpackc.low %vm1382_vm5, %vm1381_vm15  ;;  %vm2701_vm5 = vmmov 1  }
 0xb76   : > { %2183 = vmatpush3.bf16.msk.msra.mxu0 %vm2118_vm6, %v2700_v50  ;;  %vm1395_vm11 = vmand %vm1358_vm13, %vm3535_vm3  ;;  %vm794_vm6 = vcmp.gt.f32.partialorder %v2624_v20, 0.5 }
 0xb77   : > { %vm1396_vm4 = vmand %vm1359_vm12, %vm3535_vm3 }
 0xb78   : > { %vm2136_vm9 = vmpackc.low %vm1396_vm4, %vm1395_vm11 }
 0xb79   : > { %2184 = vmatprep.subr.msk.bf16.mxu0 %vm2136_vm9, %v2700_v50  ;;  %vm1379_vm1 = vmand %vm1342_vm14, %vm3535_vm3 }
 0xb7a   : > { %vm1380_vm15 = vmand %vm1343_vm0, %vm3535_vm3  ;;  %vm2702_vm0 = vmmov 0  }
 0xb7b   : > { %vm2120_vm13 = vmpackc.low %vm1380_vm15, %vm1379_vm1  ;;  %2214 = vmatprep.mubr.msk.f32.mxu1 %vm2702_vm0, %v4025_v25 }
 0xb7c   : > { %2185 = vmatpush3.bf16.msk.msra.mxu0 %vm2120_vm13, %v2700_v50  ;;  %vm1849_vm12 = vmxor %vm1031_vm2, %vm2701_vm5 }
 0xb7d   : > { %vm3719_vm11 = vmand %vm794_vm6, %vm1849_vm12 }
 0xb7f   : > { %1544 = vmatmul.mubr.bf16.vlgmr.msra.gmra.mxu0 %v2439_v37 }
 0xb80   : > { %1551 = vmatprep.mubr.bf16.mxu0 %v2105_v48 }
 0xb87   : > { %1552 = vmatmul.mubr.bf16.gmra.mxu0 %v2104_v23 }
 0xbcd   : > { %v3715_v51 = vpop.xlane.xlu1 %1336 }
 0xbce   : > { %vm1848_vm3 = vcmp.lt.f32.partialorder %v3715_v51, 0.5 }
 0xbcf   : > { %vm1894_vm14 = vmand %vm3719_vm11, %vm1848_vm3 }
 0xbd0   : > { %v3728_v28 = vsel %vm1894_vm14, 1.0, %v2620_v28   ;;  %vm3734_vm4 = vmor %vm1031_vm2, %vm1848_vm3 }
 0xbd1   : > { %v4062_v50 = vmov %v3728_v28  ;;  %vm1851_vm2 = vmxor %vm1848_vm3, %vm2701_vm5  ;;  %v4081_v20 = vsel %vm3734_vm4, 0.0, %v2624_v20  }
 0xbd2   : > { %vm3769_vm9 = vmand %vm3719_vm11, %vm1851_vm2  ;;  %vm1898_vm4 = vcmp.gt.f32.partialorder (%p3836_p6), %v4062_v50, 0.5 }
 0xc3f   : > { %v2186_v45 = vpop.f32.mrf.mxu0 }
 0xc41   : > { %v2187_v31 = vpop.f32.mrf.mxu0 }
 0xc42   : > { %v2188_v56 = vadd.f32 %v2187_v31, %v2186_v45 }
 0xc43   : > { %v2189_v28 = vpop.f32.mrf.mxu0 }
 0xc44   : > { %v1559_v53 = vsub.f32 %v2188_v56, %v4065_v2 }
 0xc45   : > { %v2190_v29 = vpop.f32.mrf.mxu0 }
 0xc46   : > { %v1564_v57 = vmul.f32 %v1563_v32, %v1559_v53  ;;  %v2191_v49 = vadd.f32 %v2190_v29, %v2189_v28 }
 0xc47   : > { %v2192_v30 = vpop.f32.mrf.mxu0 }
 0xc48   : > { %v1565_v42 = vmul.f32 %v1564_v57, %v1564_v57  ;;  %v1578_v59 = vmul.f32 %v2191_v49, %v1564_v57  ;;  %v1592_v38 = vmul.f32 %v2191_v49, %v2191_v49 }
 0xc49   : > { %v2193_v55 = vpop.f32.mrf.mxu0 }
 0xc4a   : > { %v1579_v36 = vrot.slane %v1578_v59, 4  ;;  %v1593_v60 = vrot.slane %v1592_v38, 4  ;;  %v2194_v47 = vadd.f32 %v2193_v55, %v2192_v30  ;;  %v1566_v37 = vrot.slane %v1565_v42, 4 }
 0xc4b   : > { %v2195_v48 = vpop.f32.mrf.mxu0 }
 0xc4c   : > { %v1580_v23 = vadd.f32 %v1579_v36, %v1578_v59  ;;  %v1594_v45 = vadd.f32 %v1593_v60, %v1592_v38  ;;  %v1585_v31 = vmul.f32 %v2194_v47, %v1564_v57  ;;  %v1600_v56 = vmul.f32 %v2194_v47, %v2191_v49 }
 0xc4d   : > { %v1608_v2 = vmul.f32 %v2194_v47, %v2194_v47  ;;  %v2196_v33 = vpop.f32.mrf.mxu0  ;;  %v1567_v4 = vadd.f32 %v1566_v37, %v1565_v42 }
 0xc4e   : > { %v1595_v5 = vrot.slane %v1594_v45, 2  ;;  %v1586_v53 = vrot.slane %v1585_v31, 4  ;;  %v1601_v28 = vrot.slane %v1600_v56, 4  ;;  %v1581_v32 = vrot.slane %v1580_v23, 2 }
 0xc4f   : > { %v1609_v29 = vrot.slane %v1608_v2, 4  ;;  %v1568_v6 = vrot.slane %v1567_v4, 2 }
 0xc50   : > { %v1596_v7 = vadd.f32 %v1595_v5, %v1594_v45  ;;  %v1587_v10 = vadd.f32 %v1586_v53, %v1585_v31  ;;  %v1602_v12 = vadd.f32 %v1601_v28, %v1600_v56  ;;  %v1582_v13 = vadd.f32 %v1581_v32, %v1580_v23 }
 0xc51   : > { %v1610_v30 = vadd.f32 %v1609_v29, %v1608_v2  ;;  %v1569_v55 = vadd.f32 %v1568_v6, %v1567_v4 }
 0xc52   : > { %v1603_v48 = vrot.slane %v1602_v12, 2  ;;  %v1583_v59 = vrot.slane %v1582_v13, 1  ;;  %v1588_v38 = vrot.slane %v1587_v10, 2  ;;  %v1597_v57 = vrot.slane %v1596_v7, 1 }
 0xc53   : > { %v1611_v49 = vrot.slane %v1610_v30, 2  ;;  %v1570_v36 = vrot.slane %v1569_v55, 1 }
 0xc54   : > { %v1604_v33 = vadd.f32 %v1603_v48, %v1602_v12  ;;  %v1589_v42 = vadd.f32 %v1588_v38, %v1587_v10  ;;  %v1584_v15 = vadd.f32 %v1583_v59, %v1582_v13  ;;  %v1598_v17 = vadd.f32 %v1597_v57, %v1596_v7 }
 0xc55   : > { %v1612_v60 = vadd.f32 %v1611_v49, %v1610_v30  ;;  %v1571_v47 = vadd.f32 %v1570_v36, %v1569_v55  ;;  %v1575_v55 = vmax.f32 %v3715_v51, 1.0  ;;  %v1859_v48 = vmul.f32 0.1, %v2628_v63 }
 0xc56   : > { %v1605_v37 = vrot.slane %v1604_v33, 1  ;;  %v1590_v16 = vrot.slane %v1589_v42, 1  ;;  %v1684_v4 = vmul.f32 %v3621_v9, %v1584_v15  ;;  %v1599_v10 = vmul.f32 %v3526_v35, %v1598_v17 }
 0xc57   : > { %v1613_v5 = vrot.slane %v1612_v60, 1  ;;  %v1572_v45 = vmul.f32 0.5, %v1571_v47  ;;  %2464 = vrcp.f32 %v1575_v55  ;;  %v1860_v59 = vmax.f32 %v1859_v48, 0.001 }
 0xc58   : > { %v1591_v31 = vadd.f32 %v1590_v16, %v1589_v42  ;;  %v1606_v23 = vadd.f32 %v1605_v37, %v1604_v33  ;;  %v1693_v32 = vrot.slane %v1599_v10, %v2778_v11  ;;  %v4075_v10 = vld [vmem:[#allocation55_spill] sm:$0xff] }
 0xc59   : > { %1573 = vadd.xlane.f32.xlu0 %v1572_v45  ;;  %v1614_v6 = vadd.f32 %v1613_v5, %v1612_v60  ;;  %v1861_v57 = vmin.f32 %v1860_v59, 1.0 }
 0xc5a   : > { %v1685_v56 = vmul.f32 %v3615_v27, %v1591_v31  ;;  %v1607_v2 = vmul.f32 %v3526_v35, %v1606_v23  ;;  %v1694_v17 = vmul.f32 %v1693_v32, %v3621_v9  ;;  %v4078_v32 = vld [vmem:[#allocation53_spill] sm:$0xff] }
 0xc5b   : > { %v1615_v12 = vmul.f32 %v3526_v35, %v1614_v6 }
 0xc5c   : > { %v1686_v53 = vadd.f32 %v1685_v56, %v1684_v4  ;;  %v1698_v13 = vrot.slane %v1607_v2, %v2778_v11  ;;  %v4074_v4 = vld [vmem:[#allocation54_spill] sm:$0xff] }
 0xc5d   : > { %v1705_v7 = vrot.slane %v1615_v12, %v2778_v11 }
 0xc5e   : > { %v1687_v16 = vsel %vm608_vm10, %v1686_v53, 0.0  ;;  %v1701_v28 = vmul.f32 %v1698_v13, %v3621_v9  ;;  %v1699_v30 = vmul.f32 %v1698_v13, %v3615_v27 }
 0xc5f   : > { %1688 = vadd.xlane.f32.xlu1 %v1687_v16  ;;  %v1706_v15 = vmul.f32 %v1705_v7, %v3615_v27 }
 0xc60   : > { %v1700_v35 = vadd.f32 %v1699_v30, %v1694_v17 }
 0xc61   : > { %v1707_v29 = vadd.f32 %v1706_v15, %v1701_v28 }
 0xc63   : > { %2215 = vmatmul.mubr.f32.vlgmr.msra.gmra.mxu1 %v1707_v29 }
 0xc64   : > { %2218 = vmatpush3.xpose.msra.mxu1 %v3621_v9  ;;  %2219 = vmatprep.mubr.msk.f32.mxu1 %vm2702_vm0, %v4025_v25  ;;  %v2465_v38 = vpop.eup %2464  ;;  %v2703_v9 = vmov 0.1  }
 0xc67   : > { %2220 = vmatmul.mubr.f32.vlgmr.msra.gmra.mxu1 %v1700_v35 }
 0xce2   : > { %v1574_v27 = vpop.xlane.xlu0 %1573 }
 0xce3   : > { %v1577_v49 = vmul.f32 %v2465_v38, %v1574_v27 }
 0xce5   : > { %vm1853_vm1 = vcmp.gt.f32.partialorder %v1577_v49, %v2640_v41  ;;  %vm1866_vm12 = vcmp.lt.f32.partialorder %v1577_v49, %v2636_v14 }
 0xce6   : > { %v1854_v36 = vsel %vm1853_vm1, 10.0, %v2703_v9  ;;  %v1862_v33 = vsel %vm1853_vm1, %v1861_v57, 1.0  ;;  %vm1864_vm15 = vmxor %vm1853_vm1, %vm2701_vm5  ;;  %vm1916_vm1 = vcmask (%p3836_p6), 26624  }
 0xce7   : > { %v1855_v42 = vmul.f32 %v2632_v1, %v1854_v36  ;;  %v1863_v63 = vsel %vm3769_vm9, %v1862_v33, %v2628_v63   ;;  %vm3781_vm13 = vmand %vm3769_vm9, %vm1864_vm15 }
 0xce8   : > { %vm3788_vm6 = vmand %vm3781_vm13, %vm1866_vm12  ;;  %v1891_v41 = vsel %vm3781_vm13, %v1577_v49, %v2640_v41   ;;  %v1880_v60 = vsel %vm3781_vm13, 1, %v4013_v8  ;;  %v1689_v31 = vpop.xlane.xlu1 %1688 }
 0xce9   : > { %v1856_v47 = vmax.f32 %v1855_v42, 1e-06  ;;  %v1868_v37 = vsel %vm3788_vm6, 1, %v4013_v8  ;;  %v1879_v14 = vsel %vm3788_vm6, %v1577_v49, %v2636_v14   ;;  %v1888_v5 = vrot.slane %v1880_v60, %v2778_v11 }
 0xcea   : > { %2258 = vpush %v1868_v37  ;;  %v1876_v45 = vrot.slane %v1868_v37, %v2778_v11 }
 0xceb   : > { %v1857_v23 = vmin.f32 %v1856_v47, 10000.0  ;;  %2260 = vpush %v1880_v60  ;;  %vm3806_vm5 = vcmp.eq.s32.totalorder %v1888_v5, 1 }
 0xcec   : > { %vm1877_vm3 = vcmp.eq.s32.totalorder %v1876_v45, 1  ;;  %v1890_v8 = vsel %vm3806_vm5, %v3465_v61, %v2660_v3   ;;  %v1892_v58 = vsel %vm3806_vm5, %v1689_v31, %v2648_v58  }
 0xced   : > { %v1858_v1 = vsel %vm3769_vm9, %v1857_v23, %v2632_v1   ;;  %v1878_v56 = vsel %vm1877_vm3, %v3465_v61, %v4074_v4   ;;  %v4084_v3 = vmov %v1890_v8  ;;  %vm1914_vm9 = vcmask (%p3836_p6), 23552  }
 0xcee   : > { %v4082_v60 = vmov %v1878_v56 }
 0xd1b   : > { %s2259_s1 = spop %2258 }
 0xd1c   : > { %v1870_v2 = vstv %s2259_s1  ;;  %s2261_s5 = spop %2260 }
 0xd1d   : > { %vm1871_vm11 = vcmp.eq.s32.totalorder %v1870_v2, 1  ;;  %v1882_v12 = vstv %s2261_s5 }
 0xd1e   : > { %v1872_v53 = vsel %vm1871_vm11, %v3458_v62, %v4075_v10   ;;  %vm3824_vm14 = vcmp.eq.s32.totalorder %v1882_v12, 1 }
 0xd1f   : > { %v1884_v13 = vsel %vm3824_vm14, %v3458_v62, %v2664_v0   ;;  %v4083_v30 = vmov %v1872_v53 }
 0xd20   : > { %v4085_v0 = vmov %v1884_v13 }
 0xd21   :  { %v4086_v0 = vmov (%p3836_p6), 0  }
 0xd22   :  { %v1899_v62 = vsel (%p3836_p6), %vm1898_vm4, 1, %v4086_v0 }
 0xd23   : > { %v1774_v7 = vpop.f32.mrf.mxu1  ;;  %v1907_v52 = vrot.slane (%p3836_p6), %v1899_v62, %v2778_v11  ;;  %2262 = vpush (%p3836_p6), %v1899_v62 }
 0xd25   : > { %v2216_v16 = vpop.f32.mrf.mxu1  ;;  %vm1908_vm0 = vcmp.eq.s32.totalorder (%p3836_p6), %v1907_v52, 1 }
 0xd26   :  { %780 = sbr.rel (!%p3836_p6) target bundleno = 714 (0x2ca), region = 67  ;;  %v1909_v29 = vsel (%p3836_p6), %vm1908_vm0, %v1890_v8, %v1878_v56 }
 0xd27   : > { %v1844_v61 = vpop.f32.mrf.mxu1  ;;  %1911 = vrot.lane.b32.xlu0 (%p3836_p6), %v1909_v29, %s2704_s20 }
 0xd28   : > { %v1845_v28 = vadd.f32 %v1844_v61, %v1774_v7 }
 0xd29   : > { %v2221_v15 = vpop.f32.mrf.mxu1 }
 0xd2a   : > { %v1893_v33 = vsel %vm3824_vm14, %v1845_v28, %v4078_v32   ;;  %v4080_v28 = vmov %v4062_v50 }
 0xd54   :  { %s2263_s22 = spop %2262 }
 0xd55   :  { %v1901_v17 = vstv %s2263_s22 }
 0xd56   :  { %vm1902_vm2 = vcmp.eq.s32.totalorder %v1901_v17, 1 }
 0xd57   :  { %v1903_v35 = vsel %vm1902_vm2, %v1884_v13, %v1872_v53 }
 0xd99   :  { %v1912_v55 = vpop.permute.xlu0 %1911 }
 0xd9a   :  { %v1915_v18 = vsel %vm1914_vm9, %v1903_v35, %v1912_v55 }
 0xd9b   :  { %1917 = vst.msk [vmem:[#allocation10] sm:$0x7] %vm1916_vm1, %v1915_v18 }
 0xd9c   :  { %2549 = shalt.err (!%p2546_p11)
}
 0xd9d   :  { %1927 = dma.vmem_to_hbm [thread:$0]  %s1925_s27, 64, %s3885_s6, [#allocation4]  }
 0xd9e   :  { %2616 = dma.done.wait [#allocation4], 64  }
 0xd9f   :  { %2617 = vsyncadd [#allocation4], 4294967232 }
 0xda0   :  { %1931 = vsyncpa [#allocation3], 1 }
 0xda1   :  { %1932 = vsyncpa [#allocation8], 1 }
 0xda2   :  { %1933 = vsyncpa [#allocation4], 1 }
 0xda3   :  { %1934 = vsyncpa [#allocation5], 1 }

</bundles_post_ra>
